<compile_context>
chip_gen: v7x
topology: tpu7x:2x2x1
jax: 0.10.0
libtpu: 0.0.40
codegen_flags: <defaults>
</compile_context>

<pallas_src>
import functools

import jax
import jax.numpy as jnp
from jax import lax
from jax.experimental import pallas as pl
from jax.experimental.pallas import tpu as pltpu


def _round_up(x, m):
    return (x + m - 1) // m * m


# ----------------------------------------------------------------------------
# Matmul kernel: out = act(W @ A + bias).
# K is never tiled here (K <= 640), so there is no accumulator: one dot and
# the fused epilogue (bias / ReLU / tanh / cast) per grid step.
# ----------------------------------------------------------------------------
def _mm_kernel(*refs, act, has_bias):
    if has_bias:
        w_ref, a_ref, b_ref, o_ref = refs
    else:
        w_ref, a_ref, o_ref = refs
        b_ref = None
    r = jnp.dot(w_ref[...], a_ref[...], preferred_element_type=jnp.float32)
    if b_ref is not None:
        r = r + b_ref[...]
    if act == "relu":
        r = jnp.maximum(r, 0.0)
    elif act == "tanh":
        r = jnp.tanh(r)
    o_ref[...] = r.astype(o_ref.dtype)


_VMEM_BUDGET = 24 * 1024 * 1024


def matmul_bias_act(w_pad, a, bias_pad=None, act="none", out_dtype=jnp.bfloat16):
    """act(w_pad @ pad(a) + bias).

    w_pad: (np_, kp) bf16, prepared (padded/cast) once at init.
    a:     (K, M) activation matrix, K <= kp; returns (np_, round_up(M,128)).
    """
    np_, kp = w_pad.shape
    k, m = a.shape
    assert k <= kp
    mp = _round_up(m, 128)
    a_p = jnp.pad(a.astype(jnp.bfloat16), ((0, kp - k), (0, mp - m)))

    # Whole-array M tile unless the (double-buffered) VMEM estimate is too big.
    def vmem_bytes(t):
        return (2 * kp * t * 2          # A tile, double buffered, bf16
                + np_ * kp * 2          # W (same block every step)
                + 2 * np_ * t * 4       # out tile, double buffered (<= f32)
                + np_ * 4)              # bias
    tm = mp
    while tm > 128 and tm % 256 == 0 and vmem_bytes(tm) > _VMEM_BUDGET:
        tm //= 2
    nm = mp // tm
    # TODO(synk): on v7x (2 TensorCores) split tm when the per-tile matmul is
    # large enough to amortize the ~0.35us grid-step overhead; never on v5e/v6e.

    has_bias = bias_pad is not None
    in_specs = [
        pl.BlockSpec((np_, kp), lambda i: (0, 0)),
        pl.BlockSpec((kp, tm), lambda i: (0, i)),
    ]
    args = [w_pad, a_p]
    if has_bias:
        in_specs.append(pl.BlockSpec((np_, 1), lambda i: (0, 0)))
        args.append(bias_pad)

    return pl.pallas_call(
        functools.partial(_mm_kernel, act=act, has_bias=has_bias),
        out_shape=jax.ShapeDtypeStruct((np_, mp), out_dtype),
        grid=(nm,),
        in_specs=in_specs,
        out_specs=pl.BlockSpec((np_, tm), lambda i: (0, i)),
        compiler_params=pltpu.CompilerParams(
            dimension_semantics=("parallel",),
            vmem_limit_bytes=32 * 1024 * 1024,
        ),
    )(*args)


# ----------------------------------------------------------------------------
# BatchNorm (training-mode batch statistics) + optional fused ReLU on (C, M).
# The whole slab is at most a few hundred KiB, so stats and normalization run
# in a single un-gridded pallas_call: one read, one write.
# ----------------------------------------------------------------------------
def _bn_kernel(x_ref, g_ref, b_ref, o_ref, *, inv_m, eps, relu):
    x = x_ref[...].astype(jnp.float32)
    mean = jnp.sum(x, axis=1, keepdims=True) * inv_m
    var = jnp.sum(x * x, axis=1, keepdims=True) * inv_m - mean * mean  # biased
    scale = g_ref[...] * lax.rsqrt(var + eps)
    shift = b_ref[...] - mean * scale
    y = x * scale + shift
    if relu:
        y = jnp.maximum(y, 0.0)
    o_ref[...] = y.astype(o_ref.dtype)


def batchnorm(y_cnhw, gamma_pad, beta_pad, relu=False, eps=1e-5):
    c, n, h, w = y_cnhw.shape
    cpad = gamma_pad.shape[0]
    m = n * h * w
    mp = _round_up(m, 128)
    x2 = jnp.pad(y_cnhw.reshape(c, m), ((0, cpad - c), (0, mp - m)))
    # Padded lanes/channels are zero: they contribute 0 to sum/sumsq and we
    # divide by the true m, so the statistics are exact.
    out = pl.pallas_call(
        functools.partial(_bn_kernel, inv_m=1.0 / m, eps=eps, relu=relu),
        out_shape=jax.ShapeDtypeStruct((cpad, mp), jnp.bfloat16),
    )(x2, gamma_pad, beta_pad)
    return out[:c, :m].reshape(c, n, h, w)


# ----------------------------------------------------------------------------
# ConvTranspose2d lowering (CNHW activations).
# ----------------------------------------------------------------------------
def _im2col(x_cnhw, window, pad):
    # TODO(synk): fuse this patch extraction into the matmul kernel (whole x
    # slab resident in VMEM, shifted in-kernel reads) to drop the HBM im2col
    # buffer and the stack kernel per layer.
    c, n, h, w = x_cnhw.shape
    oh = h + 2 * pad - window + 1
    ow = w + 2 * pad - window + 1
    xp = jnp.pad(x_cnhw, ((0, 0), (0, 0), (pad, pad), (pad, pad)))
    patches = jnp.stack(
        [xp[:, :, eh:eh + oh, ew:ew + ow]
         for eh in range(window) for ew in range(window)], axis=1)
    return patches.reshape(c * window * window, n * oh * ow), oh, ow


def conv_transpose_s1(x, w_pad, b_pad, cout, k, padding, act):
    """ConvTranspose2d(stride=1) == flipped-kernel conv with pad = k-1-padding."""
    n = x.shape[1]
    a, oh, ow = _im2col(x, k, k - 1 - padding)
    out = matmul_bias_act(w_pad, a, b_pad, act=act)
    return out[:cout, :n * oh * ow].reshape(cout, n, oh, ow)


def conv_transpose_s2(x, w_pad, b_pad, cout, act, out_dtype=jnp.bfloat16):
    """ConvTranspose2d(k=4, s=2, p=1): sub-pixel decomposition.

    One 3x3 conv producing 4*cout channels (structural zeros baked into the
    prepared weight matrix) followed by a pixel shuffle.
    """
    n = x.shape[1]
    a, oh, ow = _im2col(x, 3, 1)
    out = matmul_bias_act(w_pad, a, b_pad, act=act, out_dtype=out_dtype)
    y = out[:4 * cout, :n * oh * ow].reshape(2, 2, cout, n, oh, ow)
    return jnp.transpose(y, (2, 3, 4, 0, 5, 1)).reshape(cout, n, 2 * oh, 2 * ow)


# ----------------------------------------------------------------------------
# Parameters: raw (PyTorch layout) init + one-time Pallas-layout preparation.
# ----------------------------------------------------------------------------
def init_generator_params(key, z_dim, img_channel, d):
    """Raw params, PyTorch layout: ConvTranspose2d weight = (Cin, Cout, kH, kW)."""
    ks = jax.random.split(key, 8)
    p = {}
    p["w1"] = 0.05 * jax.random.normal(ks[0], (z_dim, d * 16, 4, 4), jnp.float32)
    p["b1"] = jnp.zeros((d * 16,), jnp.float32)
    p["g1"] = jnp.ones((d * 16,), jnp.float32)
    p["be1"] = jnp.zeros((d * 16,), jnp.float32)
    chans = [d * 16, d * 8, d * 4, d * 2]
    for i, (ci, co) in enumerate(zip(chans[:-1], chans[1:]), start=2):
        p[f"w{i}"] = 0.05 * jax.random.normal(ks[i], (ci, co, 4, 4), jnp.float32)
        p[f"g{i}"] = jnp.ones((co,), jnp.float32)
        p[f"be{i}"] = jnp.zeros((co,), jnp.float32)
    p["w5"] = 0.05 * jax.random.normal(ks[6], (d * 2, img_channel, 4, 4), jnp.float32)
    p["b5"] = jnp.zeros((img_channel,), jnp.float32)
    return p


def _pad_weight_bf16(w_mat):
    r, c = w_mat.shape
    rp, cp = _round_up(r, 16), _round_up(c, 128)   # bf16 min tile is (16, 128)
    return jnp.pad(w_mat, ((0, rp - r), (0, cp - c))).astype(jnp.bfloat16)


def _pad_col_f32(v, rows_pad):
    v = v.reshape(-1, 1).astype(jnp.float32)
    return jnp.pad(v, ((0, rows_pad - v.shape[0]), (0, 0)))


def _subpixel_weight(w_pt):
    """(Cin, Cout, 4, 4) ConvT(s=2, p=1) weight -> (4*Cout, Cin*9) conv matrix.

    out[co, 2m+r, 2q+c] = sum_{ci, eh in {r,r+1}, ew in {c,c+1}}
        x[ci, m+eh-1, q+ew-1] * w_pt[ci, co, 3+r-2eh, 3+c-2ew]
    """
    cin, cout, k, _ = w_pt.shape
    assert k == 4
    w_big = jnp.zeros((2, 2, cout, cin, 3, 3), jnp.float32)
    for r in (0, 1):                      # runs once, at init
        for c in (0, 1):
            for eh in (r, r + 1):
                for ew in (c, c + 1):
                    w_big = w_big.at[r, c, :, :, eh, ew].set(
                        w_pt[:, :, 3 + r - 2 * eh, 3 + c - 2 * ew].T)
    return w_big.reshape(4 * cout, cin * 9)


def prepare_generator_params(raw):
    """One-time conversion to Pallas matmul layout (padded, bf16)."""
    p = {}
    cin, cout = raw["w1"].shape[0], raw["w1"].shape[1]
    w1 = jnp.transpose(raw["w1"], (1, 0, 2, 3))[:, :, ::-1, ::-1]
    p["w1"] = _pad_weight_bf16(w1.reshape(cout, cin * 16))
    p["b1"] = _pad_col_f32(raw["b1"], p["w1"].shape[0])
    p["g1"] = _pad_col_f32(raw["g1"], _round_up(cout, 16))
    p["be1"] = _pad_col_f32(raw["be1"], _round_up(cout, 16))
    for i in (2, 3, 4, 5):
        w = raw[f"w{i}"]
        cout = w.shape[1]
        p[f"w{i}"] = _pad_weight_bf16(_subpixel_weight(w))
        if i == 5:
            b_big = jnp.broadcast_to(raw["b5"], (2, 2, cout)).reshape(4 * cout)
            p["b5"] = _pad_col_f32(b_big, p["w5"].shape[0])
        else:
            p[f"g{i}"] = _pad_col_f32(raw[f"g{i}"], _round_up(cout, 16))
            p[f"be{i}"] = _pad_col_f32(raw[f"be{i}"], _round_up(cout, 16))
    return p


# ----------------------------------------------------------------------------
# Forward
# ----------------------------------------------------------------------------
def make_generator_forward(z_dim, img_channel, d):
    c1, c2, c3, c4 = 16 * d, 8 * d, 4 * d, 2 * d

    def forward(p, x_nchw):
        x = jnp.transpose(x_nchw, (1, 0, 2, 3)).astype(jnp.bfloat16)   # CNHW
        # ConvT(s=1, p=0) + ReLU (fused in matmul epilogue), then BatchNorm.
        y = conv_transpose_s1(x, p["w1"], p["b1"], c1, k=4, padding=0, act="relu")
        y = batchnorm(y, p["g1"], p["be1"], relu=False)
        # Three _block()s: ConvT(s=2, p=1, bias=False) -> BN -> ReLU (fused in BN).
        for i, co in zip((2, 3, 4), (c2, c3, c4)):
            y = conv_transpose_s2(y, p[f"w{i}"], None, co, act="none")
            y = batchnorm(y, p[f"g{i}"], p[f"be{i}"], relu=True)
        # Final ConvT(s=2, p=1) + Tanh (fused in matmul epilogue), f32 output.
        y = conv_transpose_s2(y, p["w5"], p["b5"], img_channel, act="tanh",
                              out_dtype=jnp.float32)
        return jnp.transpose(y, (1, 0, 2, 3)).astype(jnp.float32)      # -> NCHW

    return forward


# ----------------------------------------------------------------------------
# Pure-JAX reference (lax.conv_general_dilated transposed-conv identity).
# ----------------------------------------------------------------------------
def reference_forward(raw, x, activation_dtype=jnp.float32, eps=1e-5):
    """activation_dtype=float32  -> PyTorch-equivalent f32 numerics.
    activation_dtype=bfloat16 -> mimics the kernel pipeline's bf16 storage and
    bf16 MXU inputs (f32 accumulation): tight parity check of the lowering."""
    dt = activation_dtype

    def conv_t(xx, w, b, stride, padding):
        k = w.shape[2]
        w_flip = jnp.transpose(w, (1, 0, 2, 3))[:, :, ::-1, ::-1].astype(dt)
        out = lax.conv_general_dilated(
            xx.astype(dt), w_flip, window_strides=(1, 1),
            padding=[(k - 1 - padding, k - 1 - padding)] * 2,
            lhs_dilation=(stride, stride),
            dimension_numbers=("NCHW", "OIHW", "NCHW"),
            preferred_element_type=jnp.float32)
        if b is not None:
            out = out + b.reshape(1, -1, 1, 1)
        return out

    def bn(xx, g, be, relu):
        xf = xx.astype(jnp.float32)
        mean = jnp.mean(xf, axis=(0, 2, 3), keepdims=True)
        var = jnp.mean(xf * xf, axis=(0, 2, 3), keepdims=True) - mean * mean
        y = (xf - mean) * lax.rsqrt(var + eps) * g.reshape(1, -1, 1, 1) \
            + be.reshape(1, -1, 1, 1)
        if relu:
            y = jnp.maximum(y, 0.0)
        return y.astype(dt)

    y = jnp.maximum(conv_t(x, raw["w1"], raw["b1"], 1, 0), 0.0).astype(dt)
    y = bn(y, raw["g1"], raw["be1"], relu=False)
    for i in (2, 3, 4):
        y = bn(conv_t(y, raw[f"w{i}"], None, 2, 1).astype(dt),
               raw[f"g{i}"], raw[f"be{i}"], relu=True)
    y = conv_t(y, raw["w5"], raw["b5"], 2, 1)
    return jnp.tanh(y.astype(jnp.float32))


if __name__ == "__main__":
    z_dim, img_channel, depth_scaling, batch = 8, 3, 4, 2
    key = jax.random.PRNGKey(0)
    k_param, k_x = jax.random.split(key)

    raw = init_generator_params(k_param, z_dim, img_channel, depth_scaling)
    x = jax.random.normal(k_x, (batch, z_dim, 1, 1), jnp.float32)      # latent

    params = prepare_generator_params(raw)          # one-time weight prep
    forward = jax.jit(make_generator_forward(z_dim, img_channel, depth_scaling))
    out = jax.block_until_ready(forward(params, x))

    assert out.shape == (batch, img_channel, 64, 64), out.shape
    assert bool(jnp.all(jnp.isfinite(out)))
    assert float(jnp.max(jnp.abs(out))) <= 1.0 + 1e-5        # tanh output range

    # Parity: (a) bf16-matched reference validates the transposed-conv
    # lowering / pixel shuffle / BN math; (b) pure-f32 (PyTorch-equivalent)
    # reference bounds the deliberate bf16 deviation.
    ref_match = reference_forward(raw, x, activation_dtype=jnp.bfloat16)
    ref_f32 = reference_forward(raw, x, activation_dtype=jnp.float32)
    err_match = float(jnp.max(jnp.abs(out - ref_match)))
    err_f32 = float(jnp.max(jnp.abs(out - ref_f32)))
    assert err_match < 2e-2, f"lowering parity failed: {err_match}"
    assert err_f32 < 0.25, f"bf16 deviation too large: {err_f32}"

    print("KERNEL_OK")
</pallas_src>

<mosaic_0001>
module attributes {stable_mosaic.version = 11 : i64} {
  func.func @_mm_kernel(%arg0: i32, %arg1: memref<64x128xbf16, #tpu.memory_space<vmem>>, %arg2: memref<128x128xbf16, #tpu.memory_space<vmem>>, %arg3: memref<64x1xf32, #tpu.memory_space<vmem>>, %arg4: memref<64x128xbf16, #tpu.memory_space<vmem>>) attributes {dimension_semantics = [#tpu.dimension_semantics<parallel>], iteration_bounds = array<i64: 1>, scalar_prefetch = 0 : i64, scratch_operands = 0 : i64, tpu.core_type = #tpu.core_type<tc>, window_params = [{pipeline_mode = #tpu.pipeline_mode<synchronous>, transform_indices = @transform_0, window_bounds = array<i64: 64, 128>}, {transform_indices = @transform_1, window_bounds = array<i64: 128, 128>}, {pipeline_mode = #tpu.pipeline_mode<synchronous>, transform_indices = @transform_2, window_bounds = array<i64: 64, 1>}, {transform_indices = @transform_3, window_bounds = array<i64: 64, 128>}]} {
    %c0 = arith.constant 0 : index
    %c0_0 = arith.constant 0 : index
    %0 = vector.load %arg1[%c0, %c0_0] : memref<64x128xbf16, #tpu.memory_space<vmem>>, vector<64x128xbf16>
    %c0_1 = arith.constant 0 : index
    %c0_2 = arith.constant 0 : index
    %1 = vector.load %arg2[%c0_1, %c0_2] : memref<128x128xbf16, #tpu.memory_space<vmem>>, vector<128x128xbf16>
    %cst = arith.constant dense<0.000000e+00> : vector<64x128xf32>
    %2 = tpu.matmul %0, %1, %cst {dimension_numbers = #tpu.dot_dimension_numbers<[1], [0], [0], [1], [0, 0, 1, 1], [], []>} : vector<64x128xbf16>, vector<128x128xbf16>, vector<64x128xf32> -> vector<64x128xf32>
    %c0_3 = arith.constant 0 : index
    %c0_4 = arith.constant 0 : index
    %3 = vector.load %arg3[%c0_3, %c0_4] : memref<64x1xf32, #tpu.memory_space<vmem>>, vector<64x1xf32>
    %4 = vector.broadcast %3 : vector<64x1xf32> to vector<64x128xf32>
    %5 = arith.addf %2, %4 : vector<64x128xf32>
    %cst_5 = arith.constant 0.000000e+00 : f32
    %6 = vector.broadcast %cst_5 : f32 to vector<64x128xf32>
    %7 = arith.maximumf %5, %6 : vector<64x128xf32>
    %8 = arith.truncf %7 : vector<64x128xf32> to vector<64x128xbf16>
    %c0_6 = arith.constant 0 : index
    %c0_7 = arith.constant 0 : index
    %9 = vector.load %arg4[%c0_6, %c0_7] : memref<64x128xbf16, #tpu.memory_space<vmem>>, vector<64x128xbf16>
    tpu.vector_store %arg4[%c0_6, %c0_7], %8 {strides = array<i32>} : memref<64x128xbf16, #tpu.memory_space<vmem>>, vector<64x128xbf16>,
    return
  }
  func.func @transform_0(%arg0: i32) -> (i32, i32) {
    %c0_i32 = arith.constant 0 : i32
    %c0_i32_0 = arith.constant 0 : i32
    %c0_i32_1 = arith.constant 0 : i32
    return %c0_i32, %c0_i32_0 : i32, i32
  }
  func.func @transform_1(%arg0: i32) -> (i32, i32) {
    %c0_i32 = arith.constant 0 : i32
    %c0_i32_0 = arith.constant 0 : i32
    return %c0_i32, %arg0 : i32, i32
  }
  func.func @transform_2(%arg0: i32) -> (i32, i32) {
    %c0_i32 = arith.constant 0 : i32
    %c0_i32_0 = arith.constant 0 : i32
    %c0_i32_1 = arith.constant 0 : i32
    return %c0_i32, %c0_i32_0 : i32, i32
  }
  func.func @transform_3(%arg0: i32) -> (i32, i32) {
    %c0_i32 = arith.constant 0 : i32
    %c0_i32_0 = arith.constant 0 : i32
    return %c0_i32, %arg0 : i32, i32
  }
}

module attributes {stable_mosaic.version = 11 : i64} {
  func.func @_bn_kernel(%arg0: memref<64x128xbf16, #tpu.memory_space<vmem>>, %arg1: memref<64x1xf32, #tpu.memory_space<vmem>>, %arg2: memref<64x1xf32, #tpu.memory_space<vmem>>, %arg3: memref<64x128xbf16, #tpu.memory_space<vmem>>) attributes {dimension_semantics = [], scalar_prefetch = 0 : i64, scratch_operands = 0 : i64, tpu.core_type = #tpu.core_type<tc>} {
    %c0 = arith.constant 0 : index
    %c0_0 = arith.constant 0 : index
    %0 = vector.load %arg0[%c0, %c0_0] : memref<64x128xbf16, #tpu.memory_space<vmem>>, vector<64x128xbf16>
    %1 = arith.extf %0 : vector<64x128xbf16> to vector<64x128xf32>
    %cst = arith.constant dense<0.000000e+00> : vector<64xf32>
    %2 = vector.multi_reduction <add>, %1, %cst [1] : vector<64x128xf32> to vector<64xf32>
    %3 = vector.shape_cast %2 : vector<64xf32> to vector<64x1xf32>
    %cst_1 = arith.constant 3.125000e-02 : f32
    %4 = vector.broadcast %cst_1 : f32 to vector<64x1xf32>
    %5 = arith.mulf %3, %4 : vector<64x1xf32>
    %6 = arith.mulf %1, %1 : vector<64x128xf32>
    %cst_2 = arith.constant dense<0.000000e+00> : vector<64xf32>
    %7 = vector.multi_reduction <add>, %6, %cst_2 [1] : vector<64x128xf32> to vector<64xf32>
    %8 = vector.shape_cast %7 : vector<64xf32> to vector<64x1xf32>
    %cst_3 = arith.constant 3.125000e-02 : f32
    %9 = vector.broadcast %cst_3 : f32 to vector<64x1xf32>
    %10 = arith.mulf %8, %9 : vector<64x1xf32>
    %11 = arith.mulf %5, %5 : vector<64x1xf32>
    %12 = arith.subf %10, %11 : vector<64x1xf32>
    %c0_4 = arith.constant 0 : index
    %c0_5 = arith.constant 0 : index
    %13 = vector.load %arg1[%c0_4, %c0_5] : memref<64x1xf32, #tpu.memory_space<vmem>>, vector<64x1xf32>
    %cst_6 = arith.constant 9.99999974E-6 : f32
    %14 = vector.broadcast %cst_6 : f32 to vector<64x1xf32>
    %15 = arith.addf %12, %14 : vector<64x1xf32>
    %16 = math.rsqrt %15 : vector<64x1xf32>
    %17 = arith.mulf %13, %16 : vector<64x1xf32>
    %c0_7 = arith.constant 0 : index
    %c0_8 = arith.constant 0 : index
    %18 = vector.load %arg2[%c0_7, %c0_8] : memref<64x1xf32, #tpu.memory_space<vmem>>, vector<64x1xf32>
    %19 = arith.mulf %5, %17 : vector<64x1xf32>
    %20 = arith.subf %18, %19 : vector<64x1xf32>
    %21 = vector.broadcast %17 : vector<64x1xf32> to vector<64x128xf32>
    %22 = arith.mulf %1, %21 : vector<64x128xf32>
    %23 = vector.broadcast %20 : vector<64x1xf32> to vector<64x128xf32>
    %24 = arith.addf %22, %23 : vector<64x128xf32>
    %25 = arith.truncf %24 : vector<64x128xf32> to vector<64x128xbf16>
    %c0_9 = arith.constant 0 : index
    %c0_10 = arith.constant 0 : index
    %26 = vector.load %arg3[%c0_9, %c0_10] : memref<64x128xbf16, #tpu.memory_space<vmem>>, vector<64x128xbf16>
    tpu.vector_store %arg3[%c0_9, %c0_10], %25 {strides = array<i32>} : memref<64x128xbf16, #tpu.memory_space<vmem>>, vector<64x128xbf16>,
    return
  }
}

module attributes {stable_mosaic.version = 11 : i64} {
  func.func @_mm_kernel(%arg0: i32, %arg1: memref<128x640xbf16, #tpu.memory_space<vmem>>, %arg2: memref<640x128xbf16, #tpu.memory_space<vmem>>, %arg3: memref<128x128xbf16, #tpu.memory_space<vmem>>) attributes {dimension_semantics = [#tpu.dimension_semantics<parallel>], iteration_bounds = array<i64: 1>, scalar_prefetch = 0 : i64, scratch_operands = 0 : i64, tpu.core_type = #tpu.core_type<tc>, window_params = [{pipeline_mode = #tpu.pipeline_mode<synchronous>, transform_indices = @transform_0, window_bounds = array<i64: 128, 640>}, {transform_indices = @transform_1, window_bounds = array<i64: 640, 128>}, {transform_indices = @transform_2, window_bounds = array<i64: 128, 128>}]} {
    %c0 = arith.constant 0 : index
    %c0_0 = arith.constant 0 : index
    %0 = vector.load %arg1[%c0, %c0_0] : memref<128x640xbf16, #tpu.memory_space<vmem>>, vector<128x640xbf16>
    %c0_1 = arith.constant 0 : index
    %c0_2 = arith.constant 0 : index
    %1 = vector.load %arg2[%c0_1, %c0_2] : memref<640x128xbf16, #tpu.memory_space<vmem>>, vector<640x128xbf16>
    %cst = arith.constant dense<0.000000e+00> : vector<128x128xf32>
    %2 = tpu.matmul %0, %1, %cst {dimension_numbers = #tpu.dot_dimension_numbers<[1], [0], [0], [1], [0, 0, 1, 1], [], []>} : vector<128x640xbf16>, vector<640x128xbf16>, vector<128x128xf32> -> vector<128x128xf32>
    %3 = arith.truncf %2 : vector<128x128xf32> to vector<128x128xbf16>
    %c0_3 = arith.constant 0 : index
    %c0_4 = arith.constant 0 : index
    %4 = vector.load %arg3[%c0_3, %c0_4] : memref<128x128xbf16, #tpu.memory_space<vmem>>, vector<128x128xbf16>
    tpu.vector_store %arg3[%c0_3, %c0_4], %3 {strides = array<i32>} : memref<128x128xbf16, #tpu.memory_space<vmem>>, vector<128x128xbf16>,
    return
  }
  func.func @transform_0(%arg0: i32) -> (i32, i32) {
    %c0_i32 = arith.constant 0 : i32
    %c0_i32_0 = arith.constant 0 : i32
    %c0_i32_1 = arith.constant 0 : i32
    return %c0_i32, %c0_i32_0 : i32, i32
  }
  func.func @transform_1(%arg0: i32) -> (i32, i32) {
    %c0_i32 = arith.constant 0 : i32
    %c0_i32_0 = arith.constant 0 : i32
    return %c0_i32, %arg0 : i32, i32
  }
  func.func @transform_2(%arg0: i32) -> (i32, i32) {
    %c0_i32 = arith.constant 0 : i32
    %c0_i32_0 = arith.constant 0 : i32
    return %c0_i32, %arg0 : i32, i32
  }
}

module attributes {stable_mosaic.version = 11 : i64} {
  func.func @_bn_kernel(%arg0: memref<32x128xbf16, #tpu.memory_space<vmem>>, %arg1: memref<32x1xf32, #tpu.memory_space<vmem>>, %arg2: memref<32x1xf32, #tpu.memory_space<vmem>>, %arg3: memref<32x128xbf16, #tpu.memory_space<vmem>>) attributes {dimension_semantics = [], scalar_prefetch = 0 : i64, scratch_operands = 0 : i64, tpu.core_type = #tpu.core_type<tc>} {
    %c0 = arith.constant 0 : index
    %c0_0 = arith.constant 0 : index
    %0 = vector.load %arg0[%c0, %c0_0] : memref<32x128xbf16, #tpu.memory_space<vmem>>, vector<32x128xbf16>
    %1 = arith.extf %0 : vector<32x128xbf16> to vector<32x128xf32>
    %cst = arith.constant dense<0.000000e+00> : vector<32xf32>
    %2 = vector.multi_reduction <add>, %1, %cst [1] : vector<32x128xf32> to vector<32xf32>
    %3 = vector.shape_cast %2 : vector<32xf32> to vector<32x1xf32>
    %cst_1 = arith.constant 7.812500e-03 : f32
    %4 = vector.broadcast %cst_1 : f32 to vector<32x1xf32>
    %5 = arith.mulf %3, %4 : vector<32x1xf32>
    %6 = arith.mulf %1, %1 : vector<32x128xf32>
    %cst_2 = arith.constant dense<0.000000e+00> : vector<32xf32>
    %7 = vector.multi_reduction <add>, %6, %cst_2 [1] : vector<32x128xf32> to vector<32xf32>
    %8 = vector.shape_cast %7 : vector<32xf32> to vector<32x1xf32>
    %cst_3 = arith.constant 7.812500e-03 : f32
    %9 = vector.broadcast %cst_3 : f32 to vector<32x1xf32>
    %10 = arith.mulf %8, %9 : vector<32x1xf32>
    %11 = arith.mulf %5, %5 : vector<32x1xf32>
    %12 = arith.subf %10, %11 : vector<32x1xf32>
    %c0_4 = arith.constant 0 : index
    %c0_5 = arith.constant 0 : index
    %13 = vector.load %arg1[%c0_4, %c0_5] : memref<32x1xf32, #tpu.memory_space<vmem>>, vector<32x1xf32>
    %cst_6 = arith.constant 9.99999974E-6 : f32
    %14 = vector.broadcast %cst_6 : f32 to vector<32x1xf32>
    %15 = arith.addf %12, %14 : vector<32x1xf32>
    %16 = math.rsqrt %15 : vector<32x1xf32>
    %17 = arith.mulf %13, %16 : vector<32x1xf32>
    %c0_7 = arith.constant 0 : index
    %c0_8 = arith.constant 0 : index
    %18 = vector.load %arg2[%c0_7, %c0_8] : memref<32x1xf32, #tpu.memory_space<vmem>>, vector<32x1xf32>
    %19 = arith.mulf %5, %17 : vector<32x1xf32>
    %20 = arith.subf %18, %19 : vector<32x1xf32>
    %21 = vector.broadcast %17 : vector<32x1xf32> to vector<32x128xf32>
    %22 = arith.mulf %1, %21 : vector<32x128xf32>
    %23 = vector.broadcast %20 : vector<32x1xf32> to vector<32x128xf32>
    %24 = arith.addf %22, %23 : vector<32x128xf32>
    %cst_9 = arith.constant 0.000000e+00 : f32
    %25 = vector.broadcast %cst_9 : f32 to vector<32x128xf32>
    %26 = arith.maximumf %24, %25 : vector<32x128xf32>
    %27 = arith.truncf %26 : vector<32x128xf32> to vector<32x128xbf16>
    %c0_10 = arith.constant 0 : index
    %c0_11 = arith.constant 0 : index
    %28 = vector.load %arg3[%c0_10, %c0_11] : memref<32x128xbf16, #tpu.memory_space<vmem>>, vector<32x128xbf16>
    tpu.vector_store %arg3[%c0_10, %c0_11], %27 {strides = array<i32>} : memref<32x128xbf16, #tpu.memory_space<vmem>>, vector<32x128xbf16>,
    return
  }
}

module attributes {stable_mosaic.version = 11 : i64} {
  func.func @_mm_kernel(%arg0: i32, %arg1: memref<64x384xbf16, #tpu.memory_space<vmem>>, %arg2: memref<384x128xbf16, #tpu.memory_space<vmem>>, %arg3: memref<64x128xbf16, #tpu.memory_space<vmem>>) attributes {dimension_semantics = [#tpu.dimension_semantics<parallel>], iteration_bounds = array<i64: 1>, scalar_prefetch = 0 : i64, scratch_operands = 0 : i64, tpu.core_type = #tpu.core_type<tc>, window_params = [{pipeline_mode = #tpu.pipeline_mode<synchronous>, transform_indices = @transform_0, window_bounds = array<i64: 64, 384>}, {transform_indices = @transform_1, window_bounds = array<i64: 384, 128>}, {transform_indices = @transform_2, window_bounds = array<i64: 64, 128>}]} {
    %c0 = arith.constant 0 : index
    %c0_0 = arith.constant 0 : index
    %0 = vector.load %arg1[%c0, %c0_0] : memref<64x384xbf16, #tpu.memory_space<vmem>>, vector<64x384xbf16>
    %c0_1 = arith.constant 0 : index
    %c0_2 = arith.constant 0 : index
    %1 = vector.load %arg2[%c0_1, %c0_2] : memref<384x128xbf16, #tpu.memory_space<vmem>>, vector<384x128xbf16>
    %cst = arith.constant dense<0.000000e+00> : vector<64x128xf32>
    %2 = tpu.matmul %0, %1, %cst {dimension_numbers = #tpu.dot_dimension_numbers<[1], [0], [0], [1], [0, 0, 1, 1], [], []>} : vector<64x384xbf16>, vector<384x128xbf16>, vector<64x128xf32> -> vector<64x128xf32>
    %3 = arith.truncf %2 : vector<64x128xf32> to vector<64x128xbf16>
    %c0_3 = arith.constant 0 : index
    %c0_4 = arith.constant 0 : index
    %4 = vector.load %arg3[%c0_3, %c0_4] : memref<64x128xbf16, #tpu.memory_space<vmem>>, vector<64x128xbf16>
    tpu.vector_store %arg3[%c0_3, %c0_4], %3 {strides = array<i32>} : memref<64x128xbf16, #tpu.memory_space<vmem>>, vector<64x128xbf16>,
    return
  }
  func.func @transform_0(%arg0: i32) -> (i32, i32) {
    %c0_i32 = arith.constant 0 : i32
    %c0_i32_0 = arith.constant 0 : i32
    %c0_i32_1 = arith.constant 0 : i32
    return %c0_i32, %c0_i32_0 : i32, i32
  }
  func.func @transform_1(%arg0: i32) -> (i32, i32) {
    %c0_i32 = arith.constant 0 : i32
    %c0_i32_0 = arith.constant 0 : i32
    return %c0_i32, %arg0 : i32, i32
  }
  func.func @transform_2(%arg0: i32) -> (i32, i32) {
    %c0_i32 = arith.constant 0 : i32
    %c0_i32_0 = arith.constant 0 : i32
    return %c0_i32, %arg0 : i32, i32
  }
}

module attributes {stable_mosaic.version = 11 : i64} {
  func.func @_bn_kernel(%arg0: memref<16x512xbf16, #tpu.memory_space<vmem>>, %arg1: memref<16x1xf32, #tpu.memory_space<vmem>>, %arg2: memref<16x1xf32, #tpu.memory_space<vmem>>, %arg3: memref<16x512xbf16, #tpu.memory_space<vmem>>) attributes {dimension_semantics = [], scalar_prefetch = 0 : i64, scratch_operands = 0 : i64, tpu.core_type = #tpu.core_type<tc>} {
    %c0 = arith.constant 0 : index
    %c0_0 = arith.constant 0 : index
    %0 = vector.load %arg0[%c0, %c0_0] : memref<16x512xbf16, #tpu.memory_space<vmem>>, vector<16x512xbf16>
    %1 = arith.extf %0 : vector<16x512xbf16> to vector<16x512xf32>
    %cst = arith.constant dense<0.000000e+00> : vector<16xf32>
    %2 = vector.multi_reduction <add>, %1, %cst [1] : vector<16x512xf32> to vector<16xf32>
    %3 = vector.shape_cast %2 : vector<16xf32> to vector<16x1xf32>
    %cst_1 = arith.constant 0.001953125 : f32
    %4 = vector.broadcast %cst_1 : f32 to vector<16x1xf32>
    %5 = arith.mulf %3, %4 : vector<16x1xf32>
    %6 = arith.mulf %1, %1 : vector<16x512xf32>
    %cst_2 = arith.constant dense<0.000000e+00> : vector<16xf32>
    %7 = vector.multi_reduction <add>, %6, %cst_2 [1] : vector<16x512xf32> to vector<16xf32>
    %8 = vector.shape_cast %7 : vector<16xf32> to vector<16x1xf32>
    %cst_3 = arith.constant 0.001953125 : f32
    %9 = vector.broadcast %cst_3 : f32 to vector<16x1xf32>
    %10 = arith.mulf %8, %9 : vector<16x1xf32>
    %11 = arith.mulf %5, %5 : vector<16x1xf32>
    %12 = arith.subf %10, %11 : vector<16x1xf32>
    %c0_4 = arith.constant 0 : index
    %c0_5 = arith.constant 0 : index
    %13 = vector.load %arg1[%c0_4, %c0_5] : memref<16x1xf32, #tpu.memory_space<vmem>>, vector<16x1xf32>
    %cst_6 = arith.constant 9.99999974E-6 : f32
    %14 = vector.broadcast %cst_6 : f32 to vector<16x1xf32>
    %15 = arith.addf %12, %14 : vector<16x1xf32>
    %16 = math.rsqrt %15 : vector<16x1xf32>
    %17 = arith.mulf %13, %16 : vector<16x1xf32>
    %c0_7 = arith.constant 0 : index
    %c0_8 = arith.constant 0 : index
    %18 = vector.load %arg2[%c0_7, %c0_8] : memref<16x1xf32, #tpu.memory_space<vmem>>, vector<16x1xf32>
    %19 = arith.mulf %5, %17 : vector<16x1xf32>
    %20 = arith.subf %18, %19 : vector<16x1xf32>
    %21 = vector.broadcast %17 : vector<16x1xf32> to vector<16x512xf32>
    %22 = arith.mulf %1, %21 : vector<16x512xf32>
    %23 = vector.broadcast %20 : vector<16x1xf32> to vector<16x512xf32>
    %24 = arith.addf %22, %23 : vector<16x512xf32>
    %cst_9 = arith.constant 0.000000e+00 : f32
    %25 = vector.broadcast %cst_9 : f32 to vector<16x512xf32>
    %26 = arith.maximumf %24, %25 : vector<16x512xf32>
    %27 = arith.truncf %26 : vector<16x512xf32> to vector<16x512xbf16>
    %c0_10 = arith.constant 0 : index
    %c0_11 = arith.constant 0 : index
    %28 = vector.load %arg3[%c0_10, %c0_11] : memref<16x512xbf16, #tpu.memory_space<vmem>>, vector<16x512xbf16>
    tpu.vector_store %arg3[%c0_10, %c0_11], %27 {strides = array<i32>} : memref<16x512xbf16, #tpu.memory_space<vmem>>, vector<16x512xbf16>,
    return
  }
}

module attributes {stable_mosaic.version = 11 : i64} {
  func.func @_mm_kernel(%arg0: i32, %arg1: memref<32x256xbf16, #tpu.memory_space<vmem>>, %arg2: memref<256x512xbf16, #tpu.memory_space<vmem>>, %arg3: memref<32x512xbf16, #tpu.memory_space<vmem>>) attributes {dimension_semantics = [#tpu.dimension_semantics<parallel>], iteration_bounds = array<i64: 1>, scalar_prefetch = 0 : i64, scratch_operands = 0 : i64, tpu.core_type = #tpu.core_type<tc>, window_params = [{pipeline_mode = #tpu.pipeline_mode<synchronous>, transform_indices = @transform_0, window_bounds = array<i64: 32, 256>}, {transform_indices = @transform_1, window_bounds = array<i64: 256, 512>}, {transform_indices = @transform_2, window_bounds = array<i64: 32, 512>}]} {
    %c0 = arith.constant 0 : index
    %c0_0 = arith.constant 0 : index
    %0 = vector.load %arg1[%c0, %c0_0] : memref<32x256xbf16, #tpu.memory_space<vmem>>, vector<32x256xbf16>
    %c0_1 = arith.constant 0 : index
    %c0_2 = arith.constant 0 : index
    %1 = vector.load %arg2[%c0_1, %c0_2] : memref<256x512xbf16, #tpu.memory_space<vmem>>, vector<256x512xbf16>
    %cst = arith.constant dense<0.000000e+00> : vector<32x512xf32>
    %2 = tpu.matmul %0, %1, %cst {dimension_numbers = #tpu.dot_dimension_numbers<[1], [0], [0], [1], [0, 0, 1, 1], [], []>} : vector<32x256xbf16>, vector<256x512xbf16>, vector<32x512xf32> -> vector<32x512xf32>
    %3 = arith.truncf %2 : vector<32x512xf32> to vector<32x512xbf16>
    %c0_3 = arith.constant 0 : index
    %c0_4 = arith.constant 0 : index
    %4 = vector.load %arg3[%c0_3, %c0_4] : memref<32x512xbf16, #tpu.memory_space<vmem>>, vector<32x512xbf16>
    tpu.vector_store %arg3[%c0_3, %c0_4], %3 {strides = array<i32>} : memref<32x512xbf16, #tpu.memory_space<vmem>>, vector<32x512xbf16>,
    return
  }
  func.func @transform_0(%arg0: i32) -> (i32, i32) {
    %c0_i32 = arith.constant 0 : i32
    %c0_i32_0 = arith.constant 0 : i32
    %c0_i32_1 = arith.constant 0 : i32
    return %c0_i32, %c0_i32_0 : i32, i32
  }
  func.func @transform_1(%arg0: i32) -> (i32, i32) {
    %c0_i32 = arith.constant 0 : i32
    %c0_i32_0 = arith.constant 0 : i32
    return %c0_i32, %arg0 : i32, i32
  }
  func.func @transform_2(%arg0: i32) -> (i32, i32) {
    %c0_i32 = arith.constant 0 : i32
    %c0_i32_0 = arith.constant 0 : i32
    return %c0_i32, %arg0 : i32, i32
  }
}

module attributes {stable_mosaic.version = 11 : i64} {
  func.func @_bn_kernel(%arg0: memref<16x2048xbf16, #tpu.memory_space<vmem>>, %arg1: memref<16x1xf32, #tpu.memory_space<vmem>>, %arg2: memref<16x1xf32, #tpu.memory_space<vmem>>, %arg3: memref<16x2048xbf16, #tpu.memory_space<vmem>>) attributes {dimension_semantics = [], scalar_prefetch = 0 : i64, scratch_operands = 0 : i64, tpu.core_type = #tpu.core_type<tc>} {
    %c0 = arith.constant 0 : index
    %c0_0 = arith.constant 0 : index
    %0 = vector.load %arg0[%c0, %c0_0] : memref<16x2048xbf16, #tpu.memory_space<vmem>>, vector<16x2048xbf16>
    %1 = arith.extf %0 : vector<16x2048xbf16> to vector<16x2048xf32>
    %cst = arith.constant dense<0.000000e+00> : vector<16xf32>
    %2 = vector.multi_reduction <add>, %1, %cst [1] : vector<16x2048xf32> to vector<16xf32>
    %3 = vector.shape_cast %2 : vector<16xf32> to vector<16x1xf32>
    %cst_1 = arith.constant 4.8828125E-4 : f32
    %4 = vector.broadcast %cst_1 : f32 to vector<16x1xf32>
    %5 = arith.mulf %3, %4 : vector<16x1xf32>
    %6 = arith.mulf %1, %1 : vector<16x2048xf32>
    %cst_2 = arith.constant dense<0.000000e+00> : vector<16xf32>
    %7 = vector.multi_reduction <add>, %6, %cst_2 [1] : vector<16x2048xf32> to vector<16xf32>
    %8 = vector.shape_cast %7 : vector<16xf32> to vector<16x1xf32>
    %cst_3 = arith.constant 4.8828125E-4 : f32
    %9 = vector.broadcast %cst_3 : f32 to vector<16x1xf32>
    %10 = arith.mulf %8, %9 : vector<16x1xf32>
    %11 = arith.mulf %5, %5 : vector<16x1xf32>
    %12 = arith.subf %10, %11 : vector<16x1xf32>
    %c0_4 = arith.constant 0 : index
    %c0_5 = arith.constant 0 : index
    %13 = vector.load %arg1[%c0_4, %c0_5] : memref<16x1xf32, #tpu.memory_space<vmem>>, vector<16x1xf32>
    %cst_6 = arith.constant 9.99999974E-6 : f32
    %14 = vector.broadcast %cst_6 : f32 to vector<16x1xf32>
    %15 = arith.addf %12, %14 : vector<16x1xf32>
    %16 = math.rsqrt %15 : vector<16x1xf32>
    %17 = arith.mulf %13, %16 : vector<16x1xf32>
    %c0_7 = arith.constant 0 : index
    %c0_8 = arith.constant 0 : index
    %18 = vector.load %arg2[%c0_7, %c0_8] : memref<16x1xf32, #tpu.memory_space<vmem>>, vector<16x1xf32>
    %19 = arith.mulf %5, %17 : vector<16x1xf32>
    %20 = arith.subf %18, %19 : vector<16x1xf32>
    %21 = vector.broadcast %17 : vector<16x1xf32> to vector<16x2048xf32>
    %22 = arith.mulf %1, %21 : vector<16x2048xf32>
    %23 = vector.broadcast %20 : vector<16x1xf32> to vector<16x2048xf32>
    %24 = arith.addf %22, %23 : vector<16x2048xf32>
    %cst_9 = arith.constant 0.000000e+00 : f32
    %25 = vector.broadcast %cst_9 : f32 to vector<16x2048xf32>
    %26 = arith.maximumf %24, %25 : vector<16x2048xf32>
    %27 = arith.truncf %26 : vector<16x2048xf32> to vector<16x2048xbf16>
    %c0_10 = arith.constant 0 : index
    %c0_11 = arith.constant 0 : index
    %28 = vector.load %arg3[%c0_10, %c0_11] : memref<16x2048xbf16, #tpu.memory_space<vmem>>, vector<16x2048xbf16>
    tpu.vector_store %arg3[%c0_10, %c0_11], %27 {strides = array<i32>} : memref<16x2048xbf16, #tpu.memory_space<vmem>>, vector<16x2048xbf16>,
    return
  }
}

module attributes {stable_mosaic.version = 11 : i64} {
  func.func @_mm_kernel(%arg0: i32, %arg1: memref<16x128xbf16, #tpu.memory_space<vmem>>, %arg2: memref<128x2048xbf16, #tpu.memory_space<vmem>>, %arg3: memref<16x1xf32, #tpu.memory_space<vmem>>, %arg4: memref<16x2048xf32, #tpu.memory_space<vmem>>) attributes {dimension_semantics = [#tpu.dimension_semantics<parallel>], iteration_bounds = array<i64: 1>, scalar_prefetch = 0 : i64, scratch_operands = 0 : i64, tpu.core_type = #tpu.core_type<tc>, window_params = [{pipeline_mode = #tpu.pipeline_mode<synchronous>, transform_indices = @transform_0, window_bounds = array<i64: 16, 128>}, {transform_indices = @transform_1, window_bounds = array<i64: 128, 2048>}, {pipeline_mode = #tpu.pipeline_mode<synchronous>, transform_indices = @transform_2, window_bounds = array<i64: 16, 1>}, {transform_indices = @transform_3, window_bounds = array<i64: 16, 2048>}]} {
    %c0 = arith.constant 0 : index
    %c0_0 = arith.constant 0 : index
    %0 = vector.load %arg1[%c0, %c0_0] : memref<16x128xbf16, #tpu.memory_space<vmem>>, vector<16x128xbf16>
    %c0_1 = arith.constant 0 : index
    %c0_2 = arith.constant 0 : index
    %1 = vector.load %arg2[%c0_1, %c0_2] : memref<128x2048xbf16, #tpu.memory_space<vmem>>, vector<128x2048xbf16>
    %cst = arith.constant dense<0.000000e+00> : vector<16x2048xf32>
    %2 = tpu.matmul %0, %1, %cst {dimension_numbers = #tpu.dot_dimension_numbers<[1], [0], [0], [1], [0, 0, 1, 1], [], []>} : vector<16x128xbf16>, vector<128x2048xbf16>, vector<16x2048xf32> -> vector<16x2048xf32>
    %c0_3 = arith.constant 0 : index
    %c0_4 = arith.constant 0 : index
    %3 = vector.load %arg3[%c0_3, %c0_4] : memref<16x1xf32, #tpu.memory_space<vmem>>, vector<16x1xf32>
    %4 = vector.broadcast %3 : vector<16x1xf32> to vector<16x2048xf32>
    %5 = arith.addf %2, %4 : vector<16x2048xf32>
    %6 = math.tanh %5 : vector<16x2048xf32>
    %c0_5 = arith.constant 0 : index
    %c0_6 = arith.constant 0 : index
    %7 = vector.load %arg4[%c0_5, %c0_6] : memref<16x2048xf32, #tpu.memory_space<vmem>>, vector<16x2048xf32>
    tpu.vector_store %arg4[%c0_5, %c0_6], %6 {strides = array<i32>} : memref<16x2048xf32, #tpu.memory_space<vmem>>, vector<16x2048xf32>,
    return
  }
  func.func @transform_0(%arg0: i32) -> (i32, i32) {
    %c0_i32 = arith.constant 0 : i32
    %c0_i32_0 = arith.constant 0 : i32
    %c0_i32_1 = arith.constant 0 : i32
    return %c0_i32, %c0_i32_0 : i32, i32
  }
  func.func @transform_1(%arg0: i32) -> (i32, i32) {
    %c0_i32 = arith.constant 0 : i32
    %c0_i32_0 = arith.constant 0 : i32
    return %c0_i32, %arg0 : i32, i32
  }
  func.func @transform_2(%arg0: i32) -> (i32, i32) {
    %c0_i32 = arith.constant 0 : i32
    %c0_i32_0 = arith.constant 0 : i32
    %c0_i32_1 = arith.constant 0 : i32
    return %c0_i32, %c0_i32_0 : i32, i32
  }
  func.func @transform_3(%arg0: i32) -> (i32, i32) {
    %c0_i32 = arith.constant 0 : i32
    %c0_i32_0 = arith.constant 0 : i32
    return %c0_i32, %arg0 : i32, i32
  }
}

</mosaic_0001>

<bundles_post_ra>
// kernel: forward.9
= control target key start
LH: loop header
LB: loop body
LE: loop exit
PB: predicated region body
PF: predicated region fallthrough
CT: control target
= control target key end

     0   :  { %8 = vsyncpa [#allocation3], 0  ;;  %s436_s12 = smov [#allocation2]   ;;  %s532_s0 = inlined_call_operand.hbm [shape: bf16[64,128], index: 0, kind: input, shape index: {}]   ;;  %s533_s1 = inlined_call_operand.vmem [shape: bf16[128,128], index: 1, kind: input, shape index: {}]   ;;  %s534_s2 = inlined_call_operand.vmem [shape: f32[64,1], index: 2, kind: input, shape index: {}]   ;;  %s535_s3 = inlined_call_operand.vmem [shape: bf16[64,128], index: 3, kind: output, shape index: {}]  }
   0x1   :  { %s14_s13 = sshll.u32 %s436_s12, 4  ;;  %s412_s16 = scalar_lea.hbm %s532_s0, 512  ;;  %s15_s13 = int_to_ptr.vmem [resolvable:$true] %s14_s13 }
   0x2   :  { %p413_p0 = scmp.ne.s32.totalorder %s532_s0, %s412_s16  ;;  %p416_p1 = scmp.lt.u32.totalorder %s412_s16, %s532_s0 }
   0x4   :  { %p418_p2 = pnand %p416_p1, %p413_p0 }
   0x6   :  { %421 = shalt.err (!%p418_p2)
}
   0x7   :  { %s422_s21 = scalar_lea.vmem %s15_s13, 512  ;;  %p427_p4 = scmp.lt.s32.totalorder %s15_s13, %s15_s13 }
   0x8   :  { %p423_p3 = scmp.ne.s32.totalorder %s15_s13, %s422_s21  ;;  %p428_p5 = scmp.lt.s32.totalorder %s422_s21, %s422_s21 }
   0xa   :  { %p429_p6 = por %p428_p5, %p427_p4 }
   0xc   :  { %p430_p7 = pnand %p429_p6, %p423_p3 }
   0xe   :  { %433 = shalt.err (!%p430_p7)
}
   0xf   :  { %s437_s22 = smov 64   ;;  %s438_s23 = smov 4  }
  0x10   :  { %20 = dma.hbm_to_vmem [thread:$0]  %s532_s0, 512, %s15_s13, [#allocation3], %s437_s22, %s437_s22, %s438_s23  }
  0x11   :  { %434 = dma.done.wait [#allocation3], 512  }
  0x12   :  { %435 = vsyncadd [#allocation3], 4294966784  ;;  %v439_v0 = vmov 0   ;;  %v400_v1 = vld [vmem:[%s533_s1] sm:$0xff]   ;;  %v401_v2 = vld [vmem:[%s533_s1 + $0x8] sm:$0xff]  }
  0x13   :  { %399 = vset.pattern.permute.xlu1 %v439_v0  ;;  %398 = vset.pattern.permute.xlu0 %v439_v0  ;;  %v402_v3 = vld [vmem:[%s533_s1 + $0x10] sm:$0xff]   ;;  %v403_v4 = vld [vmem:[%s533_s1 + $0x18] sm:$0xff]   ;;  %v408_v5 = vld [vmem:[#allocation2] sm:$0xff]  }
  0x14   :  { %354 = vmatprep.subr.bf16.mxu0 %v400_v1  ;;  %378 = vmatprep.subr.bf16.mxu1 %v400_v1  ;;  %v409_v6 = vld [vmem:[#allocation2 + $0x10] sm:$0xff]   ;;  %v404_v7 = vld [vmem:[%s533_s1 + $0x20] sm:$0xff]   ;;  %v56_v10 = vld [vmem:[%s534_s2 + $0x18] sm:$0xff] }
  0x15   :  { %355 = vmatpush3.bf16.msra.mxu0 %v400_v1  ;;  %386 = vmatpush3.bf16.msra.mxu1 %v400_v1  ;;  %v55_v8 = vld [vmem:[%s534_s2 + $0x10] sm:$0xff]  ;;  %v53_v9 = vld [vmem:[%s534_s2] sm:$0xff]  ;;  %v54_v11 = vld [vmem:[%s534_s2 + $0x8] sm:$0xff] }
  0x16   :  { %356 = vmatprep.subr.bf16.mxu0 %v401_v2  ;;  %379 = vmatprep.subr.bf16.mxu1 %v401_v2  ;;  %v405_v12 = vld [vmem:[%s533_s1 + $0x28] sm:$0xff]   ;;  %v57_v14 = vld [vmem:[%s534_s2 + $0x20] sm:$0xff]  ;;  %v406_v15 = vld [vmem:[%s533_s1 + $0x30] sm:$0xff]  }
  0x17   :  { %370 = vmatprep.mubr.bf16.mxu0 %v408_v5  ;;  %374 = vmatprep.mubr.bf16.mxu1 %v409_v6  ;;  %v58_v13 = vld [vmem:[%s534_s2 + $0x28] sm:$0xff]  ;;  %v60_v16 = vld [vmem:[%s534_s2 + $0x38] sm:$0xff]  ;;  %v59_v17 = vld [vmem:[%s534_s2 + $0x30] sm:$0xff] }
  0x18   :  { %73 = vperm.xlu1 %399, %v55_v8   ;;  %63 = vperm.xlu0 %398, %v53_v9   ;;  %v407_v18 = vld [vmem:[%s533_s1 + $0x38] sm:$0xff]   ;;  %v410_v19 = vld [vmem:[#allocation2 + $0x8] sm:$0xff]  }
  0x19   :  { %357 = vmatpush3.bf16.msra.mxu0 %v401_v2  ;;  %387 = vmatpush3.bf16.msra.mxu1 %v401_v2  ;;  %v411_v20 = vld [vmem:[#allocation2 + $0x18] sm:$0xff]  }
  0x1a   :  { %358 = vmatprep.subr.bf16.mxu0 %v402_v3  ;;  %380 = vmatprep.subr.bf16.mxu1 %v402_v3 }
  0x1c   :  { %78 = vperm.xlu1 %399, %v56_v10   ;;  %68 = vperm.xlu0 %398, %v54_v11  }
  0x1d   :  { %359 = vmatpush3.bf16.msra.mxu0 %v402_v3  ;;  %388 = vmatpush3.bf16.msra.mxu1 %v402_v3 }
  0x1e   :  { %360 = vmatprep.subr.bf16.mxu0 %v403_v4  ;;  %381 = vmatprep.subr.bf16.mxu1 %v403_v4 }
  0x20   :  { %88 = vperm.xlu1 %399, %v58_v13   ;;  %83 = vperm.xlu0 %398, %v57_v14  }
  0x21   :  { %361 = vmatpush3.bf16.msra.mxu0 %v403_v4  ;;  %389 = vmatpush3.bf16.msra.mxu1 %v403_v4 }
  0x22   :  { %362 = vmatprep.subr.bf16.mxu0 %v404_v7  ;;  %382 = vmatprep.subr.bf16.mxu1 %v404_v7 }
  0x24   :  { %98 = vperm.xlu1 %399, %v60_v16   ;;  %93 = vperm.xlu0 %398, %v59_v17  }
  0x25   :  { %363 = vmatpush3.bf16.msra.mxu0 %v404_v7  ;;  %390 = vmatpush3.bf16.msra.mxu1 %v404_v7 }
  0x26   :  { %364 = vmatprep.subr.bf16.mxu0 %v405_v12  ;;  %383 = vmatprep.subr.bf16.mxu1 %v405_v12 }
  0x29   :  { %365 = vmatpush3.bf16.msra.mxu0 %v405_v12  ;;  %391 = vmatpush3.bf16.msra.mxu1 %v405_v12 }
  0x2a   :  { %366 = vmatprep.subr.bf16.mxu0 %v406_v15  ;;  %384 = vmatprep.subr.bf16.mxu1 %v406_v15 }
  0x2d   :  { %367 = vmatpush3.bf16.msra.mxu0 %v406_v15  ;;  %392 = vmatpush3.bf16.msra.mxu1 %v406_v15 }
  0x2e   :  { %368 = vmatprep.subr.bf16.mxu0 %v407_v18  ;;  %385 = vmatprep.subr.bf16.mxu1 %v407_v18 }
  0x31   :  { %369 = vmatpush3.bf16.msra.mxu0 %v407_v18  ;;  %393 = vmatpush3.bf16.msra.mxu1 %v407_v18 }
  0x34   :  { %371 = vmatmul.mubr.bf16.vlgmr.msra.gmra.mrb[0].mxu0 %v410_v19  ;;  %375 = vmatmul.mubr.bf16.vlgmr.msra.gmra.mrb[0].mxu1 %v411_v20 }
  0x97   :  { %v74_v21 = vpop.permute.xlu1 %73  ;;  %v64_v22 = vpop.permute.xlu0 %63 }
  0x9b   :  { %v79_v23 = vpop.permute.xlu1 %78  ;;  %v69_v24 = vpop.permute.xlu0 %68 }
  0x9f   :  { %v89_v25 = vpop.permute.xlu1 %88  ;;  %v84_v26 = vpop.permute.xlu0 %83 }
  0xa3   :  { %v99_v27 = vpop.permute.xlu1 %98  ;;  %v94_v28 = vpop.permute.xlu0 %93 }
 0x107   :  { %v372_v29 = vpop.f32.mrb[0].mxu0  ;;  %v376_v30 = vpop.f32.mrb[0].mxu1 }
 0x108   :  { %v216_v31 = vadd.f32 %v372_v29, %v74_v21  ;;  %v232_v32 = vadd.f32 %v376_v30, %v94_v28  ;;  %v207_v33 = vpop.f32.mrb[1].mxu0  ;;  %v223_v34 = vpop.f32.mrb[1].mxu1 }
 0x109   :  { %v208_v35 = vadd.f32 %v207_v33, %v64_v22  ;;  %v224_v36 = vadd.f32 %v223_v34, %v84_v26  ;;  %v373_v37 = vpop.f32.mrb[2].mxu0  ;;  %v377_v38 = vpop.f32.mrb[2].mxu1 }
 0x10a   :  { %v219_v39 = vadd.f32 %v373_v37, %v79_v23  ;;  %v235_v40 = vadd.f32 %v377_v38, %v99_v27  ;;  %v210_v41 = vpop.f32.mrb[3].mxu0  ;;  %v226_v42 = vpop.f32.mrb[3].mxu1  ;;  %v240_v45 = vmax.f32 %v216_v31, 0.0  ;;  %v244_v46 = vmax.f32 %v232_v32, 0.0 }
 0x10b   :  { %v211_v43 = vadd.f32 %v210_v41, %v69_v24  ;;  %v227_v44 = vadd.f32 %v226_v42, %v89_v25  ;;  %v238_v49 = vmax.f32 %v208_v35, 0.0  ;;  %v242_v50 = vmax.f32 %v224_v36, 0.0 }
 0x10c   :  { %v241_v47 = vmax.f32 %v219_v39, 0.0  ;;  %v245_v48 = vmax.f32 %v235_v40, 0.0 }
 0x10d   :  { %v239_v51 = vmax.f32 %v211_v43, 0.0  ;;  %v243_v52 = vmax.f32 %v227_v44, 0.0 }
 0x10e   :  { %v327_v53 = vpack.c.bf16 %v241_v47, %v240_v45  ;;  %v337_v54 = vpack.c.bf16 %v245_v48, %v244_v46 }
 0x10f   :  { %v322_v55 = vpack.c.bf16 %v239_v51, %v238_v49  ;;  %v332_v56 = vpack.c.bf16 %v243_v52, %v242_v50 }
 0x110   :  { %339 = vst [vmem:[%s535_s3 + $0x8] sm:$0xff] %v327_v53   ;;  %341 = vst [vmem:[%s535_s3 + $0x18] sm:$0xff] %v337_v54  }
 0x111   :  { %323 = vst [vmem:[%s535_s3] sm:$0xff] %v322_v55   ;;  %340 = vst [vmem:[%s535_s3 + $0x10] sm:$0xff] %v332_v56  }
 0x112   :  { %290 = vsyncpa [#allocation3], 1 }

// kernel: forward.10
= control target key start
LH: loop header
LB: loop body
LE: loop exit
PB: predicated region body
PF: predicated region fallthrough
CT: control target
= control target key end

     0   :  { %v375_v20 = vmov 0   ;;  %s556_s0 = inlined_call_operand.vmem [shape: bf16[64,128], index: 0, kind: input, shape index: {}]   ;;  %s557_s1 = inlined_call_operand.vmem [shape: f32[64,1], index: 1, kind: input, shape index: {}]   ;;  %s558_s2 = inlined_call_operand.vmem [shape: f32[64,1], index: 2, kind: input, shape index: {}]   ;;  %s559_s3 = inlined_call_operand.vmem [shape: bf16[64,128], index: 3, kind: output, shape index: {}]  }
   0x1   :  { %v350_v0 = vld [vmem:[%s556_s0 + $0x8] sm:$0xff]   ;;  %v315_v1 = vld [vmem:[%s556_s0] sm:$0xff]   ;;  %v351_v6 = vld [vmem:[%s556_s0 + $0x10] sm:$0xff]   ;;  %358 = vset.pattern.permute.xlu1 %v375_v20  ;;  %357 = vset.pattern.permute.xlu0 %v375_v20 }
   0x2   :  { %v402_v2 = vunpack.c.l.bf16 %v350_v0  ;;  %v404_v3 = vunpack.c.l.bf16 %v315_v1  ;;  %v408_v4 = vunpack.c.h.bf16 %v350_v0  ;;  %v410_v5 = vunpack.c.h.bf16 %v315_v1  ;;  %v352_v9 = vld [vmem:[%s556_s0 + $0x18] sm:$0xff]  }
   0x3   :  { %v417_v7 = vunpack.c.h.bf16 %v351_v6  ;;  %v419_v8 = vunpack.c.l.bf16 %v351_v6  ;;  %v426_v10 = vunpack.c.h.bf16 %v352_v9  ;;  %v428_v11 = vunpack.c.l.bf16 %v352_v9 }
   0x4   :  { %34 = vadd.xlane.f32.xlu1 %v402_v2  ;;  %30 = vadd.xlane.f32.xlu0 %v404_v3  ;;  %v55_v12 = vmul.f32 %v410_v5, %v410_v5  ;;  %v54_v13 = vmul.f32 %v404_v3, %v404_v3  ;;  %v57_v14 = vmul.f32 %v408_v4, %v408_v4 }
   0x5   :  { %v56_v15 = vmul.f32 %v402_v2, %v402_v2  ;;  %v59_v16 = vmul.f32 %v417_v7, %v417_v7  ;;  %v58_v17 = vmul.f32 %v419_v8, %v419_v8  ;;  %v61_v18 = vmul.f32 %v426_v10, %v426_v10 }
   0x6   :  { %v60_v19 = vmul.f32 %v428_v11, %v428_v11 }
   0x8   :  { %36 = vadd.xlane.f32.xlu1 %v408_v4  ;;  %32 = vadd.xlane.f32.xlu0 %v410_v5 }
   0xc   :  { %40 = vadd.xlane.f32.xlu1 %v417_v7  ;;  %38 = vadd.xlane.f32.xlu0 %v419_v8 }
  0x10   :  { %44 = vadd.xlane.f32.xlu1 %v426_v10  ;;  %42 = vadd.xlane.f32.xlu0 %v428_v11 }
  0x14   :  { %64 = vadd.xlane.f32.xlu1 %v55_v12  ;;  %62 = vadd.xlane.f32.xlu0 %v54_v13 }
  0x18   :  { %68 = vadd.xlane.f32.xlu1 %v57_v14  ;;  %66 = vadd.xlane.f32.xlu0 %v56_v15 }
  0x1c   :  { %72 = vadd.xlane.f32.xlu1 %v59_v16  ;;  %70 = vadd.xlane.f32.xlu0 %v58_v17  ;;  %v103_v17 = vld [vmem:[%s557_s1 + $0x8] sm:$0xff] }
  0x20   :  { %76 = vadd.xlane.f32.xlu1 %v61_v18  ;;  %74 = vadd.xlane.f32.xlu0 %v60_v19  ;;  %v102_v19 = vld [vmem:[%s557_s1] sm:$0xff] }
  0x91   :  { %v35_v21 = vpop.xlane.xlu1 %34  ;;  %v31_v22 = vpop.xlane.xlu0 %30 }
  0x92   :  { %v448_v29 = vmul.f32 0.03125, %v31_v22  ;;  %v452_v31 = vmul.f32 0.03125, %v35_v21 }
  0x94   :  { %v86_v35 = vmul.f32 %v448_v29, %v448_v29  ;;  %v88_v41 = vmul.f32 %v452_v31, %v452_v31 }
  0x95   :  { %v37_v23 = vpop.xlane.xlu1 %36  ;;  %v33_v24 = vpop.xlane.xlu0 %32 }
  0x96   :  { %v450_v30 = vmul.f32 0.03125, %v33_v24  ;;  %v454_v32 = vmul.f32 0.03125, %v37_v23 }
  0x98   :  { %v87_v36 = vmul.f32 %v450_v30, %v450_v30  ;;  %v89_v42 = vmul.f32 %v454_v32, %v454_v32 }
  0x99   :  { %v41_v25 = vpop.xlane.xlu1 %40  ;;  %v39_v26 = vpop.xlane.xlu0 %38 }
  0x9a   :  { %v464_v43 = vmul.f32 0.03125, %v41_v25  ;;  %v466_v44 = vmul.f32 0.03125, %v39_v26  ;;  %v135_v26 = vld [vmem:[%s558_s2 + $0x8] sm:$0xff] }
  0x9c   :  { %v91_v53 = vmul.f32 %v464_v43, %v464_v43  ;;  %v90_v54 = vmul.f32 %v466_v44, %v466_v44 }
  0x9d   :  { %v45_v27 = vpop.xlane.xlu1 %44  ;;  %v43_v28 = vpop.xlane.xlu0 %42 }
  0x9e   :  { %v472_v55 = vmul.f32 0.03125, %v45_v27  ;;  %v474_v0 = vmul.f32 0.03125, %v43_v28  ;;  %v105_v27 = vld [vmem:[%s557_s1 + $0x18] sm:$0xff] }
  0xa0   :  { %v93_v9 = vmul.f32 %v472_v55, %v472_v55  ;;  %v92_v18 = vmul.f32 %v474_v0, %v474_v0 }
  0xa1   :  { %v65_v33 = vpop.xlane.xlu1 %64  ;;  %v63_v34 = vpop.xlane.xlu0 %62 }
  0xa2   :  { %v79_v37 = vmul.f32 0.03125, %v65_v33  ;;  %v78_v38 = vmul.f32 0.03125, %v63_v34  ;;  %v104_v33 = vld [vmem:[%s557_s1 + $0x10] sm:$0xff] }
  0xa4   :  { %v95_v39 = vsub.f32 %v79_v37, %v87_v36  ;;  %v94_v40 = vsub.f32 %v78_v38, %v86_v35 }
  0xa5   :  { %v69_v45 = vpop.xlane.xlu1 %68  ;;  %v67_v46 = vpop.xlane.xlu0 %66 }
  0xa6   :  { %v111_v47 = vadd.f32 1e-05, %v95_v39  ;;  %v110_v48 = vadd.f32 1e-05, %v94_v40  ;;  %v81_v49 = vmul.f32 0.03125, %v69_v45  ;;  %v80_v50 = vmul.f32 0.03125, %v67_v46 }
  0xa7   :  { %v137_v40 = vld [vmem:[%s558_s2 + $0x18] sm:$0xff] }
  0xa8   :  { %359 = vrsqrt.f32 %v111_v47  ;;  %v97_v51 = vsub.f32 %v81_v49, %v89_v42  ;;  %v96_v52 = vsub.f32 %v80_v50, %v88_v41  ;;  %v107_v41 = vld [vmem:[%s557_s1 + $0x28] sm:$0xff] }
  0xa9   :  { %361 = vrsqrt.f32 %v110_v48  ;;  %v73_v56 = vpop.xlane.xlu1 %72  ;;  %v71_v57 = vpop.xlane.xlu0 %70  ;;  %v139_v47 = vld [vmem:[%s558_s2 + $0x28] sm:$0xff]  ;;  %v109_v48 = vld [vmem:[%s557_s1 + $0x38] sm:$0xff] }
  0xaa   :  { %v113_v58 = vadd.f32 1e-05, %v97_v51  ;;  %v112_v59 = vadd.f32 1e-05, %v96_v52  ;;  %v83_v60 = vmul.f32 0.03125, %v73_v56  ;;  %v82_v61 = vmul.f32 0.03125, %v71_v57 }
  0xab   :  { %v141_v56 = vld [vmem:[%s558_s2 + $0x38] sm:$0xff] }
  0xac   :  { %363 = vrsqrt.f32 %v113_v58  ;;  %v99_v62 = vsub.f32 %v83_v60, %v91_v53  ;;  %v98_v63 = vsub.f32 %v82_v61, %v90_v54 }
  0xad   :  { %365 = vrsqrt.f32 %v112_v59  ;;  %v77_v1 = vpop.xlane.xlu1 %76  ;;  %v75_v6 = vpop.xlane.xlu0 %74  ;;  %v108_v59 = vld [vmem:[%s557_s1 + $0x30] sm:$0xff] }
  0xae   :  { %v115_v12 = vadd.f32 1e-05, %v99_v62  ;;  %v85_v13 = vmul.f32 0.03125, %v77_v1  ;;  %v114_v14 = vadd.f32 1e-05, %v98_v63  ;;  %v84_v15 = vmul.f32 0.03125, %v75_v6 }
  0xaf   :  { %v134_v62 = vld [vmem:[%s558_s2] sm:$0xff]  ;;  %v136_v1 = vld [vmem:[%s558_s2 + $0x10] sm:$0xff] }
  0xb0   :  { %367 = vrsqrt.f32 %v115_v12  ;;  %v101_v16 = vsub.f32 %v85_v13, %v93_v9  ;;  %v100_v23 = vsub.f32 %v84_v15, %v92_v18 }
  0xb1   :  { %369 = vrsqrt.f32 %v114_v14 }
  0xb2   :  { %v360_v20 = vpop.eup %359  ;;  %v117_v21 = vadd.f32 1e-05, %v101_v16  ;;  %v116_v36 = vadd.f32 1e-05, %v100_v23 }
  0xb3   :  { %v362_v22 = vpop.eup %361  ;;  %v127_v24 = vmul.f32 %v360_v20, %v103_v17 }
  0xb4   :  { %371 = vrsqrt.f32 %v117_v21  ;;  %v126_v25 = vmul.f32 %v362_v22, %v102_v19 }
  0xb5   :  { %165 = vperm.xlu1 %358, %v127_v24   ;;  %v143_v28 = vmul.f32 %v127_v24, %v450_v30  ;;  %373 = vrsqrt.f32 %v116_v36 }
  0xb6   :  { %v364_v34 = vpop.eup %363  ;;  %160 = vperm.xlu0 %357, %v126_v25   ;;  %v142_v61 = vmul.f32 %v126_v25, %v448_v29  ;;  %v138_v29 = vld [vmem:[%s558_s2 + $0x20] sm:$0xff] }
  0xb7   :  { %v366_v35 = vpop.eup %365  ;;  %v151_v37 = vsub.f32 %v135_v26, %v143_v28  ;;  %v129_v38 = vmul.f32 %v364_v34, %v105_v27 }
  0xb8   :  { %v128_v39 = vmul.f32 %v366_v35, %v104_v33 }
  0xb9   :  { %v145_v30 = vmul.f32 %v129_v38, %v454_v32  ;;  %v106_v32 = vld [vmem:[%s557_s1 + $0x20] sm:$0xff] }
  0xba   :  { %v368_v42 = vpop.eup %367  ;;  %213 = vperm.xlu0 %357, %v151_v37   ;;  %170 = vperm.xlu1 %358, %v128_v39   ;;  %v144_v63 = vmul.f32 %v128_v39, %v452_v31  ;;  %v140_v31 = vld [vmem:[%s558_s2 + $0x30] sm:$0xff] }
  0xbb   :  { %v153_v45 = vsub.f32 %v137_v40, %v145_v30  ;;  %v131_v46 = vmul.f32 %v368_v42, %v107_v41  ;;  %v370_v49 = vpop.eup %369 }
  0xbc   :  { %v130_v54 = vmul.f32 %v370_v49, %v106_v32  ;;  %v152_v6 = vsub.f32 %v136_v1, %v144_v63 }
  0xbd   :  { %v147_v50 = vmul.f32 %v131_v46, %v464_v43 }
  0xbe   :  { %v372_v51 = vpop.eup %371  ;;  %223 = vperm.xlu0 %357, %v153_v45   ;;  %175 = vperm.xlu1 %358, %v129_v38   ;;  %v146_v9 = vmul.f32 %v130_v54, %v466_v44 }
  0xbf   :  { %v155_v52 = vsub.f32 %v139_v47, %v147_v50  ;;  %v133_v53 = vmul.f32 %v372_v51, %v109_v48  ;;  %v374_v43 = vpop.eup %373 }
  0xc0   :  { %v132_v60 = vmul.f32 %v374_v43, %v108_v59  ;;  %v154_v12 = vsub.f32 %v138_v29, %v146_v9 }
  0xc1   :  { %v149_v57 = vmul.f32 %v133_v53, %v472_v55  ;;  %v150_v55 = vsub.f32 %v134_v62, %v142_v61 }
  0xc2   :  { %233 = vperm.xlu0 %357, %v155_v52   ;;  %180 = vperm.xlu1 %358, %v130_v54   ;;  %v148_v13 = vmul.f32 %v132_v60, %v474_v0 }
  0xc3   :  { %v157_v58 = vsub.f32 %v141_v56, %v149_v57 }
  0xc4   :  { %v156_v14 = vsub.f32 %v140_v31, %v148_v13 }
  0xc6   :  { %243 = vperm.xlu0 %357, %v157_v58   ;;  %185 = vperm.xlu1 %358, %v131_v46  }
  0xca   :  { %190 = vperm.xlu1 %358, %v132_v60  }
  0xce   :  { %195 = vperm.xlu1 %358, %v133_v53  }
  0xd2   :  { %208 = vperm.xlu1 %358, %v150_v55  }
  0xd6   :  { %218 = vperm.xlu1 %358, %v152_v6  }
  0xda   :  { %228 = vperm.xlu1 %358, %v154_v12  }
  0xde   :  { %238 = vperm.xlu1 %358, %v156_v14  }
 0x134   :  { %v166_v15 = vpop.permute.xlu1 %165 }
 0x135   :  { %v161_v44 = vpop.permute.xlu0 %160  ;;  %v199_v23 = vmul.f32 %v410_v5, %v166_v15 }
 0x136   :  { %v198_v0 = vmul.f32 %v404_v3, %v161_v44 }
 0x139   :  { %v171_v16 = vpop.permute.xlu1 %170  ;;  %v214_v21 = vpop.permute.xlu0 %213 }
 0x13a   :  { %v247_v26 = vadd.f32 %v214_v21, %v199_v23  ;;  %v200_v33 = vmul.f32 %v402_v2, %v171_v16 }
 0x13d   :  { %v176_v17 = vpop.permute.xlu1 %175  ;;  %v224_v24 = vpop.permute.xlu0 %223 }
 0x13e   :  { %v201_v27 = vmul.f32 %v408_v4, %v176_v17 }
 0x140   :  { %v249_v36 = vadd.f32 %v224_v24, %v201_v27 }
 0x141   :  { %v181_v18 = vpop.permute.xlu1 %180  ;;  %v234_v38 = vpop.permute.xlu0 %233 }
 0x142   :  { %v202_v3 = vmul.f32 %v419_v8, %v181_v18 }
 0x145   :  { %v186_v19 = vpop.permute.xlu1 %185  ;;  %v244_v42 = vpop.permute.xlu0 %243 }
 0x146   :  { %v203_v37 = vmul.f32 %v417_v7, %v186_v19 }
 0x148   :  { %v251_v41 = vadd.f32 %v234_v38, %v203_v37 }
 0x149   :  { %v191_v20 = vpop.permute.xlu1 %190 }
 0x14a   :  { %v204_v7 = vmul.f32 %v428_v11, %v191_v20 }
 0x14d   :  { %v196_v22 = vpop.permute.xlu1 %195 }
 0x14e   :  { %v205_v4 = vmul.f32 %v426_v10, %v196_v22 }
 0x150   :  { %v253_v46 = vadd.f32 %v244_v42, %v205_v4 }
 0x151   :  { %v209_v25 = vpop.permute.xlu1 %208 }
 0x152   :  { %v246_v28 = vadd.f32 %v209_v25, %v198_v0 }
 0x154   :  { %v333_v34 = vpack.c.bf16 %v247_v26, %v246_v28 }
 0x155   :  { %v219_v35 = vpop.permute.xlu1 %218 }
 0x156   :  { %334 = vst [vmem:[%s559_s3] sm:$0xff] %v333_v34   ;;  %v248_v5 = vadd.f32 %v219_v35, %v200_v33 }
 0x158   :  { %v338_v39 = vpack.c.bf16 %v249_v36, %v248_v5 }
 0x159   :  { %v229_v40 = vpop.permute.xlu1 %228 }
 0x15a   :  { %353 = vst [vmem:[%s559_s3 + $0x8] sm:$0xff] %v338_v39   ;;  %v250_v2 = vadd.f32 %v229_v40, %v202_v3 }
 0x15c   :  { %v343_v30 = vpack.c.bf16 %v251_v41, %v250_v2 }
 0x15d   :  { %v239_v45 = vpop.permute.xlu1 %238 }
 0x15e   :  { %354 = vst [vmem:[%s559_s3 + $0x10] sm:$0xff] %v343_v30   ;;  %v252_v8 = vadd.f32 %v239_v45, %v204_v7 }
 0x160   :  { %v348_v47 = vpack.c.bf16 %v253_v46, %v252_v8 }
 0x162   :  { %355 = vst [vmem:[%s559_s3 + $0x18] sm:$0xff] %v348_v47  }

// kernel: forward.11
= control target key start
LH: loop header
LB: loop body
LE: loop exit
PB: predicated region body
PF: predicated region fallthrough
CT: control target
= control target key end

     0   :  { %s1713_s1 = inlined_call_operand.vmem [shape: bf16[640,128], index: 1, kind: input, shape index: {}]   ;;  %s1714_s0 = inlined_call_operand.vmem [shape: bf16[128,640], index: 0, kind: input, shape index: {}]   ;;  %s1715_s2 = inlined_call_operand.vmem [shape: bf16[128,128], index: 2, kind: output, shape index: {}]  }
   0x1   :  { %v1314_v0 = vld [vmem:[%s1713_s1 + $0x40] sm:$0xff]   ;;  %v1318_v4 = vld [vmem:[%s1713_s1 + $0x48] sm:$0xff]   ;;  %v1322_v8 = vld [vmem:[%s1713_s1 + $0x50] sm:$0xff]  }
   0x2   :  { %v1315_v1 = vld [vmem:[%s1713_s1 + $0xc0] sm:$0xff]   ;;  %1122 = vmatprep.subr.bf16.mxu0 %v1314_v0  ;;  %v1319_v5 = vld [vmem:[%s1713_s1 + $0xc8] sm:$0xff]   ;;  %v1323_v9 = vld [vmem:[%s1713_s1 + $0xd0] sm:$0xff]  }
   0x3   :  { %v1316_v2 = vld [vmem:[%s1713_s1] sm:$0xff]   ;;  %1186 = vmatprep.subr.bf16.mxu1 %v1315_v1  ;;  %v1320_v6 = vld [vmem:[%s1713_s1 + $0x8] sm:$0xff]   ;;  %v1324_v10 = vld [vmem:[%s1713_s1 + $0x10] sm:$0xff]  }
   0x4   :  { %v1317_v3 = vld [vmem:[%s1713_s1 + $0x80] sm:$0xff]   ;;  %1123 = vmatpush3.bf16.msra.mxu0 %v1316_v2  ;;  %v1321_v7 = vld [vmem:[%s1713_s1 + $0x88] sm:$0xff]   ;;  %v1325_v11 = vld [vmem:[%s1713_s1 + $0x90] sm:$0xff]  }
   0x5   :  { %1187 = vmatpush3.bf16.msra.mxu1 %v1317_v3  ;;  %1124 = vmatprep.subr.bf16.mxu0 %v1318_v4  ;;  %v1326_v12 = vld [vmem:[%s1713_s1 + $0x58] sm:$0xff]   ;;  %v1330_v16 = vld [vmem:[%s1713_s1 + $0x60] sm:$0xff]   ;;  %v1334_v20 = vld [vmem:[%s1713_s1 + $0x68] sm:$0xff]  }
   0x6   :  { %1188 = vmatprep.subr.bf16.mxu1 %v1319_v5  ;;  %v1327_v13 = vld [vmem:[%s1713_s1 + $0xd8] sm:$0xff]   ;;  %v1331_v17 = vld [vmem:[%s1713_s1 + $0xe0] sm:$0xff]   ;;  %v1335_v21 = vld [vmem:[%s1713_s1 + $0xe8] sm:$0xff]  }
   0x7   :  { %v1328_v14 = vld [vmem:[%s1713_s1 + $0x18] sm:$0xff]   ;;  %v1332_v18 = vld [vmem:[%s1713_s1 + $0x20] sm:$0xff]   ;;  %v1336_v22 = vld [vmem:[%s1713_s1 + $0x28] sm:$0xff]  }
   0x8   :  { %1125 = vmatpush3.bf16.msra.mxu0 %v1320_v6  ;;  %v1329_v15 = vld [vmem:[%s1713_s1 + $0x98] sm:$0xff]   ;;  %v1333_v19 = vld [vmem:[%s1713_s1 + $0xa0] sm:$0xff]   ;;  %v1337_v23 = vld [vmem:[%s1713_s1 + $0xa8] sm:$0xff]  }
   0x9   :  { %1189 = vmatpush3.bf16.msra.mxu1 %v1321_v7  ;;  %1126 = vmatprep.subr.bf16.mxu0 %v1322_v8  ;;  %v1338_v24 = vld [vmem:[%s1713_s1 + $0x70] sm:$0xff]   ;;  %v1342_v28 = vld [vmem:[%s1713_s1 + $0x78] sm:$0xff]   ;;  %v1351_v35 = vld [vmem:[%s1714_s0 + $0xc] ss:$20 sps:$4 sm:$0xff]  }
   0xa   :  { %1190 = vmatprep.subr.bf16.mxu1 %v1323_v9  ;;  %v1339_v25 = vld [vmem:[%s1713_s1 + $0xf0] sm:$0xff]   ;;  %v1343_v29 = vld [vmem:[%s1713_s1 + $0xf8] sm:$0xff]   ;;  %v1352_v36 = vld [vmem:[%s1713_s1 + $0x100] sm:$0xff]   ;;  %717 = vmatprep.mubr.bf16.mxu1 %v1351_v35 }
   0xb   :  { %v1340_v26 = vld [vmem:[%s1713_s1 + $0x30] sm:$0xff]   ;;  %v1344_v30 = vld [vmem:[%s1713_s1 + $0x38] sm:$0xff]   ;;  %v1353_v37 = vld [vmem:[%s1714_s0 + $0x2c] ss:$20 sps:$4 sm:$0xff]  }
   0xc   :  { %1127 = vmatpush3.bf16.msra.mxu0 %v1324_v10  ;;  %v1341_v27 = vld [vmem:[%s1713_s1 + $0xb0] sm:$0xff]   ;;  %v1345_v31 = vld [vmem:[%s1713_s1 + $0xb8] sm:$0xff]   ;;  %v1359_v39 = vld [vmem:[%s1713_s1 + $0x108] sm:$0xff]  }
   0xd   :  { %1191 = vmatpush3.bf16.msra.mxu1 %v1325_v11  ;;  %1128 = vmatprep.subr.bf16.mxu0 %v1326_v12  ;;  %v1346_v32 = vld [vmem:[%s1714_s0] ss:$20 sps:$4 sm:$0xff]   ;;  %v1348_v33 = vld [vmem:[%s1714_s0 + $0x4] ss:$20 sps:$4 sm:$0xff]   ;;  %v1349_v34 = vld [vmem:[%s1714_s0 + $0x8] ss:$20 sps:$4 sm:$0xff]  }
   0xe   :  { %1192 = vmatprep.subr.bf16.mxu1 %v1327_v13  ;;  %620 = vmatprep.mubr.bf16.mxu0 %v1348_v33  ;;  %v1355_v38 = vld [vmem:[%s1714_s0 + $0x34] ss:$20 sps:$4 sm:$0xff]   ;;  %v1358_v41 = vld [vmem:[%s1714_s0 + $0x30] ss:$20 sps:$4 sm:$0xff]   ;;  %v1373_v45 = vld [vmem:[%s1713_s1 + $0x118] sm:$0xff]  }
   0xf   :  { %v1357_v40 = vld [vmem:[%s1714_s0 + $0x28] ss:$20 sps:$4 sm:$0xff]   ;;  %v1366_v44 = vld [vmem:[%s1713_s1 + $0x110] sm:$0xff]   ;;  %v1365_v47 = vld [vmem:[%s1714_s0 + $0x58] ss:$20 sps:$4 sm:$0xff]  }
  0x10   :  { %1129 = vmatpush3.bf16.msra.mxu0 %v1328_v14  ;;  %v1360_v42 = vld [vmem:[%s1714_s0 + $0x54] ss:$20 sps:$4 sm:$0xff]   ;;  %v1362_v43 = vld [vmem:[%s1714_s0 + $0x5c] ss:$20 sps:$4 sm:$0xff]   ;;  %v1369_v49 = vld [vmem:[%s1714_s0 + $0x84] ss:$20 sps:$4 sm:$0xff]  }
  0x11   :  { %1193 = vmatpush3.bf16.msra.mxu1 %v1329_v15  ;;  %1130 = vmatprep.subr.bf16.mxu0 %v1330_v16  ;;  %v1364_v46 = vld [vmem:[%s1714_s0 + $0x50] ss:$20 sps:$4 sm:$0xff]   ;;  %v1387_v51 = vld [vmem:[%s1713_s1 + $0x128] sm:$0xff]   ;;  %v1372_v53 = vld [vmem:[%s1714_s0 + $0x80] ss:$20 sps:$4 sm:$0xff]  }
  0x12   :  { %1194 = vmatprep.subr.bf16.mxu1 %v1331_v17  ;;  %v1367_v48 = vld [vmem:[%s1714_s0 + $0x7c] ss:$20 sps:$4 sm:$0xff]   ;;  %v1380_v50 = vld [vmem:[%s1713_s1 + $0x120] sm:$0xff]   ;;  %v1371_v52 = vld [vmem:[%s1714_s0 + $0x78] ss:$20 sps:$4 sm:$0xff]  }
  0x13   :  { %v1374_v54 = vld [vmem:[%s1714_s0 + $0xa4] ss:$20 sps:$4 sm:$0xff]   ;;  %v1394_v55 = vld [vmem:[%s1713_s1 + $0x130] sm:$0xff]   ;;  %v1376_v56 = vld [vmem:[%s1714_s0 + $0xac] ss:$20 sps:$4 sm:$0xff]  }
  0x14   :  { %1131 = vmatpush3.bf16.msra.mxu0 %v1332_v18  ;;  %v1401_v57 = vld [vmem:[%s1713_s1 + $0x138] sm:$0xff]   ;;  %v1378_v58 = vld [vmem:[%s1714_s0 + $0xa0] ss:$20 sps:$4 sm:$0xff]   ;;  %v1386_v63 = vld [vmem:[%s1714_s0 + $0xd0] ss:$20 sps:$4 sm:$0xff]  }
  0x15   :  { %1195 = vmatpush3.bf16.msra.mxu1 %v1333_v19  ;;  %1132 = vmatprep.subr.bf16.mxu0 %v1334_v20  ;;  %v1379_v59 = vld [vmem:[%s1714_s0 + $0xa8] ss:$20 sps:$4 sm:$0xff]   ;;  %v1381_v60 = vld [vmem:[%s1714_s0 + $0xcc] ss:$20 sps:$4 sm:$0xff]   ;;  %v1392_v2 = vld [vmem:[%s1714_s0 + $0xf0] ss:$20 sps:$4 sm:$0xff]  }
  0x16   :  { %1196 = vmatprep.subr.bf16.mxu1 %v1335_v21  ;;  %v1383_v61 = vld [vmem:[%s1714_s0 + $0xd4] ss:$20 sps:$4 sm:$0xff]   ;;  %v1390_v1 = vld [vmem:[%s1714_s0 + $0xfc] ss:$20 sps:$4 sm:$0xff]   ;;  %v1393_v3 = vld [vmem:[%s1714_s0 + $0xf8] ss:$20 sps:$4 sm:$0xff]  }
  0x17   :  { %v1385_v62 = vld [vmem:[%s1714_s0 + $0xc8] ss:$20 sps:$4 sm:$0xff]   ;;  %v1397_v5 = vld [vmem:[%s1714_s0 + $0x124] ss:$20 sps:$4 sm:$0xff]   ;;  %v1400_v7 = vld [vmem:[%s1714_s0 + $0x120] ss:$20 sps:$4 sm:$0xff]  }
  0x18   :  { %1133 = vmatpush3.bf16.msra.mxu0 %v1336_v22  ;;  %v1388_v0 = vld [vmem:[%s1714_s0 + $0xf4] ss:$20 sps:$4 sm:$0xff]   ;;  %v1395_v4 = vld [vmem:[%s1714_s0 + $0x11c] ss:$20 sps:$4 sm:$0xff]   ;;  %v1399_v6 = vld [vmem:[%s1714_s0 + $0x118] ss:$20 sps:$4 sm:$0xff]  }
  0x19   :  { %1197 = vmatpush3.bf16.msra.mxu1 %v1337_v23  ;;  %1134 = vmatprep.subr.bf16.mxu0 %v1338_v24  ;;  %v1402_v8 = vld [vmem:[%s1714_s0 + $0x10] ss:$20 sps:$4 sm:$0xff]   ;;  %v1404_v10 = vld [vmem:[%s1714_s0 + $0x38] ss:$20 sps:$4 sm:$0xff]   ;;  %v1406_v12 = vld [vmem:[%s1714_s0 + $0x60] ss:$20 sps:$4 sm:$0xff]  }
  0x1a   :  { %1198 = vmatprep.subr.bf16.mxu1 %v1339_v25  ;;  %v1403_v9 = vld [vmem:[%s1714_s0 + $0xb0] ss:$20 sps:$4 sm:$0xff]   ;;  %v1405_v11 = vld [vmem:[%s1714_s0 + $0xd8] ss:$20 sps:$4 sm:$0xff]   ;;  %v1407_v13 = vld [vmem:[%s1714_s0 + $0x100] ss:$20 sps:$4 sm:$0xff]  }
  0x1b   :  { %v1408_v14 = vld [vmem:[%s1714_s0 + $0x88] ss:$20 sps:$4 sm:$0xff]  }
  0x1c   :  { %1135 = vmatpush3.bf16.msra.mxu0 %v1340_v26  ;;  %v1409_v15 = vld [vmem:[%s1714_s0 + $0x128] ss:$20 sps:$4 sm:$0xff]  }
  0x1d   :  { %1199 = vmatpush3.bf16.msra.mxu1 %v1341_v27  ;;  %1136 = vmatprep.subr.bf16.mxu0 %v1342_v28 }
  0x1e   :  { %1200 = vmatprep.subr.bf16.mxu1 %v1343_v29 }
  0x20   :  { %1137 = vmatpush3.bf16.msra.mxu0 %v1344_v30 }
  0x21   :  { %1201 = vmatpush3.bf16.msra.mxu1 %v1345_v31  ;;  %1266 = vmatprep.subr.bf16.mxu0 %v1352_v36 }
  0x22   :  { %1298 = vmatprep.subr.bf16.mxu1 %v1352_v36 }
  0x23   :  { %621 = vmatmul.mubr.bf16.vlgmr.msra.gmra.mrb[0].mxu0 %v1346_v32 }
  0x24   :  { %718 = vmatmul.mubr.bf16.vlgmr.msra.gmra.mrb[0].mxu1 %v1349_v34  ;;  %1267 = vmatpush3.bf16.msra.mxu0 %v1352_v36 }
  0x25   :  { %1306 = vmatpush3.bf16.msra.mxu1 %v1352_v36  ;;  %628 = vmatprep.mubr.bf16.mxu0 %v1353_v37 }
  0x26   :  { %725 = vmatprep.mubr.bf16.mxu1 %v1355_v38  ;;  %1268 = vmatprep.subr.bf16.mxu0 %v1359_v39 }
  0x27   :  { %1299 = vmatprep.subr.bf16.mxu1 %v1359_v39 }
  0x28   :  { %1269 = vmatpush3.bf16.msra.mxu0 %v1359_v39 }
  0x29   :  { %1307 = vmatpush3.bf16.msra.mxu1 %v1359_v39  ;;  %1270 = vmatprep.subr.bf16.mxu0 %v1366_v44 }
  0x2a   :  { %1300 = vmatprep.subr.bf16.mxu1 %v1366_v44 }
  0x2b   :  { %629 = vmatmul.mubr.bf16.gmra.mrb[4].mxu0 %v1357_v40 }
  0x2c   :  { %726 = vmatmul.mubr.bf16.gmra.mrb[4].mxu1 %v1358_v41  ;;  %636 = vmatprep.mubr.bf16.mxu0 %v1360_v42 }
  0x2d   :  { %733 = vmatprep.mubr.bf16.mxu1 %v1362_v43  ;;  %1271 = vmatpush3.bf16.msra.mxu0 %v1366_v44 }
  0x2e   :  { %1308 = vmatpush3.bf16.msra.mxu1 %v1366_v44  ;;  %1272 = vmatprep.subr.bf16.mxu0 %v1373_v45 }
  0x2f   :  { %1301 = vmatprep.subr.bf16.mxu1 %v1373_v45 }
  0x31   :  { %1273 = vmatpush3.bf16.msra.mxu0 %v1373_v45 }
  0x32   :  { %1309 = vmatpush3.bf16.msra.mxu1 %v1373_v45  ;;  %1274 = vmatprep.subr.bf16.mxu0 %v1380_v50 }
  0x33   :  { %637 = vmatmul.mubr.bf16.gmra.mrb[8].mxu0 %v1364_v46  ;;  %1302 = vmatprep.subr.bf16.mxu1 %v1380_v50 }
  0x34   :  { %734 = vmatmul.mubr.bf16.gmra.mrb[8].mxu1 %v1365_v47  ;;  %644 = vmatprep.mubr.bf16.mxu0 %v1367_v48 }
  0x35   :  { %741 = vmatprep.mubr.bf16.mxu1 %v1369_v49  ;;  %1275 = vmatpush3.bf16.msra.mxu0 %v1380_v50 }
  0x36   :  { %1310 = vmatpush3.bf16.msra.mxu1 %v1380_v50  ;;  %1276 = vmatprep.subr.bf16.mxu0 %v1387_v51 }
  0x37   :  { %1303 = vmatprep.subr.bf16.mxu1 %v1387_v51 }
  0x39   :  { %1277 = vmatpush3.bf16.msra.mxu0 %v1387_v51 }
  0x3a   :  { %1311 = vmatpush3.bf16.msra.mxu1 %v1387_v51  ;;  %1278 = vmatprep.subr.bf16.mxu0 %v1394_v55 }
  0x3b   :  { %645 = vmatmul.mubr.bf16.gmra.mrb[12].mxu0 %v1371_v52  ;;  %1304 = vmatprep.subr.bf16.mxu1 %v1394_v55 }
  0x3c   :  { %742 = vmatmul.mubr.bf16.gmra.mrb[12].mxu1 %v1372_v53  ;;  %652 = vmatprep.mubr.bf16.mxu0 %v1374_v54 }
  0x3d   :  { %749 = vmatprep.mubr.bf16.mxu1 %v1376_v56  ;;  %1279 = vmatpush3.bf16.msra.mxu0 %v1394_v55 }
  0x3e   :  { %1312 = vmatpush3.bf16.msra.mxu1 %v1394_v55  ;;  %1280 = vmatprep.subr.bf16.mxu0 %v1401_v57 }
  0x3f   :  { %1305 = vmatprep.subr.bf16.mxu1 %v1401_v57 }
  0x41   :  { %1281 = vmatpush3.bf16.msra.mxu0 %v1401_v57 }
  0x42   :  { %1313 = vmatpush3.bf16.msra.mxu1 %v1401_v57 }
  0x43   :  { %653 = vmatmul.mubr.bf16.gmra.mrb[16].mxu0 %v1378_v58 }
  0x44   :  { %750 = vmatmul.mubr.bf16.gmra.mrb[16].mxu1 %v1379_v59  ;;  %660 = vmatprep.mubr.bf16.mxu0 %v1381_v60 }
  0x45   :  { %757 = vmatprep.mubr.bf16.mxu1 %v1383_v61 }
  0x4b   :  { %661 = vmatmul.mubr.bf16.gmra.mrb[20].mxu0 %v1385_v62 }
  0x4c   :  { %758 = vmatmul.mubr.bf16.gmra.mrb[20].mxu1 %v1386_v63  ;;  %668 = vmatprep.mubr.bf16.mxu0 %v1388_v0 }
  0x4d   :  { %765 = vmatprep.mubr.bf16.mxu1 %v1390_v1 }
  0x53   :  { %669 = vmatmul.mubr.bf16.gmra.mrb[24].mxu0 %v1392_v2 }
  0x54   :  { %766 = vmatmul.mubr.bf16.gmra.mrb[24].mxu1 %v1393_v3  ;;  %676 = vmatprep.mubr.bf16.mxu0 %v1395_v4 }
  0x55   :  { %773 = vmatprep.mubr.bf16.mxu1 %v1397_v5 }
  0x5b   :  { %677 = vmatmul.mubr.bf16.gmra.mrb[28].mxu0 %v1399_v6 }
  0x5c   :  { %774 = vmatmul.mubr.bf16.gmra.mrb[28].mxu1 %v1400_v7  ;;  %1282 = vmatprep.mubr.bf16.mxu0 %v1402_v8 }
  0x5d   :  { %1290 = vmatprep.mubr.bf16.mxu1 %v1403_v9 }
  0x63   :  { %1283 = vmatmul.mubr.bf16.vlgmr.msra.gmra.mrb[32].mxu0 %v1404_v10 }
  0x64   :  { %1291 = vmatmul.mubr.bf16.vlgmr.msra.gmra.mrb[32].mxu1 %v1405_v11  ;;  %1286 = vmatprep.mubr.bf16.mxu0 %v1406_v12 }
  0x65   :  { %1294 = vmatprep.mubr.bf16.mxu1 %v1407_v13 }
  0x6b   :  { %1287 = vmatmul.mubr.bf16.gmra.mrb[36].mxu0 %v1408_v14 }
  0x6c   :  { %1295 = vmatmul.mubr.bf16.gmra.mrb[36].mxu1 %v1409_v15 }
  0xf6   :  { %v1138_v16 = vpop.f32.mrb[0].mxu0 }
  0xf7   :  { %v1202_v17 = vpop.f32.mrb[0].mxu1  ;;  %v1139_v18 = vpop.f32.mrb[1].mxu0 }
  0xf8   :  { %v1140_v19 = vadd.f32 %v1139_v18, %v1138_v16  ;;  %v1203_v20 = vpop.f32.mrb[1].mxu1  ;;  %v1141_v21 = vpop.f32.mrb[2].mxu0 }
  0xf9   :  { %v1204_v22 = vadd.f32 %v1203_v20, %v1202_v17  ;;  %v1205_v23 = vpop.f32.mrb[2].mxu1  ;;  %v1142_v24 = vpop.f32.mrb[3].mxu0 }
  0xfa   :  { %v1143_v25 = vadd.f32 %v1142_v24, %v1141_v21  ;;  %v1206_v26 = vpop.f32.mrb[3].mxu1 }
  0xfb   :  { %v1207_v27 = vadd.f32 %v1206_v26, %v1205_v23  ;;  %v1665_v28 = vadd.f32 %v1204_v22, %v1140_v19 }
  0xfd   :  { %v1667_v29 = vadd.f32 %v1207_v27, %v1143_v25 }
  0xfe   :  { %v1144_v30 = vpop.f32.mrb[4].mxu0 }
  0xff   :  { %v1208_v31 = vpop.f32.mrb[4].mxu1  ;;  %v1145_v32 = vpop.f32.mrb[5].mxu0 }
 0x100   :  { %v1146_v33 = vadd.f32 %v1145_v32, %v1144_v30  ;;  %v1209_v34 = vpop.f32.mrb[5].mxu1  ;;  %v1147_v35 = vpop.f32.mrb[6].mxu0 }
 0x101   :  { %v1210_v36 = vadd.f32 %v1209_v34, %v1208_v31  ;;  %v1211_v37 = vpop.f32.mrb[6].mxu1  ;;  %v1148_v38 = vpop.f32.mrb[7].mxu0 }
 0x102   :  { %v1149_v39 = vadd.f32 %v1148_v38, %v1147_v35  ;;  %v1212_v40 = vpop.f32.mrb[7].mxu1 }
 0x103   :  { %v1213_v41 = vadd.f32 %v1212_v40, %v1211_v37  ;;  %v1669_v42 = vadd.f32 %v1210_v36, %v1146_v33 }
 0x105   :  { %v1671_v43 = vadd.f32 %v1213_v41, %v1149_v39 }
 0x106   :  { %v1150_v44 = vpop.f32.mrb[8].mxu0 }
 0x107   :  { %v1214_v45 = vpop.f32.mrb[8].mxu1  ;;  %v1151_v46 = vpop.f32.mrb[9].mxu0 }
 0x108   :  { %v1152_v47 = vadd.f32 %v1151_v46, %v1150_v44  ;;  %v1215_v48 = vpop.f32.mrb[9].mxu1  ;;  %v1153_v49 = vpop.f32.mrb[10].mxu0 }
 0x109   :  { %v1216_v50 = vadd.f32 %v1215_v48, %v1214_v45  ;;  %v1217_v51 = vpop.f32.mrb[10].mxu1  ;;  %v1154_v52 = vpop.f32.mrb[11].mxu0 }
 0x10a   :  { %v1155_v53 = vadd.f32 %v1154_v52, %v1153_v49  ;;  %v1218_v54 = vpop.f32.mrb[11].mxu1 }
 0x10b   :  { %v1219_v55 = vadd.f32 %v1218_v54, %v1217_v51  ;;  %v1673_v56 = vadd.f32 %v1216_v50, %v1152_v47 }
 0x10d   :  { %v1675_v57 = vadd.f32 %v1219_v55, %v1155_v53 }
 0x10e   :  { %v1156_v58 = vpop.f32.mrb[12].mxu0 }
 0x10f   :  { %v1220_v59 = vpop.f32.mrb[12].mxu1  ;;  %v1157_v60 = vpop.f32.mrb[13].mxu0 }
 0x110   :  { %v1158_v61 = vadd.f32 %v1157_v60, %v1156_v58  ;;  %v1221_v62 = vpop.f32.mrb[13].mxu1  ;;  %v1159_v63 = vpop.f32.mrb[14].mxu0 }
 0x111   :  { %v1222_v0 = vadd.f32 %v1221_v62, %v1220_v59  ;;  %v1223_v1 = vpop.f32.mrb[14].mxu1  ;;  %v1160_v2 = vpop.f32.mrb[15].mxu0 }
 0x112   :  { %v1161_v3 = vadd.f32 %v1160_v2, %v1159_v63  ;;  %v1224_v4 = vpop.f32.mrb[15].mxu1 }
 0x113   :  { %v1225_v5 = vadd.f32 %v1224_v4, %v1223_v1  ;;  %v1677_v6 = vadd.f32 %v1222_v0, %v1158_v61 }
 0x115   :  { %v1679_v7 = vadd.f32 %v1225_v5, %v1161_v3 }
 0x116   :  { %v1162_v8 = vpop.f32.mrb[16].mxu0 }
 0x117   :  { %v1226_v9 = vpop.f32.mrb[16].mxu1  ;;  %v1163_v10 = vpop.f32.mrb[17].mxu0 }
 0x118   :  { %v1164_v11 = vadd.f32 %v1163_v10, %v1162_v8  ;;  %v1227_v12 = vpop.f32.mrb[17].mxu1  ;;  %v1165_v13 = vpop.f32.mrb[18].mxu0 }
 0x119   :  { %v1228_v14 = vadd.f32 %v1227_v12, %v1226_v9  ;;  %v1229_v15 = vpop.f32.mrb[18].mxu1  ;;  %v1166_v16 = vpop.f32.mrb[19].mxu0 }
 0x11a   :  { %v1167_v17 = vadd.f32 %v1166_v16, %v1165_v13  ;;  %v1230_v18 = vpop.f32.mrb[19].mxu1 }
 0x11b   :  { %v1231_v19 = vadd.f32 %v1230_v18, %v1229_v15  ;;  %v752_v20 = vadd.f32 %v1228_v14, %v1164_v11 }
 0x11d   :  { %v755_v21 = vadd.f32 %v1231_v19, %v1167_v17 }
 0x11e   :  { %v1168_v22 = vpop.f32.mrb[20].mxu0 }
 0x11f   :  { %v1232_v23 = vpop.f32.mrb[20].mxu1  ;;  %v1169_v24 = vpop.f32.mrb[21].mxu0 }
 0x120   :  { %v1170_v25 = vadd.f32 %v1169_v24, %v1168_v22  ;;  %v1233_v26 = vpop.f32.mrb[21].mxu1  ;;  %v1171_v27 = vpop.f32.mrb[22].mxu0 }
 0x121   :  { %v1234_v30 = vadd.f32 %v1233_v26, %v1232_v23  ;;  %v1235_v31 = vpop.f32.mrb[22].mxu1  ;;  %v1172_v32 = vpop.f32.mrb[23].mxu0 }
 0x122   :  { %v1173_v33 = vadd.f32 %v1172_v32, %v1171_v27  ;;  %v1236_v34 = vpop.f32.mrb[23].mxu1 }
 0x123   :  { %v1237_v35 = vadd.f32 %v1236_v34, %v1235_v31  ;;  %v760_v36 = vadd.f32 %v1234_v30, %v1170_v25 }
 0x125   :  { %v763_v37 = vadd.f32 %v1237_v35, %v1173_v33 }
 0x126   :  { %v1174_v38 = vpop.f32.mrb[24].mxu0 }
 0x127   :  { %v1238_v39 = vpop.f32.mrb[24].mxu1  ;;  %v1175_v40 = vpop.f32.mrb[25].mxu0 }
 0x128   :  { %v1176_v41 = vadd.f32 %v1175_v40, %v1174_v38  ;;  %v1239_v44 = vpop.f32.mrb[25].mxu1  ;;  %v1177_v45 = vpop.f32.mrb[26].mxu0 }
 0x129   :  { %v1240_v46 = vadd.f32 %v1239_v44, %v1238_v39  ;;  %v1241_v47 = vpop.f32.mrb[26].mxu1  ;;  %v1178_v48 = vpop.f32.mrb[27].mxu0 }
 0x12a   :  { %v1179_v49 = vadd.f32 %v1178_v48, %v1177_v45  ;;  %v1242_v50 = vpop.f32.mrb[27].mxu1 }
 0x12b   :  { %v1243_v51 = vadd.f32 %v1242_v50, %v1241_v47  ;;  %v768_v52 = vadd.f32 %v1240_v46, %v1176_v41 }
 0x12d   :  { %v771_v53 = vadd.f32 %v1243_v51, %v1179_v49 }
 0x12e   :  { %v1180_v54 = vpop.f32.mrb[28].mxu0 }
 0x12f   :  { %v1244_v55 = vpop.f32.mrb[28].mxu1  ;;  %v1181_v58 = vpop.f32.mrb[29].mxu0 }
 0x130   :  { %v1182_v59 = vadd.f32 %v1181_v58, %v1180_v54  ;;  %v1245_v60 = vpop.f32.mrb[29].mxu1  ;;  %v1183_v61 = vpop.f32.mrb[30].mxu0 }
 0x131   :  { %v1246_v62 = vadd.f32 %v1245_v60, %v1244_v55  ;;  %v1247_v63 = vpop.f32.mrb[30].mxu1  ;;  %v1184_v0 = vpop.f32.mrb[31].mxu0 }
 0x132   :  { %v1185_v1 = vadd.f32 %v1184_v0, %v1183_v61  ;;  %v1248_v2 = vpop.f32.mrb[31].mxu1 }
 0x133   :  { %v1249_v3 = vadd.f32 %v1248_v2, %v1247_v63  ;;  %v776_v4 = vadd.f32 %v1246_v62, %v1182_v59 }
 0x135   :  { %v779_v5 = vadd.f32 %v1249_v3, %v1185_v1 }
 0x136   :  { %v1284_v8 = vpop.f32.mrb[32].mxu0 }
 0x137   :  { %v825_v9 = vadd.f32 %v1284_v8, %v1669_v42  ;;  %v1292_v10 = vpop.f32.mrb[32].mxu1  ;;  %v816_v11 = vpop.f32.mrb[33].mxu0 }
 0x138   :  { %v857_v12 = vadd.f32 %v1292_v10, %v760_v36  ;;  %v817_v13 = vadd.f32 %v816_v11, %v1665_v28  ;;  %v848_v14 = vpop.f32.mrb[33].mxu1  ;;  %v1285_v15 = vpop.f32.mrb[34].mxu0 }
 0x139   :  { %v849_v16 = vadd.f32 %v848_v14, %v752_v20  ;;  %v828_v17 = vadd.f32 %v1285_v15, %v1671_v43  ;;  %v1293_v18 = vpop.f32.mrb[34].mxu1  ;;  %v819_v19 = vpop.f32.mrb[35].mxu0 }
 0x13a   :  { %v860_v22 = vadd.f32 %v1293_v18, %v763_v37  ;;  %v820_v23 = vadd.f32 %v819_v19, %v1667_v29  ;;  %v851_v24 = vpop.f32.mrb[35].mxu1 }
 0x13b   :  { %v1083_v25 = vpack.c.bf16 %v828_v17, %v825_v9  ;;  %v852_v26 = vadd.f32 %v851_v24, %v755_v21 }
 0x13c   :  { %v1103_v27 = vpack.c.bf16 %v860_v22, %v857_v12  ;;  %v1078_v42 = vpack.c.bf16 %v820_v23, %v817_v13 }
 0x13d   :  { %1115 = vst [vmem:[%s1715_s2 + $0x8] sm:$0xff] %v1083_v25   ;;  %v1098_v28 = vpack.c.bf16 %v852_v26, %v849_v16 }
 0x13e   :  { %1119 = vst [vmem:[%s1715_s2 + $0x28] sm:$0xff] %v1103_v27   ;;  %1079 = vst [vmem:[%s1715_s2] sm:$0xff] %v1078_v42   ;;  %v1288_v43 = vpop.f32.mrb[36].mxu0 }
 0x13f   :  { %1118 = vst [vmem:[%s1715_s2 + $0x20] sm:$0xff] %v1098_v28   ;;  %v841_v29 = vadd.f32 %v1288_v43, %v1677_v6  ;;  %v1296_v20 = vpop.f32.mrb[36].mxu1  ;;  %v832_v21 = vpop.f32.mrb[37].mxu0 }
 0x140   :  { %v873_v30 = vadd.f32 %v1296_v20, %v776_v4  ;;  %v833_v31 = vadd.f32 %v832_v21, %v1673_v56  ;;  %v864_v32 = vpop.f32.mrb[37].mxu1  ;;  %v1289_v33 = vpop.f32.mrb[38].mxu0 }
 0x141   :  { %v865_v34 = vadd.f32 %v864_v32, %v768_v52  ;;  %v844_v35 = vadd.f32 %v1289_v33, %v1679_v7  ;;  %v1297_v36 = vpop.f32.mrb[38].mxu1  ;;  %v835_v37 = vpop.f32.mrb[39].mxu0 }
 0x142   :  { %v876_v38 = vadd.f32 %v1297_v36, %v779_v5  ;;  %v836_v39 = vadd.f32 %v835_v37, %v1675_v57  ;;  %v867_v40 = vpop.f32.mrb[39].mxu1 }
 0x143   :  { %v1093_v41 = vpack.c.bf16 %v844_v35, %v841_v29  ;;  %v868_v44 = vadd.f32 %v867_v40, %v771_v53 }
 0x144   :  { %v1113_v45 = vpack.c.bf16 %v876_v38, %v873_v30  ;;  %v1088_v6 = vpack.c.bf16 %v836_v39, %v833_v31 }
 0x145   :  { %1117 = vst [vmem:[%s1715_s2 + $0x18] sm:$0xff] %v1093_v41   ;;  %v1108_v56 = vpack.c.bf16 %v868_v44, %v865_v34 }
 0x146   :  { %1121 = vst [vmem:[%s1715_s2 + $0x38] sm:$0xff] %v1113_v45   ;;  %1116 = vst [vmem:[%s1715_s2 + $0x10] sm:$0xff] %v1088_v6  }
 0x147   :  { %1120 = vst [vmem:[%s1715_s2 + $0x30] sm:$0xff] %v1108_v56  }

// kernel: forward.12
= control target key start
LH: loop header
LB: loop body
LE: loop exit
PB: predicated region body
PF: predicated region fallthrough
CT: control target
= control target key end

     0   :  { %v201_v10 = vmov 0   ;;  %s282_s0 = inlined_call_operand.vmem [shape: bf16[32,128], index: 0, kind: input, shape index: {}]   ;;  %s283_s1 = inlined_call_operand.vmem [shape: f32[32,1], index: 1, kind: input, shape index: {}]   ;;  %s284_s2 = inlined_call_operand.vmem [shape: f32[32,1], index: 2, kind: input, shape index: {}]   ;;  %s285_s3 = inlined_call_operand.vmem [shape: bf16[32,128], index: 3, kind: output, shape index: {}]  }
   0x1   :  { %v188_v0 = vld [vmem:[%s282_s0 + $0x8] sm:$0xff]   ;;  %v171_v1 = vld [vmem:[%s282_s0] sm:$0xff]   ;;  %192 = vset.pattern.permute.xlu1 %v201_v10  ;;  %191 = vset.pattern.permute.xlu0 %v201_v10  ;;  %v60_v45 = vld [vmem:[%s283_s1 + $0x10] sm:$0xff] }
   0x2   :  { %v228_v2 = vunpack.c.l.bf16 %v188_v0  ;;  %v230_v3 = vunpack.c.l.bf16 %v171_v1  ;;  %v234_v4 = vunpack.c.h.bf16 %v188_v0  ;;  %v236_v5 = vunpack.c.h.bf16 %v171_v1  ;;  %v59_v39 = vld [vmem:[%s283_s1 + $0x8] sm:$0xff]  ;;  %v58_v40 = vld [vmem:[%s283_s1] sm:$0xff]  ;;  %v61_v49 = vld [vmem:[%s283_s1 + $0x18] sm:$0xff] }
   0x3   :  { %v74_v52 = vld [vmem:[%s284_s2] sm:$0xff]  ;;  %v75_v55 = vld [vmem:[%s284_s2 + $0x8] sm:$0xff]  ;;  %v76_v58 = vld [vmem:[%s284_s2 + $0x10] sm:$0xff] }
   0x4   :  { %26 = vadd.xlane.f32.xlu1 %v228_v2  ;;  %22 = vadd.xlane.f32.xlu0 %v230_v3  ;;  %v35_v6 = vmul.f32 %v236_v5, %v236_v5  ;;  %v34_v7 = vmul.f32 %v230_v3, %v230_v3  ;;  %v37_v8 = vmul.f32 %v234_v4, %v234_v4  ;;  %v77_v61 = vld [vmem:[%s284_s2 + $0x18] sm:$0xff] }
   0x5   :  { %v36_v9 = vmul.f32 %v228_v2, %v228_v2 }
   0x8   :  { %28 = vadd.xlane.f32.xlu1 %v234_v4  ;;  %24 = vadd.xlane.f32.xlu0 %v236_v5 }
   0xc   :  { %40 = vadd.xlane.f32.xlu1 %v35_v6  ;;  %38 = vadd.xlane.f32.xlu0 %v34_v7 }
  0x10   :  { %44 = vadd.xlane.f32.xlu1 %v37_v8  ;;  %42 = vadd.xlane.f32.xlu0 %v36_v9 }
  0x91   :  { %v27_v11 = vpop.xlane.xlu1 %26  ;;  %v23_v12 = vpop.xlane.xlu0 %22 }
  0x92   :  { %v30_v15 = vmul.f32 0.0078125, %v23_v12  ;;  %v32_v17 = vmul.f32 0.0078125, %v27_v11 }
  0x94   :  { %v50_v21 = vmul.f32 %v30_v15, %v30_v15  ;;  %v52_v27 = vmul.f32 %v32_v17, %v32_v17 }
  0x95   :  { %v29_v13 = vpop.xlane.xlu1 %28  ;;  %v25_v14 = vpop.xlane.xlu0 %24 }
  0x96   :  { %v31_v16 = vmul.f32 0.0078125, %v25_v14  ;;  %v33_v18 = vmul.f32 0.0078125, %v29_v13 }
  0x98   :  { %v51_v22 = vmul.f32 %v31_v16, %v31_v16  ;;  %v53_v28 = vmul.f32 %v33_v18, %v33_v18 }
  0x99   :  { %v41_v19 = vpop.xlane.xlu1 %40  ;;  %v39_v20 = vpop.xlane.xlu0 %38 }
  0x9a   :  { %v47_v23 = vmul.f32 0.0078125, %v41_v19  ;;  %v46_v24 = vmul.f32 0.0078125, %v39_v20 }
  0x9c   :  { %v55_v25 = vsub.f32 %v47_v23, %v51_v22  ;;  %v54_v26 = vsub.f32 %v46_v24, %v50_v21 }
  0x9d   :  { %v45_v29 = vpop.xlane.xlu1 %44  ;;  %v43_v30 = vpop.xlane.xlu0 %42 }
  0x9e   :  { %v63_v31 = vadd.f32 1e-05, %v55_v25  ;;  %v62_v32 = vadd.f32 1e-05, %v54_v26  ;;  %v49_v33 = vmul.f32 0.0078125, %v45_v29  ;;  %v48_v34 = vmul.f32 0.0078125, %v43_v30 }
  0xa0   :  { %193 = vrsqrt.f32 %v63_v31  ;;  %v57_v35 = vsub.f32 %v49_v33, %v53_v28  ;;  %v56_v36 = vsub.f32 %v48_v34, %v52_v27 }
  0xa1   :  { %195 = vrsqrt.f32 %v62_v32 }
  0xa2   :  { %v64_v37 = vadd.f32 1e-05, %v56_v36  ;;  %v65_v38 = vadd.f32 1e-05, %v57_v35 }
  0xa4   :  { %197 = vrsqrt.f32 %v64_v37 }
  0xa5   :  { %199 = vrsqrt.f32 %v65_v38 }
  0xaa   :  { %v194_v41 = vpop.eup %193 }
  0xab   :  { %v196_v42 = vpop.eup %195  ;;  %v71_v43 = vmul.f32 %v194_v41, %v59_v39 }
  0xac   :  { %v70_v44 = vmul.f32 %v196_v42, %v58_v40 }
  0xad   :  { %93 = vperm.xlu1 %192, %v71_v43   ;;  %v79_v54 = vmul.f32 %v71_v43, %v31_v16 }
  0xae   :  { %88 = vperm.xlu0 %191, %v70_v44   ;;  %v198_v46 = vpop.eup %197  ;;  %v78_v51 = vmul.f32 %v70_v44, %v30_v15 }
  0xaf   :  { %v72_v47 = vmul.f32 %v198_v46, %v60_v45  ;;  %v200_v48 = vpop.eup %199  ;;  %v83_v56 = vsub.f32 %v75_v55, %v79_v54 }
  0xb0   :  { %v73_v50 = vmul.f32 %v200_v48, %v61_v49  ;;  %v82_v53 = vsub.f32 %v74_v52, %v78_v51 }
  0xb1   :  { %98 = vperm.xlu1 %192, %v72_v47   ;;  %v80_v57 = vmul.f32 %v72_v47, %v32_v17 }
  0xb2   :  { %v81_v60 = vmul.f32 %v73_v50, %v33_v18 }
  0xb3   :  { %v84_v59 = vsub.f32 %v76_v58, %v80_v57 }
  0xb4   :  { %v85_v62 = vsub.f32 %v77_v61, %v81_v60 }
  0xb5   :  { %103 = vperm.xlu1 %192, %v73_v50  }
  0xb9   :  { %112 = vperm.xlu1 %192, %v82_v53  }
  0xbd   :  { %117 = vperm.xlu1 %192, %v83_v56  }
  0xc1   :  { %122 = vperm.xlu1 %192, %v84_v59  }
  0xc5   :  { %127 = vperm.xlu1 %192, %v85_v62  }
 0x12c   :  { %v94_v63 = vpop.permute.xlu1 %93 }
 0x12d   :  { %v89_v6 = vpop.permute.xlu0 %88  ;;  %v107_v9 = vmul.f32 %v236_v5, %v94_v63 }
 0x12e   :  { %v106_v8 = vmul.f32 %v230_v3, %v89_v6 }
 0x130   :  { %v99_v0 = vpop.permute.xlu1 %98 }
 0x131   :  { %v108_v16 = vmul.f32 %v228_v2, %v99_v0 }
 0x134   :  { %v104_v1 = vpop.permute.xlu1 %103 }
 0x135   :  { %v109_v18 = vmul.f32 %v234_v4, %v104_v1 }
 0x138   :  { %v113_v7 = vpop.permute.xlu1 %112 }
 0x139   :  { %v130_v10 = vadd.f32 %v113_v7, %v106_v8 }
 0x13b   :  { %v134_v13 = vmax.f32 %v130_v10, 0.0 }
 0x13c   :  { %v118_v11 = vpop.permute.xlu1 %117 }
 0x13d   :  { %v131_v12 = vadd.f32 %v118_v11, %v107_v9 }
 0x13f   :  { %v135_v14 = vmax.f32 %v131_v12, 0.0 }
 0x140   :  { %v123_v15 = vpop.permute.xlu1 %122 }
 0x141   :  { %v181_v17 = vpack.c.bf16 %v135_v14, %v134_v13  ;;  %v132_v19 = vadd.f32 %v123_v15, %v108_v16 }
 0x143   :  { %182 = vst [vmem:[%s285_s3] sm:$0xff] %v181_v17   ;;  %v136_v21 = vmax.f32 %v132_v19, 0.0 }
 0x144   :  { %v128_v20 = vpop.permute.xlu1 %127 }
 0x145   :  { %v133_v3 = vadd.f32 %v128_v20, %v109_v18 }
 0x147   :  { %v137_v5 = vmax.f32 %v133_v3, 0.0 }
 0x149   :  { %v186_v22 = vpack.c.bf16 %v137_v5, %v136_v21 }
 0x14b   :  { %189 = vst [vmem:[%s285_s3 + $0x8] sm:$0xff] %v186_v22  }

// kernel: forward.13
= control target key start
LH: loop header
LB: loop body
LE: loop exit
PB: predicated region body
PF: predicated region fallthrough
CT: control target
= control target key end

     0   :  { %s784_s1 = inlined_call_operand.vmem [shape: bf16[384,128], index: 1, kind: input, shape index: {}]   ;;  %s785_s0 = inlined_call_operand.vmem [shape: bf16[64,384], index: 0, kind: input, shape index: {}]   ;;  %s786_s2 = inlined_call_operand.vmem [shape: bf16[64,128], index: 2, kind: output, shape index: {}]  }
   0x1   :  { %v609_v0 = vld [vmem:[%s784_s1 + $0x40] sm:$0xff]   ;;  %v612_v3 = vld [vmem:[%s784_s1 + $0x48] sm:$0xff]   ;;  %v615_v6 = vld [vmem:[%s784_s1 + $0x50] sm:$0xff]  }
   0x2   :  { %v610_v1 = vld [vmem:[%s784_s1] sm:$0xff]   ;;  %533 = vmatprep.subr.bf16.mxu0 %v609_v0  ;;  %v613_v4 = vld [vmem:[%s784_s1 + $0x8] sm:$0xff]   ;;  %v616_v7 = vld [vmem:[%s784_s1 + $0x10] sm:$0xff]  }
   0x3   :  { %v611_v2 = vld [vmem:[%s784_s1 + $0x80] sm:$0xff]   ;;  %534 = vmatpush3.bf16.msra.mxu0 %v610_v1  ;;  %v614_v5 = vld [vmem:[%s784_s1 + $0x88] sm:$0xff]   ;;  %v617_v8 = vld [vmem:[%s784_s1 + $0x90] sm:$0xff]  }
   0x4   :  { %585 = vmatprep.subr.bf16.mxu1 %v611_v2  ;;  %535 = vmatprep.subr.bf16.mxu0 %v612_v3  ;;  %v618_v9 = vld [vmem:[%s784_s1 + $0x58] sm:$0xff]   ;;  %v621_v12 = vld [vmem:[%s784_s1 + $0x60] sm:$0xff]   ;;  %v624_v15 = vld [vmem:[%s784_s1 + $0x68] sm:$0xff]  }
   0x5   :  { %586 = vmatpush3.bf16.msra.mxu1 %v611_v2  ;;  %v619_v10 = vld [vmem:[%s784_s1 + $0x18] sm:$0xff]   ;;  %v623_v13 = vld [vmem:[%s784_s1 + $0xa0] sm:$0xff]   ;;  %v626_v16 = vld [vmem:[%s784_s1 + $0xa8] sm:$0xff]  }
   0x6   :  { %587 = vmatprep.subr.bf16.mxu1 %v614_v5  ;;  %v620_v11 = vld [vmem:[%s784_s1 + $0x98] sm:$0xff]   ;;  %v622_v14 = vld [vmem:[%s784_s1 + $0x20] sm:$0xff]   ;;  %v625_v17 = vld [vmem:[%s784_s1 + $0x28] sm:$0xff]  }
   0x7   :  { %536 = vmatpush3.bf16.msra.mxu0 %v613_v4  ;;  %v627_v18 = vld [vmem:[%s784_s1 + $0x70] sm:$0xff]   ;;  %v630_v21 = vld [vmem:[%s784_s1 + $0x78] sm:$0xff]   ;;  %v633_v26 = vld [vmem:[%s785_s0] ss:$12 sps:$4 sm:$0xff]  }
   0x8   :  { %537 = vmatprep.subr.bf16.mxu0 %v615_v6  ;;  %v628_v19 = vld [vmem:[%s784_s1 + $0x30] sm:$0xff]   ;;  %v632_v22 = vld [vmem:[%s784_s1 + $0xb8] sm:$0xff]   ;;  %v637_v28 = vld [vmem:[%s785_s0 + $0x20] ss:$12 sps:$4 sm:$0xff]  }
   0x9   :  { %588 = vmatpush3.bf16.msra.mxu1 %v614_v5  ;;  %v629_v20 = vld [vmem:[%s784_s1 + $0xb0] sm:$0xff]   ;;  %v631_v25 = vld [vmem:[%s784_s1 + $0x38] sm:$0xff]  }
   0xa   :  { %589 = vmatprep.subr.bf16.mxu1 %v617_v8  ;;  %v635_v23 = vld [vmem:[%s785_s0 + $0x4] ss:$12 sps:$4 sm:$0xff]   ;;  %v636_v24 = vld [vmem:[%s785_s0 + $0x8] ss:$12 sps:$4 sm:$0xff]   ;;  %v646_v34 = vld [vmem:[%s785_s0 + $0x4c] ss:$12 sps:$4 sm:$0xff]  }
   0xb   :  { %538 = vmatpush3.bf16.msra.mxu0 %v616_v7  ;;  %316 = vmatprep.mubr.bf16.mxu0 %v635_v23  ;;  %v638_v27 = vld [vmem:[%s785_s0 + $0x1c] ss:$12 sps:$4 sm:$0xff]   ;;  %v644_v29 = vld [vmem:[%s785_s0 + $0x38] ss:$12 sps:$4 sm:$0xff]   ;;  %v641_v31 = vld [vmem:[%s785_s0 + $0x34] ss:$12 sps:$4 sm:$0xff]  }
   0xc   :  { %539 = vmatprep.subr.bf16.mxu0 %v618_v9  ;;  %601 = vmatprep.mubr.bf16.mxu1 %v636_v24  ;;  %v640_v30 = vld [vmem:[%s785_s0 + $0x18] ss:$12 sps:$4 sm:$0xff]   ;;  %v645_v32 = vld [vmem:[%s785_s0 + $0x50] ss:$12 sps:$4 sm:$0xff]   ;;  %v648_v35 = vld [vmem:[%s785_s0 + $0x48] ss:$12 sps:$4 sm:$0xff]  }
   0xd   :  { %590 = vmatpush3.bf16.msra.mxu1 %v617_v8  ;;  %v643_v33 = vld [vmem:[%s785_s0 + $0x30] ss:$12 sps:$4 sm:$0xff]  }
   0xe   :  { %591 = vmatprep.subr.bf16.mxu1 %v620_v11 }
   0xf   :  { %540 = vmatpush3.bf16.msra.mxu0 %v619_v10 }
  0x10   :  { %541 = vmatprep.subr.bf16.mxu0 %v621_v12 }
  0x11   :  { %592 = vmatpush3.bf16.msra.mxu1 %v620_v11 }
  0x12   :  { %593 = vmatprep.subr.bf16.mxu1 %v623_v13 }
  0x13   :  { %542 = vmatpush3.bf16.msra.mxu0 %v622_v14 }
  0x14   :  { %543 = vmatprep.subr.bf16.mxu0 %v624_v15 }
  0x15   :  { %594 = vmatpush3.bf16.msra.mxu1 %v623_v13 }
  0x16   :  { %595 = vmatprep.subr.bf16.mxu1 %v626_v16 }
  0x17   :  { %544 = vmatpush3.bf16.msra.mxu0 %v625_v17 }
  0x18   :  { %545 = vmatprep.subr.bf16.mxu0 %v627_v18 }
  0x19   :  { %596 = vmatpush3.bf16.msra.mxu1 %v626_v16 }
  0x1a   :  { %597 = vmatprep.subr.bf16.mxu1 %v629_v20 }
  0x1b   :  { %546 = vmatpush3.bf16.msra.mxu0 %v628_v19 }
  0x1c   :  { %547 = vmatprep.subr.bf16.mxu0 %v630_v21 }
  0x1d   :  { %598 = vmatpush3.bf16.msra.mxu1 %v629_v20 }
  0x1e   :  { %599 = vmatprep.subr.bf16.mxu1 %v632_v22 }
  0x1f   :  { %548 = vmatpush3.bf16.msra.mxu0 %v631_v25 }
  0x21   :  { %600 = vmatpush3.bf16.msra.mxu1 %v632_v22 }
  0x22   :  { %317 = vmatmul.mubr.bf16.vlgmr.msra.gmra.mrb[0].mxu0 %v633_v26 }
  0x23   :  { %324 = vmatprep.mubr.bf16.mxu0 %v638_v27 }
  0x24   :  { %602 = vmatmul.mubr.bf16.vlgmr.msra.gmra.mrb[0].mxu1 %v637_v28 }
  0x25   :  { %605 = vmatprep.mubr.bf16.mxu1 %v644_v29 }
  0x2a   :  { %325 = vmatmul.mubr.bf16.gmra.mrb[4].mxu0 %v640_v30 }
  0x2b   :  { %332 = vmatprep.mubr.bf16.mxu0 %v641_v31 }
  0x2c   :  { %606 = vmatmul.mubr.bf16.gmra.mrb[4].mxu1 %v645_v32 }
  0x32   :  { %333 = vmatmul.mubr.bf16.gmra.mrb[8].mxu0 %v643_v33 }
  0x33   :  { %340 = vmatprep.mubr.bf16.mxu0 %v646_v34 }
  0x3a   :  { %341 = vmatmul.mubr.bf16.gmra.mrb[12].mxu0 %v648_v35 }
  0xf5   :  { %v549_v36 = vpop.f32.mrb[0].mxu0 }
  0xf6   :  { %v550_v37 = vpop.f32.mrb[1].mxu0 }
  0xf7   :  { %v551_v38 = vadd.f32 %v550_v37, %v549_v36  ;;  %v552_v39 = vpop.f32.mrb[2].mxu0  ;;  %v603_v40 = vpop.f32.mrb[0].mxu1 }
  0xf8   :  { %v553_v41 = vpop.f32.mrb[3].mxu0  ;;  %v383_v42 = vpop.f32.mrb[1].mxu1 }
  0xf9   :  { %v554_v43 = vadd.f32 %v553_v41, %v552_v39  ;;  %v384_v44 = vadd.f32 %v551_v38, %v383_v42  ;;  %v604_v45 = vpop.f32.mrb[2].mxu1 }
  0xfa   :  { %v386_v46 = vpop.f32.mrb[3].mxu1 }
  0xfb   :  { %v387_v47 = vadd.f32 %v554_v43, %v386_v46 }
  0xfd   :  { %v513_v48 = vpack.c.bf16 %v387_v47, %v384_v44  ;;  %v555_v49 = vpop.f32.mrb[4].mxu0 }
  0xfe   :  { %v556_v50 = vpop.f32.mrb[5].mxu0 }
  0xff   :  { %514 = vst [vmem:[%s786_s2] sm:$0xff] %v513_v48   ;;  %v557_v51 = vadd.f32 %v556_v50, %v555_v49  ;;  %v558_v52 = vpop.f32.mrb[6].mxu0  ;;  %v607_v53 = vpop.f32.mrb[4].mxu1 }
 0x100   :  { %v559_v54 = vpop.f32.mrb[7].mxu0  ;;  %v399_v55 = vpop.f32.mrb[5].mxu1 }
 0x101   :  { %v392_v56 = vadd.f32 %v603_v40, %v557_v51  ;;  %v560_v57 = vadd.f32 %v559_v54, %v558_v52  ;;  %v608_v58 = vpop.f32.mrb[6].mxu1 }
 0x102   :  { %v402_v59 = vpop.f32.mrb[7].mxu1 }
 0x103   :  { %v395_v60 = vadd.f32 %v604_v45, %v560_v57 }
 0x105   :  { %v518_v61 = vpack.c.bf16 %v395_v60, %v392_v56  ;;  %v561_v62 = vpop.f32.mrb[8].mxu0 }
 0x106   :  { %v562_v63 = vpop.f32.mrb[9].mxu0 }
 0x107   :  { %530 = vst [vmem:[%s786_s2 + $0x8] sm:$0xff] %v518_v61   ;;  %v563_v0 = vadd.f32 %v562_v63, %v561_v62  ;;  %v564_v1 = vpop.f32.mrb[10].mxu0 }
 0x108   :  { %v565_v2 = vpop.f32.mrb[11].mxu0 }
 0x109   :  { %v566_v3 = vadd.f32 %v565_v2, %v564_v1  ;;  %v400_v4 = vadd.f32 %v563_v0, %v399_v55 }
 0x10b   :  { %v403_v5 = vadd.f32 %v566_v3, %v402_v59 }
 0x10d   :  { %v523_v6 = vpack.c.bf16 %v403_v5, %v400_v4  ;;  %v567_v7 = vpop.f32.mrb[12].mxu0 }
 0x10e   :  { %v568_v8 = vpop.f32.mrb[13].mxu0 }
 0x10f   :  { %531 = vst [vmem:[%s786_s2 + $0x10] sm:$0xff] %v523_v6   ;;  %v569_v9 = vadd.f32 %v568_v8, %v567_v7  ;;  %v570_v10 = vpop.f32.mrb[14].mxu0 }
 0x110   :  { %v571_v11 = vpop.f32.mrb[15].mxu0 }
 0x111   :  { %v408_v12 = vadd.f32 %v607_v53, %v569_v9  ;;  %v572_v13 = vadd.f32 %v571_v11, %v570_v10 }
 0x113   :  { %v411_v14 = vadd.f32 %v608_v58, %v572_v13 }
 0x115   :  { %v528_v15 = vpack.c.bf16 %v411_v14, %v408_v12 }
 0x117   :  { %532 = vst [vmem:[%s786_s2 + $0x18] sm:$0xff] %v528_v15  }

// kernel: forward.14
= control target key start
LH: loop header
LB: loop body
LE: loop exit
PB: predicated region body
PF: predicated region fallthrough
CT: control target
= control target key end

     0   :  { %v167_v32 = vmov 0   ;;  %s272_s0 = inlined_call_operand.vmem [shape: bf16[16,512], index: 0, kind: input, shape index: {}]   ;;  %s273_s1 = inlined_call_operand.vmem [shape: f32[16,1], index: 1, kind: input, shape index: {}]   ;;  %s274_s2 = inlined_call_operand.vmem [shape: f32[16,1], index: 2, kind: input, shape index: {}]   ;;  %s275_s3 = inlined_call_operand.vmem [shape: bf16[16,512], index: 3, kind: output, shape index: {}]  }
   0x1   :  { %v14_v0 = vld [vmem:[%s272_s0] sm:$0xff]  ;;  %v15_v1 = vld [vmem:[%s272_s0 + $0x8] sm:$0xff]  ;;  %v16_v2 = vld [vmem:[%s272_s0 + $0x10] sm:$0xff]  ;;  %161 = vset.pattern.permute.xlu0 %v167_v32  ;;  %162 = vset.pattern.permute.xlu1 %v167_v32 }
   0x2   :  { %v197_v3 = vunpack.c.l.bf16 %v14_v0  ;;  %v199_v4 = vunpack.c.h.bf16 %v14_v0  ;;  %v201_v5 = vunpack.c.l.bf16 %v15_v1  ;;  %v203_v6 = vunpack.c.h.bf16 %v15_v1  ;;  %v17_v7 = vld [vmem:[%s272_s0 + $0x18] sm:$0xff]  ;;  %v62_v47 = vld [vmem:[%s273_s1] sm:$0xff]  ;;  %v63_v50 = vld [vmem:[%s273_s1 + $0x8] sm:$0xff] }
   0x3   :  { %v208_v8 = vunpack.c.l.bf16 %v16_v2  ;;  %v210_v9 = vunpack.c.h.bf16 %v16_v2  ;;  %v212_v10 = vunpack.c.l.bf16 %v17_v7  ;;  %v214_v11 = vunpack.c.h.bf16 %v17_v7  ;;  %v70_v54 = vld [vmem:[%s274_s2] sm:$0xff]  ;;  %v71_v57 = vld [vmem:[%s274_s2 + $0x8] sm:$0xff] }
   0x4   :  { %v26_v12 = vadd.f32 %v199_v4, %v197_v3  ;;  %v38_v13 = vmul.f32 %v197_v3, %v197_v3  ;;  %v39_v14 = vmul.f32 %v199_v4, %v199_v4  ;;  %v40_v15 = vmul.f32 %v201_v5, %v201_v5 }
   0x5   :  { %v31_v16 = vadd.f32 %v210_v9, %v208_v8  ;;  %v42_v17 = vmul.f32 %v208_v8, %v208_v8  ;;  %v43_v18 = vmul.f32 %v210_v9, %v210_v9  ;;  %v41_v20 = vmul.f32 %v203_v6, %v203_v6 }
   0x6   :  { %v27_v19 = vadd.f32 %v26_v12, %v201_v5  ;;  %v46_v21 = vadd.f32 %v39_v14, %v38_v13  ;;  %v44_v22 = vmul.f32 %v212_v10, %v212_v10  ;;  %v45_v27 = vmul.f32 %v214_v11, %v214_v11 }
   0x7   :  { %v32_v23 = vadd.f32 %v31_v16, %v212_v10  ;;  %v51_v24 = vadd.f32 %v43_v18, %v42_v17 }
   0x8   :  { %v28_v25 = vadd.f32 %v27_v19, %v203_v6  ;;  %v47_v26 = vadd.f32 %v46_v21, %v40_v15 }
   0x9   :  { %v52_v28 = vadd.f32 %v51_v24, %v44_v22  ;;  %v33_v30 = vadd.f32 %v32_v23, %v214_v11 }
   0xa   :  { %29 = vadd.xlane.f32.xlu0 %v28_v25  ;;  %v48_v29 = vadd.f32 %v47_v26, %v41_v20 }
   0xb   :  { %v53_v31 = vadd.f32 %v52_v28, %v45_v27 }
   0xc   :  { %49 = vadd.xlane.f32.xlu1 %v48_v29 }
   0xe   :  { %34 = vadd.xlane.f32.xlu0 %v33_v30 }
  0x10   :  { %54 = vadd.xlane.f32.xlu1 %v53_v31 }
  0x97   :  { %v30_v33 = vpop.xlane.xlu0 %29 }
  0x98   :  { %v36_v34 = vmul.f32 0.001953125, %v30_v33 }
  0x99   :  { %v50_v35 = vpop.xlane.xlu1 %49 }
  0x9a   :  { %v58_v36 = vmul.f32 %v36_v34, %v36_v34  ;;  %v56_v37 = vmul.f32 0.001953125, %v50_v35 }
  0x9b   :  { %v35_v38 = vpop.xlane.xlu0 %34 }
  0x9c   :  { %v60_v39 = vsub.f32 %v56_v37, %v58_v36  ;;  %v37_v40 = vmul.f32 0.001953125, %v35_v38 }
  0x9d   :  { %v55_v41 = vpop.xlane.xlu1 %54 }
  0x9e   :  { %v64_v42 = vadd.f32 1e-05, %v60_v39  ;;  %v59_v43 = vmul.f32 %v37_v40, %v37_v40  ;;  %v57_v44 = vmul.f32 0.001953125, %v55_v41 }
  0xa0   :  { %163 = vrsqrt.f32 %v64_v42  ;;  %v61_v45 = vsub.f32 %v57_v44, %v59_v43 }
  0xa2   :  { %v65_v46 = vadd.f32 1e-05, %v61_v45 }
  0xa4   :  { %165 = vrsqrt.f32 %v65_v46 }
  0xaa   :  { %v164_v48 = vpop.eup %163 }
  0xab   :  { %v68_v49 = vmul.f32 %v164_v48, %v62_v47 }
  0xad   :  { %78 = vperm.xlu0 %161, %v68_v49   ;;  %v72_v53 = vmul.f32 %v68_v49, %v36_v34 }
  0xae   :  { %v166_v51 = vpop.eup %165 }
  0xaf   :  { %v69_v52 = vmul.f32 %v166_v51, %v63_v50  ;;  %v74_v55 = vsub.f32 %v70_v54, %v72_v53 }
  0xb1   :  { %83 = vperm.xlu1 %162, %v69_v52   ;;  %v73_v56 = vmul.f32 %v69_v52, %v37_v40 }
  0xb3   :  { %v75_v58 = vsub.f32 %v71_v57, %v73_v56 }
  0xb5   :  { %96 = vperm.xlu1 %162, %v74_v55  }
  0xb9   :  { %101 = vperm.xlu1 %162, %v75_v58  }
 0x12c   :  { %v79_v59 = vpop.permute.xlu0 %78 }
 0x12d   :  { %v86_v61 = vmul.f32 %v79_v59, %v197_v3  ;;  %v87_v62 = vmul.f32 %v79_v59, %v199_v4  ;;  %v88_v63 = vmul.f32 %v79_v59, %v201_v5  ;;  %v89_v0 = vmul.f32 %v79_v59, %v203_v6 }
 0x130   :  { %v84_v60 = vpop.permute.xlu1 %83 }
 0x131   :  { %v90_v14 = vmul.f32 %v84_v60, %v208_v8  ;;  %v91_v15 = vmul.f32 %v84_v60, %v210_v9  ;;  %v92_v3 = vmul.f32 %v84_v60, %v212_v10  ;;  %v93_v4 = vmul.f32 %v84_v60, %v214_v11 }
 0x134   :  { %v97_v1 = vpop.permute.xlu1 %96 }
 0x135   :  { %v104_v2 = vadd.f32 %v97_v1, %v86_v61  ;;  %v105_v7 = vadd.f32 %v97_v1, %v87_v62  ;;  %v106_v12 = vadd.f32 %v97_v1, %v88_v63  ;;  %v107_v13 = vadd.f32 %v97_v1, %v89_v0 }
 0x137   :  { %v112_v16 = vmax.f32 %v104_v2, 0.0  ;;  %v113_v17 = vmax.f32 %v105_v7, 0.0  ;;  %v114_v18 = vmax.f32 %v106_v12, 0.0  ;;  %v115_v19 = vmax.f32 %v107_v13, 0.0 }
 0x138   :  { %v102_v5 = vpop.permute.xlu1 %101 }
 0x139   :  { %v156_v20 = vpack.c.bf16 %v113_v17, %v112_v16  ;;  %v157_v6 = vpack.c.bf16 %v115_v19, %v114_v18  ;;  %v108_v21 = vadd.f32 %v102_v5, %v90_v14  ;;  %v109_v22 = vadd.f32 %v102_v5, %v91_v15 }
 0x13a   :  { %v110_v23 = vadd.f32 %v102_v5, %v92_v3  ;;  %v111_v24 = vadd.f32 %v102_v5, %v93_v4 }
 0x13b   :  { %144 = vst [vmem:[%s275_s3] sm:$0xff] %v156_v20  ;;  %145 = vst [vmem:[%s275_s3 + $0x8] sm:$0xff] %v157_v6  ;;  %v116_v8 = vmax.f32 %v108_v21, 0.0  ;;  %v117_v9 = vmax.f32 %v109_v22, 0.0 }
 0x13c   :  { %v118_v10 = vmax.f32 %v110_v23, 0.0  ;;  %v119_v25 = vmax.f32 %v111_v24, 0.0 }
 0x13d   :  { %v158_v11 = vpack.c.bf16 %v117_v9, %v116_v8 }
 0x13e   :  { %v159_v26 = vpack.c.bf16 %v119_v25, %v118_v10 }
 0x13f   :  { %146 = vst [vmem:[%s275_s3 + $0x10] sm:$0xff] %v158_v11 }
 0x140   :  { %147 = vst [vmem:[%s275_s3 + $0x18] sm:$0xff] %v159_v26 }

// kernel: forward.15
= control target key start
LH: loop header
LB: loop body
LE: loop exit
PB: predicated region body
PF: predicated region fallthrough
CT: control target
= control target key end

     0   :  { %s1014_s1 = inlined_call_operand.vmem [shape: bf16[256,512], index: 1, kind: input, shape index: {}]   ;;  %s1015_s0 = inlined_call_operand.vmem [shape: bf16[32,256], index: 0, kind: input, shape index: {}]   ;;  %s1016_s2 = inlined_call_operand.vmem [shape: bf16[32,512], index: 2, kind: output, shape index: {}]  }
   0x1   :  { %v669_v0 = vld [vmem:[%s1014_s1 + $0x4] ss:$16 sps:$4 sm:$0xff]   ;;  %v671_v1 = vld [vmem:[%s1014_s1 + $0xc] ss:$16 sps:$4 sm:$0xff]   ;;  %v673_v2 = vld [vmem:[%s1014_s1] ss:$16 sps:$4 sm:$0xff]  }
   0x2   :  { %419 = vmatprep.subr.bf16.mxu0 %v669_v0  ;;  %v674_v3 = vld [vmem:[%s1014_s1 + $0x8] ss:$16 sps:$4 sm:$0xff]   ;;  %472 = vmatprep.subr.bf16.mxu1 %v671_v1  ;;  %v675_v4 = vld [vmem:[%s1014_s1 + $0x24] ss:$16 sps:$4 sm:$0xff]   ;;  %v677_v5 = vld [vmem:[%s1014_s1 + $0x2c] ss:$16 sps:$4 sm:$0xff]  }
   0x3   :  { %420 = vmatpush1.bf16.msra.mxu0 %v673_v2  ;;  %473 = vmatpush1.bf16.msra.mxu1 %v674_v3  ;;  %v679_v6 = vld [vmem:[%s1014_s1 + $0x20] ss:$16 sps:$4 sm:$0xff]   ;;  %v680_v7 = vld [vmem:[%s1014_s1 + $0x28] ss:$16 sps:$4 sm:$0xff]   ;;  %v681_v8 = vld [vmem:[%s1014_s1 + $0x44] ss:$16 sps:$4 sm:$0xff]  }
   0x4   :  { %421 = vmatprep.subr.bf16.mxu0 %v675_v4  ;;  %474 = vmatprep.subr.bf16.mxu1 %v677_v5  ;;  %v683_v9 = vld [vmem:[%s1014_s1 + $0x4c] ss:$16 sps:$4 sm:$0xff]   ;;  %v685_v10 = vld [vmem:[%s1014_s1 + $0x40] ss:$16 sps:$4 sm:$0xff]   ;;  %v686_v11 = vld [vmem:[%s1014_s1 + $0x48] ss:$16 sps:$4 sm:$0xff]  }
   0x5   :  { %v687_v12 = vld [vmem:[%s1014_s1 + $0x64] ss:$16 sps:$4 sm:$0xff]   ;;  %v689_v13 = vld [vmem:[%s1014_s1 + $0x6c] ss:$16 sps:$4 sm:$0xff]   ;;  %v691_v14 = vld [vmem:[%s1014_s1 + $0x60] ss:$16 sps:$4 sm:$0xff]  }
   0x6   :  { %v692_v15 = vld [vmem:[%s1014_s1 + $0x68] ss:$16 sps:$4 sm:$0xff]   ;;  %v693_v16 = vld [vmem:[%s1014_s1 + $0x84] ss:$16 sps:$4 sm:$0xff]   ;;  %v695_v17 = vld [vmem:[%s1014_s1 + $0x8c] ss:$16 sps:$4 sm:$0xff]  }
   0x7   :  { %422 = vmatpush1.bf16.msra.mxu0 %v679_v6  ;;  %475 = vmatpush1.bf16.msra.mxu1 %v680_v7  ;;  %v697_v18 = vld [vmem:[%s1014_s1 + $0x80] ss:$16 sps:$4 sm:$0xff]   ;;  %v698_v19 = vld [vmem:[%s1014_s1 + $0x88] ss:$16 sps:$4 sm:$0xff]   ;;  %v699_v20 = vld [vmem:[%s1014_s1 + $0xa4] ss:$16 sps:$4 sm:$0xff]  }
   0x8   :  { %423 = vmatprep.subr.bf16.mxu0 %v681_v8  ;;  %476 = vmatprep.subr.bf16.mxu1 %v683_v9  ;;  %v701_v21 = vld [vmem:[%s1014_s1 + $0xac] ss:$16 sps:$4 sm:$0xff]   ;;  %v703_v22 = vld [vmem:[%s1014_s1 + $0xa0] ss:$16 sps:$4 sm:$0xff]   ;;  %v704_v23 = vld [vmem:[%s1014_s1 + $0xa8] ss:$16 sps:$4 sm:$0xff]  }
   0x9   :  { %v705_v24 = vld [vmem:[%s1014_s1 + $0xc4] ss:$16 sps:$4 sm:$0xff]   ;;  %v707_v25 = vld [vmem:[%s1014_s1 + $0xcc] ss:$16 sps:$4 sm:$0xff]   ;;  %v709_v26 = vld [vmem:[%s1014_s1 + $0xc0] ss:$16 sps:$4 sm:$0xff]  }
   0xa   :  { %v710_v27 = vld [vmem:[%s1014_s1 + $0xc8] ss:$16 sps:$4 sm:$0xff]   ;;  %v711_v28 = vld [vmem:[%s1014_s1 + $0xe4] ss:$16 sps:$4 sm:$0xff]   ;;  %v713_v29 = vld [vmem:[%s1014_s1 + $0xec] ss:$16 sps:$4 sm:$0xff]  }
   0xb   :  { %424 = vmatpush1.bf16.msra.mxu0 %v685_v10  ;;  %477 = vmatpush1.bf16.msra.mxu1 %v686_v11  ;;  %v715_v30 = vld [vmem:[%s1014_s1 + $0xe0] ss:$16 sps:$4 sm:$0xff]   ;;  %v716_v31 = vld [vmem:[%s1014_s1 + $0xe8] ss:$16 sps:$4 sm:$0xff]   ;;  %v717_v32 = vld [vmem:[%s1014_s1 + $0x104] ss:$16 sps:$4 sm:$0xff]  }
   0xc   :  { %425 = vmatprep.subr.bf16.mxu0 %v687_v12  ;;  %478 = vmatprep.subr.bf16.mxu1 %v689_v13  ;;  %v719_v33 = vld [vmem:[%s1014_s1 + $0x10c] ss:$16 sps:$4 sm:$0xff]   ;;  %v721_v34 = vld [vmem:[%s1014_s1 + $0x100] ss:$16 sps:$4 sm:$0xff]   ;;  %v722_v35 = vld [vmem:[%s1014_s1 + $0x108] ss:$16 sps:$4 sm:$0xff]  }
   0xd   :  { %v723_v36 = vld [vmem:[%s1014_s1 + $0x124] ss:$16 sps:$4 sm:$0xff]   ;;  %v725_v37 = vld [vmem:[%s1014_s1 + $0x12c] ss:$16 sps:$4 sm:$0xff]   ;;  %v727_v38 = vld [vmem:[%s1014_s1 + $0x120] ss:$16 sps:$4 sm:$0xff]  }
   0xe   :  { %v728_v39 = vld [vmem:[%s1014_s1 + $0x128] ss:$16 sps:$4 sm:$0xff]   ;;  %v729_v40 = vld [vmem:[%s1014_s1 + $0x144] ss:$16 sps:$4 sm:$0xff]   ;;  %v731_v41 = vld [vmem:[%s1014_s1 + $0x14c] ss:$16 sps:$4 sm:$0xff]  }
   0xf   :  { %426 = vmatpush1.bf16.msra.mxu0 %v691_v14  ;;  %479 = vmatpush1.bf16.msra.mxu1 %v692_v15  ;;  %v733_v42 = vld [vmem:[%s1014_s1 + $0x140] ss:$16 sps:$4 sm:$0xff]   ;;  %v734_v43 = vld [vmem:[%s1014_s1 + $0x148] ss:$16 sps:$4 sm:$0xff]   ;;  %v735_v44 = vld [vmem:[%s1014_s1 + $0x164] ss:$16 sps:$4 sm:$0xff]  }
  0x10   :  { %427 = vmatprep.subr.bf16.mxu0 %v693_v16  ;;  %480 = vmatprep.subr.bf16.mxu1 %v695_v17  ;;  %v737_v45 = vld [vmem:[%s1014_s1 + $0x16c] ss:$16 sps:$4 sm:$0xff]   ;;  %v739_v46 = vld [vmem:[%s1014_s1 + $0x160] ss:$16 sps:$4 sm:$0xff]   ;;  %v740_v48 = vld [vmem:[%s1014_s1 + $0x168] ss:$16 sps:$4 sm:$0xff]  }
  0x11   :  { %v767_v47 = vld [vmem:[%s1015_s0 + $0x4] ss:$8 sps:$4 sm:$0xff]   ;;  %v745_v51 = vld [vmem:[%s1014_s1 + $0x180] ss:$16 sps:$4 sm:$0xff]   ;;  %v746_v52 = vld [vmem:[%s1014_s1 + $0x188] ss:$16 sps:$4 sm:$0xff]  }
  0x12   :  { %v741_v49 = vld [vmem:[%s1014_s1 + $0x184] ss:$16 sps:$4 sm:$0xff]   ;;  %v743_v50 = vld [vmem:[%s1014_s1 + $0x18c] ss:$16 sps:$4 sm:$0xff]   ;;  %451 = vmatprep.mubr.bf16.mxu0 %v767_v47  ;;  %504 = vmatprep.mubr.bf16.mxu1 %v767_v47  ;;  %v751_v55 = vld [vmem:[%s1014_s1 + $0x1a0] ss:$16 sps:$4 sm:$0xff]  }
  0x13   :  { %428 = vmatpush1.bf16.msra.mxu0 %v697_v18  ;;  %481 = vmatpush1.bf16.msra.mxu1 %v698_v19  ;;  %v747_v53 = vld [vmem:[%s1014_s1 + $0x1a4] ss:$16 sps:$4 sm:$0xff]   ;;  %v749_v54 = vld [vmem:[%s1014_s1 + $0x1ac] ss:$16 sps:$4 sm:$0xff]   ;;  %v752_v56 = vld [vmem:[%s1014_s1 + $0x1a8] ss:$16 sps:$4 sm:$0xff]  }
  0x14   :  { %429 = vmatprep.subr.bf16.mxu0 %v699_v20  ;;  %482 = vmatprep.subr.bf16.mxu1 %v701_v21  ;;  %v753_v57 = vld [vmem:[%s1014_s1 + $0x1c4] ss:$16 sps:$4 sm:$0xff]   ;;  %v755_v58 = vld [vmem:[%s1014_s1 + $0x1cc] ss:$16 sps:$4 sm:$0xff]   ;;  %v757_v59 = vld [vmem:[%s1014_s1 + $0x1c0] ss:$16 sps:$4 sm:$0xff]  }
  0x15   :  { %v758_v60 = vld [vmem:[%s1014_s1 + $0x1c8] ss:$16 sps:$4 sm:$0xff]   ;;  %v759_v61 = vld [vmem:[%s1014_s1 + $0x1e4] ss:$16 sps:$4 sm:$0xff]   ;;  %v761_v62 = vld [vmem:[%s1014_s1 + $0x1ec] ss:$16 sps:$4 sm:$0xff]  }
  0x16   :  { %v763_v63 = vld [vmem:[%s1014_s1 + $0x1e0] ss:$16 sps:$4 sm:$0xff]   ;;  %v764_v0 = vld [vmem:[%s1014_s1 + $0x1e8] ss:$16 sps:$4 sm:$0xff]   ;;  %v768_v2 = vld [vmem:[%s1015_s0 + $0x14] ss:$8 sps:$4 sm:$0xff]  }
  0x17   :  { %430 = vmatpush1.bf16.msra.mxu0 %v703_v22  ;;  %483 = vmatpush1.bf16.msra.mxu1 %v704_v23  ;;  %v765_v1 = vld [vmem:[%s1015_s0] ss:$8 sps:$4 sm:$0xff]   ;;  %v770_v3 = vld [vmem:[%s1015_s0 + $0x10] ss:$8 sps:$4 sm:$0xff]  }
  0x18   :  { %431 = vmatprep.subr.bf16.mxu0 %v705_v24  ;;  %484 = vmatprep.subr.bf16.mxu1 %v707_v25 }
  0x1b   :  { %432 = vmatpush1.bf16.msra.mxu0 %v709_v26  ;;  %485 = vmatpush1.bf16.msra.mxu1 %v710_v27 }
  0x1c   :  { %433 = vmatprep.subr.bf16.mxu0 %v711_v28  ;;  %486 = vmatprep.subr.bf16.mxu1 %v713_v29 }
  0x1f   :  { %434 = vmatpush1.bf16.msra.mxu0 %v715_v30  ;;  %487 = vmatpush1.bf16.msra.mxu1 %v716_v31 }
  0x20   :  { %435 = vmatprep.subr.bf16.mxu0 %v717_v32  ;;  %488 = vmatprep.subr.bf16.mxu1 %v719_v33 }
  0x23   :  { %436 = vmatpush1.bf16.msra.mxu0 %v721_v34  ;;  %489 = vmatpush1.bf16.msra.mxu1 %v722_v35 }
  0x24   :  { %437 = vmatprep.subr.bf16.mxu0 %v723_v36  ;;  %490 = vmatprep.subr.bf16.mxu1 %v725_v37 }
  0x27   :  { %438 = vmatpush1.bf16.msra.mxu0 %v727_v38  ;;  %491 = vmatpush1.bf16.msra.mxu1 %v728_v39 }
  0x28   :  { %439 = vmatprep.subr.bf16.mxu0 %v729_v40  ;;  %492 = vmatprep.subr.bf16.mxu1 %v731_v41 }
  0x2b   :  { %440 = vmatpush1.bf16.msra.mxu0 %v733_v42  ;;  %493 = vmatpush1.bf16.msra.mxu1 %v734_v43 }
  0x2c   :  { %441 = vmatprep.subr.bf16.mxu0 %v735_v44  ;;  %494 = vmatprep.subr.bf16.mxu1 %v737_v45 }
  0x2f   :  { %442 = vmatpush1.bf16.msra.mxu0 %v739_v46  ;;  %495 = vmatpush1.bf16.msra.mxu1 %v740_v48 }
  0x30   :  { %443 = vmatprep.subr.bf16.mxu0 %v741_v49  ;;  %496 = vmatprep.subr.bf16.mxu1 %v743_v50 }
  0x33   :  { %444 = vmatpush1.bf16.msra.mxu0 %v745_v51  ;;  %497 = vmatpush1.bf16.msra.mxu1 %v746_v52 }
  0x34   :  { %445 = vmatprep.subr.bf16.mxu0 %v747_v53  ;;  %498 = vmatprep.subr.bf16.mxu1 %v749_v54 }
  0x37   :  { %446 = vmatpush1.bf16.msra.mxu0 %v751_v55  ;;  %499 = vmatpush1.bf16.msra.mxu1 %v752_v56 }
  0x38   :  { %447 = vmatprep.subr.bf16.mxu0 %v753_v57  ;;  %500 = vmatprep.subr.bf16.mxu1 %v755_v58 }
  0x3b   :  { %448 = vmatpush1.bf16.msra.mxu0 %v757_v59  ;;  %501 = vmatpush1.bf16.msra.mxu1 %v758_v60 }
  0x3c   :  { %449 = vmatprep.subr.bf16.mxu0 %v759_v61  ;;  %502 = vmatprep.subr.bf16.mxu1 %v761_v62 }
  0x3f   :  { %450 = vmatpush1.bf16.msra.mxu0 %v763_v63  ;;  %503 = vmatpush1.bf16.msra.mxu1 %v764_v0 }
  0x42   :  { %452 = vmatmul.mubr.bf16.vlgmr.msra.gmra.mrb[0].mxu0 %v765_v1  ;;  %505 = vmatmul.mubr.bf16.vlgmr.msra.gmra.mrb[0].mxu1 %v765_v1 }
  0x43   :  { %461 = vmatprep.mubr.bf16.mxu0 %v768_v2  ;;  %514 = vmatprep.mubr.bf16.mxu1 %v768_v2 }
  0x4a   :  { %462 = vmatmul.mubr.bf16.gmra.mrb[4].mxu0 %v770_v3  ;;  %515 = vmatmul.mubr.bf16.gmra.mrb[4].mxu1 %v770_v3 }
 0x115   :  { %v453_v4 = vpop.f32.mrb[0].mxu0  ;;  %v506_v5 = vpop.f32.mrb[0].mxu1 }
 0x116   :  { %v455_v6 = vpop.f32.mrb[1].mxu0  ;;  %v508_v7 = vpop.f32.mrb[1].mxu1 }
 0x117   :  { %v661_v8 = vpack.c.bf16 %v455_v6, %v453_v4  ;;  %v662_v9 = vpack.c.bf16 %v508_v7, %v506_v5  ;;  %v457_v10 = vpop.f32.mrb[2].mxu0  ;;  %v510_v11 = vpop.f32.mrb[2].mxu1 }
 0x118   :  { %v459_v12 = vpop.f32.mrb[3].mxu0  ;;  %v512_v13 = vpop.f32.mrb[3].mxu1 }
 0x119   :  { %573 = vst [vmem:[%s1016_s2] sm:$0xff] %v661_v8  ;;  %574 = vst [vmem:[%s1016_s2 + $0x8] sm:$0xff] %v662_v9  ;;  %v663_v14 = vpack.c.bf16 %v459_v12, %v457_v10  ;;  %v664_v15 = vpack.c.bf16 %v512_v13, %v510_v11 }
 0x11b   :  { %575 = vst [vmem:[%s1016_s2 + $0x10] sm:$0xff] %v663_v14  ;;  %576 = vst [vmem:[%s1016_s2 + $0x18] sm:$0xff] %v664_v15 }
 0x11d   :  { %v463_v16 = vpop.f32.mrb[4].mxu0  ;;  %v516_v17 = vpop.f32.mrb[4].mxu1 }
 0x11e   :  { %v465_v18 = vpop.f32.mrb[5].mxu0  ;;  %v518_v19 = vpop.f32.mrb[5].mxu1 }
 0x11f   :  { %v665_v20 = vpack.c.bf16 %v465_v18, %v463_v16  ;;  %v666_v21 = vpack.c.bf16 %v518_v19, %v516_v17  ;;  %v467_v22 = vpop.f32.mrb[6].mxu0  ;;  %v520_v23 = vpop.f32.mrb[6].mxu1 }
 0x120   :  { %v469_v24 = vpop.f32.mrb[7].mxu0  ;;  %v522_v25 = vpop.f32.mrb[7].mxu1 }
 0x121   :  { %577 = vst [vmem:[%s1016_s2 + $0x20] sm:$0xff] %v665_v20  ;;  %578 = vst [vmem:[%s1016_s2 + $0x28] sm:$0xff] %v666_v21  ;;  %v667_v26 = vpack.c.bf16 %v469_v24, %v467_v22  ;;  %v668_v27 = vpack.c.bf16 %v522_v25, %v520_v23 }
 0x123   :  { %579 = vst [vmem:[%s1016_s2 + $0x30] sm:$0xff] %v667_v26  ;;  %580 = vst [vmem:[%s1016_s2 + $0x38] sm:$0xff] %v668_v27 }

// kernel: forward.16
= control target key start
LH: loop header
LB: loop body
LE: loop exit
PB: predicated region body
PF: predicated region fallthrough
CT: control target
= control target key end

     0   :  { %s824_s0 = inlined_call_operand.vmem [shape: bf16[16,2048], index: 0, kind: input, shape index: {}]   ;;  %s825_s1 = inlined_call_operand.vmem [shape: f32[16,1], index: 1, kind: input, shape index: {}]   ;;  %s826_s2 = inlined_call_operand.vmem [shape: f32[16,1], index: 2, kind: input, shape index: {}]   ;;  %s827_s3 = inlined_call_operand.vmem [shape: bf16[16,2048], index: 3, kind: output, shape index: {}]  }
   0x1   :  { %v14_v0 = vld [vmem:[%s824_s0] sm:$0xff]  ;;  %v15_v1 = vld [vmem:[%s824_s0 + $0x8] sm:$0xff]  ;;  %v16_v4 = vld [vmem:[%s824_s0 + $0x10] sm:$0xff] }
   0x2   :  { %v482_v2 = vunpack.c.l.bf16 %v14_v0  ;;  %v484_v3 = vunpack.c.h.bf16 %v14_v0  ;;  %v489_v5 = vunpack.c.l.bf16 %v15_v1  ;;  %v491_v6 = vunpack.c.h.bf16 %v15_v1  ;;  %v17_v11 = vld [vmem:[%s824_s0 + $0x18] sm:$0xff]  ;;  %v22_v14 = vld [vmem:[%s824_s0 + $0x40] sm:$0xff]  ;;  %v23_v21 = vld [vmem:[%s824_s0 + $0x48] sm:$0xff] }
   0x3   :  { %v499_v10 = vunpack.c.l.bf16 %v16_v4  ;;  %v510_v15 = vunpack.c.h.bf16 %v16_v4  ;;  %v515_v19 = vunpack.c.l.bf16 %v17_v11  ;;  %v18_v22 = vld [vmem:[%s824_s0 + $0x20] sm:$0xff]  ;;  %v526_v25 = vunpack.c.l.bf16 %v22_v14  ;;  %v24_v34 = vld [vmem:[%s824_s0 + $0x50] sm:$0xff]  ;;  %v19_v35 = vld [vmem:[%s824_s0 + $0x28] sm:$0xff] }
   0x4   :  { %v62_v7 = vadd.f32 %v484_v3, %v482_v2  ;;  %v98_v8 = vmul.f32 %v482_v2, %v482_v2  ;;  %v99_v9 = vmul.f32 %v484_v3, %v484_v3  ;;  %v100_v13 = vmul.f32 %v489_v5, %v489_v5  ;;  %v25_v48 = vld [vmem:[%s824_s0 + $0x58] sm:$0xff]  ;;  %v20_v51 = vld [vmem:[%s824_s0 + $0x30] sm:$0xff]  ;;  %v26_v1 = vld [vmem:[%s824_s0 + $0x60] sm:$0xff] }
   0x5   :  { %v101_v17 = vmul.f32 %v491_v6, %v491_v6  ;;  %v102_v20 = vmul.f32 %v499_v10, %v499_v10  ;;  %v528_v26 = vunpack.c.h.bf16 %v22_v14  ;;  %v530_v27 = vunpack.c.h.bf16 %v17_v11 }
   0x6   :  { %v63_v12 = vadd.f32 %v62_v7, %v489_v5  ;;  %v130_v18 = vadd.f32 %v99_v9, %v98_v8  ;;  %v103_v29 = vmul.f32 %v510_v15, %v510_v15  ;;  %v535_v31 = vunpack.c.l.bf16 %v23_v21  ;;  %v21_v8 = vld [vmem:[%s824_s0 + $0x38] sm:$0xff] }
   0x7   :  { %v537_v32 = vunpack.c.l.bf16 %v18_v22  ;;  %v104_v33 = vmul.f32 %v515_v19, %v515_v19  ;;  %v548_v38 = vunpack.c.h.bf16 %v23_v21  ;;  %v79_v39 = vadd.f32 %v528_v26, %v526_v25 }
   0x8   :  { %v64_v16 = vadd.f32 %v63_v12, %v491_v6  ;;  %v131_v24 = vadd.f32 %v130_v18, %v100_v13  ;;  %v552_v40 = vunpack.c.h.bf16 %v18_v22  ;;  %v105_v41 = vmul.f32 %v530_v27, %v530_v27 }
   0x9   :  { %v557_v44 = vunpack.c.l.bf16 %v24_v34  ;;  %v80_v45 = vadd.f32 %v79_v39, %v535_v31  ;;  %v560_v46 = vunpack.c.l.bf16 %v19_v35  ;;  %v106_v47 = vmul.f32 %v537_v32, %v537_v32 }
   0xa   :  { %v65_v23 = vadd.f32 %v64_v16, %v499_v10  ;;  %v132_v30 = vadd.f32 %v131_v24, %v101_v17  ;;  %v114_v49 = vmul.f32 %v526_v25, %v526_v25  ;;  %v115_v50 = vmul.f32 %v528_v26, %v528_v26 }
   0xb   :  { %v575_v54 = vunpack.c.h.bf16 %v24_v34  ;;  %v81_v55 = vadd.f32 %v80_v45, %v548_v38  ;;  %v578_v56 = vunpack.c.h.bf16 %v19_v35  ;;  %v107_v57 = vmul.f32 %v552_v40, %v552_v40 }
   0xc   :  { %v66_v28 = vadd.f32 %v65_v23, %v510_v15  ;;  %v133_v37 = vadd.f32 %v132_v30, %v102_v20  ;;  %v116_v58 = vmul.f32 %v535_v31, %v535_v31  ;;  %v585_v61 = vunpack.c.l.bf16 %v25_v48 }
   0xd   :  { %v82_v62 = vadd.f32 %v81_v55, %v557_v44  ;;  %v588_v63 = vunpack.c.l.bf16 %v20_v51  ;;  %v108_v0 = vmul.f32 %v560_v46, %v560_v46  ;;  %v117_v4 = vmul.f32 %v548_v38, %v548_v38 }
   0xe   :  { %v67_v36 = vadd.f32 %v66_v28, %v515_v19  ;;  %v134_v43 = vadd.f32 %v133_v37, %v103_v29  ;;  %v147_v7 = vadd.f32 %v115_v50, %v114_v49  ;;  %v601_v12 = vunpack.c.h.bf16 %v25_v48  ;;  %v27_v29 = vld [vmem:[%s824_s0 + $0x68] sm:$0xff] }
   0xf   :  { %v83_v13 = vadd.f32 %v82_v62, %v575_v54  ;;  %v604_v14 = vunpack.c.h.bf16 %v20_v51  ;;  %v109_v16 = vmul.f32 %v578_v56, %v578_v56  ;;  %v118_v17 = vmul.f32 %v557_v44, %v557_v44  ;;  %v28_v51 = vld [vmem:[%s824_s0 + $0x70] sm:$0xff] }
  0x10   :  { %v68_v42 = vadd.f32 %v67_v36, %v530_v27  ;;  %v135_v53 = vadd.f32 %v134_v43, %v104_v33  ;;  %v148_v18 = vadd.f32 %v147_v7, %v116_v58  ;;  %v611_v22 = vunpack.c.l.bf16 %v26_v1 }
  0x11   :  { %v84_v23 = vadd.f32 %v83_v13, %v585_v61  ;;  %v614_v24 = vunpack.c.l.bf16 %v21_v8  ;;  %v110_v28 = vmul.f32 %v588_v63, %v588_v63  ;;  %v119_v30 = vmul.f32 %v575_v54, %v575_v54 }
  0x12   :  { %v69_v52 = vadd.f32 %v68_v42, %v537_v32  ;;  %v136_v60 = vadd.f32 %v135_v53, %v105_v41  ;;  %v149_v33 = vadd.f32 %v148_v18, %v117_v4  ;;  %v624_v36 = vunpack.c.h.bf16 %v26_v1 }
  0x13   :  { %v85_v37 = vadd.f32 %v84_v23, %v601_v12  ;;  %v627_v39 = vunpack.c.h.bf16 %v21_v8  ;;  %v111_v41 = vmul.f32 %v604_v14, %v604_v14  ;;  %v120_v42 = vmul.f32 %v585_v61, %v585_v61 }
  0x14   :  { %v70_v59 = vadd.f32 %v69_v52, %v552_v40  ;;  %v137_v11 = vadd.f32 %v136_v60, %v106_v47  ;;  %v150_v43 = vadd.f32 %v149_v33, %v118_v17  ;;  %v634_v48 = vunpack.c.l.bf16 %v27_v29 }
  0x15   :  { %v86_v49 = vadd.f32 %v85_v37, %v611_v22  ;;  %v112_v50 = vmul.f32 %v614_v24, %v614_v24  ;;  %v121_v52 = vmul.f32 %v601_v12, %v601_v12  ;;  %v645_v58 = vunpack.c.h.bf16 %v27_v29 }
  0x16   :  { %v71_v9 = vadd.f32 %v70_v59, %v560_v46  ;;  %v138_v21 = vadd.f32 %v137_v11, %v107_v57  ;;  %v151_v53 = vadd.f32 %v150_v43, %v119_v30  ;;  %v113_v60 = vmul.f32 %v627_v39, %v627_v39 }
  0x17   :  { %v87_v59 = vadd.f32 %v86_v49, %v624_v36  ;;  %v122_v62 = vmul.f32 %v611_v22, %v611_v22  ;;  %v653_v7 = vunpack.c.l.bf16 %v28_v51  ;;  %v123_v11 = vmul.f32 %v624_v36, %v624_v36 }
  0x18   :  { %v72_v20 = vadd.f32 %v71_v9, %v578_v56  ;;  %v139_v35 = vadd.f32 %v138_v21, %v108_v0  ;;  %v152_v0 = vadd.f32 %v151_v53, %v120_v42  ;;  %v29_v9 = vld [vmem:[%s824_s0 + $0x78] sm:$0xff]  ;;  %v661_v17 = vunpack.c.h.bf16 %v28_v51 }
  0x19   :  { %v88_v8 = vadd.f32 %v87_v59, %v634_v48  ;;  %v125_v30 = vmul.f32 %v645_v58, %v645_v58  ;;  %v126_v37 = vmul.f32 %v653_v7, %v653_v7 }
  0x1a   :  { %v73_v34 = vadd.f32 %v72_v20, %v588_v63  ;;  %v140_v47 = vadd.f32 %v139_v35, %v109_v16  ;;  %v153_v13 = vadd.f32 %v152_v0, %v121_v52  ;;  %v124_v20 = vmul.f32 %v634_v48, %v634_v48 }
  0x1b   :  { %v89_v18 = vadd.f32 %v88_v8, %v645_v58  ;;  %v127_v43 = vmul.f32 %v661_v17, %v661_v17 }
  0x1c   :  { %v74_v45 = vadd.f32 %v73_v34, %v604_v14  ;;  %v141_v57 = vadd.f32 %v140_v47, %v110_v28  ;;  %v154_v21 = vadd.f32 %v153_v13, %v122_v62  ;;  %v666_v28 = vunpack.c.l.bf16 %v29_v9 }
  0x1d   :  { %v90_v29 = vadd.f32 %v89_v18, %v653_v7  ;;  %v671_v34 = vunpack.c.h.bf16 %v29_v9 }
  0x1e   :  { %v75_v55 = vadd.f32 %v74_v45, %v614_v24  ;;  %v142_v4 = vadd.f32 %v141_v57, %v111_v41  ;;  %v155_v33 = vadd.f32 %v154_v21, %v123_v11  ;;  %v128_v49 = vmul.f32 %v666_v28, %v666_v28 }
  0x1f   :  { %v91_v35 = vadd.f32 %v90_v29, %v661_v17  ;;  %v129_v51 = vmul.f32 %v671_v34, %v671_v34  ;;  %v455_v57 = vmov 0  }
  0x20   :  { %v76_v1 = vadd.f32 %v75_v55, %v627_v39  ;;  %v143_v16 = vadd.f32 %v142_v4, %v112_v50  ;;  %v156_v41 = vadd.f32 %v155_v33, %v124_v20  ;;  %449 = vset.pattern.permute.xlu0 %v455_v57  ;;  %450 = vset.pattern.permute.xlu1 %v455_v57  ;;  %v170_v20 = vld [vmem:[%s825_s1] sm:$0xff]  ;;  %v171_v33 = vld [vmem:[%s825_s1 + $0x8] sm:$0xff] }
  0x21   :  { %v92_v42 = vadd.f32 %v91_v35, %v666_v28 }
  0x22   :  { %77 = vadd.xlane.f32.xlu0 %v76_v1  ;;  %v144_v23 = vadd.f32 %v143_v16, %v113_v60  ;;  %v157_v45 = vadd.f32 %v156_v41, %v125_v30 }
  0x23   :  { %v93_v47 = vadd.f32 %v92_v42, %v671_v34  ;;  %v178_v42 = vld [vmem:[%s826_s2] sm:$0xff] }
  0x24   :  { %145 = vadd.xlane.f32.xlu1 %v144_v23  ;;  %v158_v50 = vadd.f32 %v157_v45, %v126_v37 }
  0x26   :  { %94 = vadd.xlane.f32.xlu0 %v93_v47  ;;  %v159_v52 = vadd.f32 %v158_v50, %v127_v43  ;;  %v179_v47 = vld [vmem:[%s826_s2 + $0x8] sm:$0xff] }
  0x28   :  { %v160_v53 = vadd.f32 %v159_v52, %v128_v49 }
  0x2a   :  { %v161_v55 = vadd.f32 %v160_v53, %v129_v51 }
  0x2c   :  { %162 = vadd.xlane.f32.xlu1 %v161_v55 }
  0xaf   :  { %v78_v59 = vpop.xlane.xlu0 %77 }
  0xb0   :  { %v96_v60 = vmul.f32 0.00048828125, %v78_v59 }
  0xb1   :  { %v146_v0 = vpop.xlane.xlu1 %145 }
  0xb2   :  { %v166_v62 = vmul.f32 %v96_v60, %v96_v60  ;;  %v164_v1 = vmul.f32 0.00048828125, %v146_v0 }
  0xb3   :  { %v95_v9 = vpop.xlane.xlu0 %94 }
  0xb4   :  { %v168_v4 = vsub.f32 %v164_v1, %v166_v62  ;;  %v97_v11 = vmul.f32 0.00048828125, %v95_v9 }
  0xb6   :  { %v172_v8 = vadd.f32 1e-05, %v168_v4  ;;  %v167_v13 = vmul.f32 %v97_v11, %v97_v11 }
  0xb8   :  { %451 = vrsqrt.f32 %v172_v8 }
  0xb9   :  { %v163_v16 = vpop.xlane.xlu1 %162 }
  0xba   :  { %v165_v18 = vmul.f32 0.00048828125, %v163_v16 }
  0xbc   :  { %v169_v21 = vsub.f32 %v165_v18, %v167_v13 }
  0xbe   :  { %v173_v29 = vadd.f32 1e-05, %v169_v21 }
  0xc0   :  { %453 = vrsqrt.f32 %v173_v29 }
  0xc2   :  { %v452_v23 = vpop.eup %451 }
  0xc3   :  { %v176_v30 = vmul.f32 %v452_v23, %v170_v20 }
  0xc5   :  { %186 = vperm.xlu0 %449, %v176_v30   ;;  %v180_v41 = vmul.f32 %v176_v30, %v96_v60 }
  0xc7   :  { %v182_v43 = vsub.f32 %v178_v42, %v180_v41 }
  0xca   :  { %v454_v35 = vpop.eup %453 }
  0xcb   :  { %v177_v37 = vmul.f32 %v454_v35, %v171_v33 }
  0xcd   :  { %191 = vperm.xlu1 %450, %v177_v37   ;;  %v181_v45 = vmul.f32 %v177_v37, %v97_v11 }
  0xcf   :  { %v183_v49 = vsub.f32 %v179_v47, %v181_v45 }
  0xd1   :  { %228 = vperm.xlu1 %450, %v182_v43  }
  0xd5   :  { %233 = vperm.xlu1 %450, %v183_v49  }
 0x144   :  { %v187_v50 = vpop.permute.xlu0 %186 }
 0x145   :  { %v194_v51 = vmul.f32 %v187_v50, %v482_v2  ;;  %v195_v52 = vmul.f32 %v187_v50, %v484_v3  ;;  %v196_v53 = vmul.f32 %v187_v50, %v489_v5  ;;  %v197_v55 = vmul.f32 %v187_v50, %v491_v6 }
 0x146   :  { %v198_v57 = vmul.f32 %v187_v50, %v499_v10  ;;  %v199_v59 = vmul.f32 %v187_v50, %v510_v15  ;;  %v200_v60 = vmul.f32 %v187_v50, %v515_v19  ;;  %v201_v62 = vmul.f32 %v187_v50, %v530_v27 }
 0x147   :  { %v202_v0 = vmul.f32 %v187_v50, %v537_v32  ;;  %v203_v1 = vmul.f32 %v187_v50, %v552_v40  ;;  %v204_v2 = vmul.f32 %v187_v50, %v560_v46  ;;  %v205_v3 = vmul.f32 %v187_v50, %v578_v56 }
 0x148   :  { %v206_v5 = vmul.f32 %v187_v50, %v588_v63  ;;  %v207_v6 = vmul.f32 %v187_v50, %v604_v14  ;;  %v208_v10 = vmul.f32 %v187_v50, %v614_v24  ;;  %v209_v15 = vmul.f32 %v187_v50, %v627_v39 }
 0x14c   :  { %v192_v4 = vpop.permute.xlu1 %191 }
 0x14d   :  { %v713_v19 = vmul.f32 %v192_v4, %v526_v25  ;;  %v716_v27 = vmul.f32 %v192_v4, %v528_v26  ;;  %v719_v32 = vmul.f32 %v192_v4, %v535_v31  ;;  %v722_v40 = vmul.f32 %v192_v4, %v548_v38 }
 0x14e   :  { %v725_v46 = vmul.f32 %v192_v4, %v557_v44  ;;  %v728_v56 = vmul.f32 %v192_v4, %v575_v54  ;;  %v731_v63 = vmul.f32 %v192_v4, %v585_v61  ;;  %v734_v25 = vmul.f32 %v192_v4, %v601_v12 }
 0x14f   :  { %v737_v26 = vmul.f32 %v192_v4, %v611_v22  ;;  %v740_v31 = vmul.f32 %v192_v4, %v624_v36  ;;  %v743_v38 = vmul.f32 %v192_v4, %v634_v48  ;;  %v746_v44 = vmul.f32 %v192_v4, %v645_v58 }
 0x150   :  { %v229_v54 = vpop.permute.xlu1 %228  ;;  %v749_v14 = vmul.f32 %v192_v4, %v653_v7  ;;  %v752_v61 = vmul.f32 %v192_v4, %v661_v17  ;;  %v755_v12 = vmul.f32 %v192_v4, %v666_v28  ;;  %v758_v22 = vmul.f32 %v192_v4, %v671_v34 }
 0x151   :  { %v236_v24 = vadd.f32 %v229_v54, %v194_v51  ;;  %v237_v36 = vadd.f32 %v229_v54, %v195_v52  ;;  %v238_v39 = vadd.f32 %v229_v54, %v196_v53  ;;  %v239_v48 = vadd.f32 %v229_v54, %v197_v55 }
 0x152   :  { %v240_v8 = vadd.f32 %v229_v54, %v198_v57  ;;  %v241_v58 = vadd.f32 %v229_v54, %v199_v59  ;;  %v242_v9 = vadd.f32 %v229_v54, %v200_v60  ;;  %v243_v11 = vadd.f32 %v229_v54, %v201_v62 }
 0x153   :  { %v244_v13 = vadd.f32 %v229_v54, %v202_v0  ;;  %v245_v7 = vadd.f32 %v229_v54, %v203_v1  ;;  %v246_v16 = vadd.f32 %v229_v54, %v204_v2  ;;  %v247_v18 = vadd.f32 %v229_v54, %v205_v3 }
 0x154   :  { %v248_v17 = vadd.f32 %v229_v54, %v206_v5  ;;  %v249_v20 = vadd.f32 %v229_v54, %v207_v6  ;;  %v250_v21 = vadd.f32 %v229_v54, %v208_v10  ;;  %v251_v28 = vadd.f32 %v229_v54, %v209_v15  ;;  %v234_v53 = vpop.permute.xlu1 %233 }
 0x155   :  { %v268_v23 = vmax.f32 %v236_v24, 0.0  ;;  %v269_v29 = vmax.f32 %v237_v36, 0.0  ;;  %v270_v34 = vmax.f32 %v238_v39, 0.0  ;;  %v271_v30 = vmax.f32 %v239_v48, 0.0 }
 0x156   :  { %v272_v33 = vmax.f32 %v240_v8, 0.0  ;;  %v273_v35 = vmax.f32 %v241_v58, 0.0  ;;  %v274_v37 = vmax.f32 %v242_v9, 0.0  ;;  %v275_v41 = vmax.f32 %v243_v11, 0.0 }
 0x157   :  { %v276_v42 = vmax.f32 %v244_v13, 0.0  ;;  %v277_v43 = vmax.f32 %v245_v7, 0.0  ;;  %v278_v45 = vmax.f32 %v246_v16, 0.0  ;;  %v279_v47 = vmax.f32 %v247_v18, 0.0 }
 0x158   :  { %v280_v49 = vmax.f32 %v248_v17, 0.0  ;;  %v281_v50 = vmax.f32 %v249_v20, 0.0  ;;  %v282_v51 = vmax.f32 %v250_v21, 0.0  ;;  %v283_v52 = vmax.f32 %v251_v28, 0.0 }
 0x159   :  { %v432_v55 = vpack.c.bf16 %v269_v29, %v268_v23  ;;  %v433_v57 = vpack.c.bf16 %v271_v30, %v270_v34  ;;  %v434_v59 = vpack.c.bf16 %v273_v35, %v272_v33  ;;  %v435_v60 = vpack.c.bf16 %v275_v41, %v274_v37 }
 0x15a   :  { %v436_v62 = vpack.c.bf16 %v277_v43, %v276_v42  ;;  %v437_v0 = vpack.c.bf16 %v279_v47, %v278_v45  ;;  %v438_v1 = vpack.c.bf16 %v281_v50, %v280_v49  ;;  %v439_v2 = vpack.c.bf16 %v283_v52, %v282_v51 }
 0x15b   :  { %396 = vst [vmem:[%s827_s3] sm:$0xff] %v432_v55  ;;  %397 = vst [vmem:[%s827_s3 + $0x8] sm:$0xff] %v433_v57  ;;  %v252_v3 = vadd.f32 %v234_v53, %v713_v19  ;;  %v253_v5 = vadd.f32 %v234_v53, %v716_v27  ;;  %v254_v6 = vadd.f32 %v234_v53, %v719_v32 }
 0x15c   :  { %398 = vst [vmem:[%s827_s3 + $0x10] sm:$0xff] %v434_v59  ;;  %399 = vst [vmem:[%s827_s3 + $0x18] sm:$0xff] %v435_v60  ;;  %v255_v10 = vadd.f32 %v234_v53, %v722_v40  ;;  %v256_v15 = vadd.f32 %v234_v53, %v725_v46  ;;  %v257_v4 = vadd.f32 %v234_v53, %v728_v56 }
 0x15d   :  { %400 = vst [vmem:[%s827_s3 + $0x20] sm:$0xff] %v436_v62  ;;  %401 = vst [vmem:[%s827_s3 + $0x28] sm:$0xff] %v437_v0  ;;  %v258_v19 = vadd.f32 %v234_v53, %v731_v63  ;;  %v259_v27 = vadd.f32 %v234_v53, %v734_v25  ;;  %v260_v32 = vadd.f32 %v234_v53, %v737_v26  ;;  %v284_v48 = vmax.f32 %v252_v3, 0.0 }
 0x15e   :  { %402 = vst [vmem:[%s827_s3 + $0x30] sm:$0xff] %v438_v1  ;;  %403 = vst [vmem:[%s827_s3 + $0x38] sm:$0xff] %v439_v2  ;;  %v261_v40 = vadd.f32 %v234_v53, %v740_v31  ;;  %v262_v54 = vadd.f32 %v234_v53, %v743_v38  ;;  %v263_v24 = vadd.f32 %v234_v53, %v746_v44  ;;  %v285_v63 = vmax.f32 %v253_v5, 0.0 }
 0x15f   :  { %v264_v36 = vadd.f32 %v234_v53, %v749_v14  ;;  %v265_v39 = vadd.f32 %v234_v53, %v752_v61  ;;  %v266_v46 = vadd.f32 %v234_v53, %v755_v12  ;;  %v267_v56 = vadd.f32 %v234_v53, %v758_v22 }
 0x160   :  { %v286_v8 = vmax.f32 %v254_v6, 0.0  ;;  %v287_v25 = vmax.f32 %v255_v10, 0.0  ;;  %v288_v58 = vmax.f32 %v256_v15, 0.0  ;;  %v289_v26 = vmax.f32 %v257_v4, 0.0 }
 0x161   :  { %v290_v9 = vmax.f32 %v258_v19, 0.0  ;;  %v291_v31 = vmax.f32 %v259_v27, 0.0  ;;  %v292_v11 = vmax.f32 %v260_v32, 0.0  ;;  %v293_v38 = vmax.f32 %v261_v40, 0.0 }
 0x162   :  { %v294_v13 = vmax.f32 %v262_v54, 0.0  ;;  %v295_v44 = vmax.f32 %v263_v24, 0.0  ;;  %v296_v7 = vmax.f32 %v264_v36, 0.0  ;;  %v297_v14 = vmax.f32 %v265_v39, 0.0 }
 0x163   :  { %v298_v16 = vmax.f32 %v266_v46, 0.0  ;;  %v299_v61 = vmax.f32 %v267_v56, 0.0  ;;  %v440_v18 = vpack.c.bf16 %v285_v63, %v284_v48  ;;  %v441_v12 = vpack.c.bf16 %v287_v25, %v286_v8 }
 0x164   :  { %v442_v17 = vpack.c.bf16 %v289_v26, %v288_v58  ;;  %v443_v22 = vpack.c.bf16 %v291_v31, %v290_v9  ;;  %v444_v20 = vpack.c.bf16 %v293_v38, %v292_v11  ;;  %v445_v21 = vpack.c.bf16 %v295_v44, %v294_v13 }
 0x165   :  { %v446_v28 = vpack.c.bf16 %v297_v14, %v296_v7  ;;  %v447_v23 = vpack.c.bf16 %v299_v61, %v298_v16  ;;  %404 = vst [vmem:[%s827_s3 + $0x40] sm:$0xff] %v440_v18  ;;  %405 = vst [vmem:[%s827_s3 + $0x48] sm:$0xff] %v441_v12 }
 0x166   :  { %406 = vst [vmem:[%s827_s3 + $0x50] sm:$0xff] %v442_v17  ;;  %407 = vst [vmem:[%s827_s3 + $0x58] sm:$0xff] %v443_v22 }
 0x167   :  { %408 = vst [vmem:[%s827_s3 + $0x60] sm:$0xff] %v444_v20  ;;  %409 = vst [vmem:[%s827_s3 + $0x68] sm:$0xff] %v445_v21 }
 0x168   :  { %410 = vst [vmem:[%s827_s3 + $0x70] sm:$0xff] %v446_v28  ;;  %411 = vst [vmem:[%s827_s3 + $0x78] sm:$0xff] %v447_v23 }

// kernel: forward.17
= control target key start
LH: loop header
LB: loop body
LE: loop exit
PB: predicated region body
PF: predicated region fallthrough
CT: control target
= control target key end

     0   :  { %v1411_v3 = vmov 0   ;;  %s1976_s1 = inlined_call_operand.vmem [shape: bf16[128,2048], index: 1, kind: input, shape index: {}]   ;;  %s1977_s0 = inlined_call_operand.vmem [shape: bf16[16,128], index: 0, kind: input, shape index: {}]   ;;  %s1978_s2 = inlined_call_operand.vmem [shape: f32[16,1], index: 2, kind: input, shape index: {}]   ;;  %s1979_s3 = inlined_call_operand.vmem [shape: f32[16,2048], index: 3, kind: output, shape index: {}]  }
   0x1   :  { %v17_v0 = vld [vmem:[%s1976_s1] sm:$0xff]  ;;  %v18_v2 = vld [vmem:[%s1976_s1 + $0x8] sm:$0xff]  ;;  %835 = vmatprep.mubr.bf16.mxu0 %v1411_v3  ;;  %878 = vmatprep.mubr.bf16.mxu1 %v1411_v3  ;;  %v19_v63 = vld [vmem:[%s1976_s1 + $0x10] sm:$0xff] }
   0x2   :  { %v25_v1 = vld [vmem:[%s1976_s1 + $0x40] sm:$0xff]  ;;  %v26_v5 = vld [vmem:[%s1976_s1 + $0x48] sm:$0xff]  ;;  %1345 = vset.pattern.permute.xlu0 %v1411_v3 }
   0x3   :  { %v1217_v4 = vcombine.high %v17_v0, %v25_v1  ;;  %v1216_v6 = vcombine.low %v17_v0, %v25_v1  ;;  %v33_v7 = vld [vmem:[%s1976_s1 + $0x80] sm:$0xff]  ;;  %v1219_v9 = vcombine.high %v18_v2, %v26_v5  ;;  %v1218_v10 = vcombine.low %v18_v2, %v26_v5  ;;  %v34_v12 = vld [vmem:[%s1976_s1 + $0x88] sm:$0xff]  ;;  %v27_v0 = vld [vmem:[%s1976_s1 + $0x50] sm:$0xff] }
   0x4   :  { %v41_v8 = vld [vmem:[%s1976_s1 + $0xc0] sm:$0xff]  ;;  %v42_v13 = vld [vmem:[%s1976_s1 + $0xc8] sm:$0xff]  ;;  %v20_v1 = vld [vmem:[%s1976_s1 + $0x18] sm:$0xff] }
   0x5   :  { %v1233_v11 = vcombine.high %v33_v7, %v41_v8  ;;  %v49_v14 = vld [vmem:[%s1976_s1 + $0x100] sm:$0xff]  ;;  %803 = vmatprep.subr.bf16.mxu0 %v1217_v4  ;;  %v1235_v15 = vcombine.high %v34_v12, %v42_v13  ;;  %v50_v17 = vld [vmem:[%s1976_s1 + $0x108] sm:$0xff]  ;;  %846 = vmatprep.subr.bf16.mxu1 %v1219_v9  ;;  %v1232_v19 = vcombine.low %v33_v7, %v41_v8  ;;  %v28_v2 = vld [vmem:[%s1976_s1 + $0x58] sm:$0xff] }
   0x6   :  { %v57_v16 = vld [vmem:[%s1976_s1 + $0x140] sm:$0xff]  ;;  %v58_v18 = vld [vmem:[%s1976_s1 + $0x148] sm:$0xff]  ;;  %804 = vmatpush1.bf16.msra.mxu0 %v1216_v6  ;;  %847 = vmatpush1.bf16.msra.mxu1 %v1218_v10  ;;  %v1234_v20 = vcombine.low %v34_v12, %v42_v13  ;;  %v1221_v6 = vcombine.high %v19_v63, %v27_v0  ;;  %v1223_v7 = vcombine.high %v20_v1, %v28_v2  ;;  %v35_v8 = vld [vmem:[%s1976_s1 + $0x90] sm:$0xff] }
   0x7   :  { %805 = vmatprep.subr.bf16.mxu0 %v1233_v11  ;;  %v1249_v21 = vcombine.high %v49_v14, %v57_v16  ;;  %848 = vmatprep.subr.bf16.mxu1 %v1235_v15  ;;  %v1251_v22 = vcombine.high %v50_v17, %v58_v18  ;;  %v65_v23 = vld [vmem:[%s1976_s1 + $0x180] sm:$0xff]  ;;  %v66_v25 = vld [vmem:[%s1976_s1 + $0x188] sm:$0xff]  ;;  %v1248_v27 = vcombine.low %v49_v14, %v57_v16  ;;  %v43_v9 = vld [vmem:[%s1976_s1 + $0xd0] sm:$0xff] }
   0x8   :  { %v73_v24 = vld [vmem:[%s1976_s1 + $0x1c0] sm:$0xff]  ;;  %v74_v26 = vld [vmem:[%s1976_s1 + $0x1c8] sm:$0xff]  ;;  %v1250_v28 = vcombine.low %v50_v17, %v58_v18  ;;  %v36_v11 = vld [vmem:[%s1976_s1 + $0x98] sm:$0xff]  ;;  %v1220_v13 = vcombine.low %v19_v63, %v27_v0  ;;  %v1222_v14 = vcombine.low %v20_v1, %v28_v2  ;;  %v1237_v15 = vcombine.high %v35_v8, %v43_v9 }
   0x9   :  { %v1265_v29 = vcombine.high %v65_v23, %v73_v24  ;;  %v1267_v30 = vcombine.high %v66_v25, %v74_v26  ;;  %v81_v31 = vld [vmem:[%s1976_s1 + $0x200] sm:$0xff]  ;;  %v82_v33 = vld [vmem:[%s1976_s1 + $0x208] sm:$0xff]  ;;  %v1264_v35 = vcombine.low %v65_v23, %v73_v24  ;;  %v1266_v36 = vcombine.low %v66_v25, %v74_v26  ;;  %v44_v12 = vld [vmem:[%s1976_s1 + $0xd8] sm:$0xff] }
   0xa   :  { %806 = vmatpush1.bf16.msra.mxu0 %v1232_v19  ;;  %849 = vmatpush1.bf16.msra.mxu1 %v1234_v20  ;;  %v89_v32 = vld [vmem:[%s1976_s1 + $0x240] sm:$0xff]  ;;  %v90_v34 = vld [vmem:[%s1976_s1 + $0x248] sm:$0xff]  ;;  %v1239_v16 = vcombine.high %v36_v11, %v44_v12  ;;  %v51_v17 = vld [vmem:[%s1976_s1 + $0x110] sm:$0xff] }
   0xb   :  { %807 = vmatprep.subr.bf16.mxu0 %v1249_v21  ;;  %850 = vmatprep.subr.bf16.mxu1 %v1251_v22  ;;  %v1281_v37 = vcombine.high %v81_v31, %v89_v32  ;;  %v1283_v38 = vcombine.high %v82_v33, %v90_v34  ;;  %v97_v39 = vld [vmem:[%s1976_s1 + $0x280] sm:$0xff]  ;;  %v98_v41 = vld [vmem:[%s1976_s1 + $0x288] sm:$0xff]  ;;  %v1280_v43 = vcombine.low %v81_v31, %v89_v32  ;;  %v59_v18 = vld [vmem:[%s1976_s1 + $0x150] sm:$0xff] }
   0xc   :  { %v105_v40 = vld [vmem:[%s1976_s1 + $0x2c0] sm:$0xff]  ;;  %v106_v42 = vld [vmem:[%s1976_s1 + $0x2c8] sm:$0xff]  ;;  %v1282_v44 = vcombine.low %v82_v33, %v90_v34  ;;  %v52_v19 = vld [vmem:[%s1976_s1 + $0x118] sm:$0xff]  ;;  %v1236_v21 = vcombine.low %v35_v8, %v43_v9  ;;  %v1238_v22 = vcombine.low %v36_v11, %v44_v12  ;;  %v1253_v23 = vcombine.high %v51_v17, %v59_v18 }
   0xd   :  { %v1297_v45 = vcombine.high %v97_v39, %v105_v40  ;;  %v1299_v46 = vcombine.high %v98_v41, %v106_v42  ;;  %v113_v47 = vld [vmem:[%s1976_s1 + $0x300] sm:$0xff]  ;;  %v114_v49 = vld [vmem:[%s1976_s1 + $0x308] sm:$0xff]  ;;  %v1296_v51 = vcombine.low %v97_v39, %v105_v40  ;;  %v1298_v52 = vcombine.low %v98_v41, %v106_v42  ;;  %v60_v20 = vld [vmem:[%s1976_s1 + $0x158] sm:$0xff] }
   0xe   :  { %808 = vmatpush1.bf16.msra.mxu0 %v1248_v27  ;;  %851 = vmatpush1.bf16.msra.mxu1 %v1250_v28  ;;  %v121_v48 = vld [vmem:[%s1976_s1 + $0x340] sm:$0xff]  ;;  %v122_v50 = vld [vmem:[%s1976_s1 + $0x348] sm:$0xff]  ;;  %v1255_v24 = vcombine.high %v52_v19, %v60_v20  ;;  %v67_v25 = vld [vmem:[%s1976_s1 + $0x190] sm:$0xff]  ;;  %v1254_v31 = vcombine.low %v52_v19, %v60_v20 }
   0xf   :  { %809 = vmatprep.subr.bf16.mxu0 %v1265_v29  ;;  %852 = vmatprep.subr.bf16.mxu1 %v1267_v30  ;;  %v1313_v53 = vcombine.high %v113_v47, %v121_v48  ;;  %v1315_v54 = vcombine.high %v114_v49, %v122_v50  ;;  %v129_v55 = vld [vmem:[%s1976_s1 + $0x380] sm:$0xff]  ;;  %v130_v57 = vld [vmem:[%s1976_s1 + $0x388] sm:$0xff]  ;;  %v1312_v59 = vcombine.low %v113_v47, %v121_v48  ;;  %v75_v26 = vld [vmem:[%s1976_s1 + $0x1d0] sm:$0xff] }
  0x10   :  { %v137_v56 = vld [vmem:[%s1976_s1 + $0x3c0] sm:$0xff]  ;;  %v138_v58 = vld [vmem:[%s1976_s1 + $0x3c8] sm:$0xff]  ;;  %v1314_v60 = vcombine.low %v114_v49, %v122_v50  ;;  %v68_v27 = vld [vmem:[%s1976_s1 + $0x198] sm:$0xff]  ;;  %v1252_v30 = vcombine.low %v51_v17, %v59_v18  ;;  %v1269_v32 = vcombine.high %v67_v25, %v75_v26  ;;  %v1268_v39 = vcombine.low %v67_v25, %v75_v26 }
  0x11   :  { %v1329_v61 = vcombine.high %v129_v55, %v137_v56  ;;  %v1331_v62 = vcombine.high %v130_v57, %v138_v58  ;;  %v1328_v4 = vcombine.low %v129_v55, %v137_v56  ;;  %v1330_v5 = vcombine.low %v130_v57, %v138_v58  ;;  %v1552_v10 = vld [vmem:[%s1977_s0] sm:$0xff]   ;;  %v76_v28 = vld [vmem:[%s1976_s1 + $0x1d8] sm:$0xff]  ;;  %v146_v33 = vld [vmem:[%s1978_s2 + $0x8] sm:$0xff] }
  0x12   :  { %810 = vmatpush1.bf16.msra.mxu0 %v1264_v35  ;;  %853 = vmatpush1.bf16.msra.mxu1 %v1266_v36  ;;  %v145_v29 = vld [vmem:[%s1978_s2] sm:$0xff]  ;;  %v1271_v34 = vcombine.high %v68_v27, %v76_v28  ;;  %v83_v35 = vld [vmem:[%s1976_s1 + $0x210] sm:$0xff]  ;;  %v1270_v40 = vcombine.low %v68_v27, %v76_v28 }
  0x13   :  { %811 = vmatprep.subr.bf16.mxu0 %v1281_v37  ;;  %854 = vmatprep.subr.bf16.mxu1 %v1283_v38  ;;  %v91_v36 = vld [vmem:[%s1976_s1 + $0x250] sm:$0xff]  ;;  %v84_v37 = vld [vmem:[%s1976_s1 + $0x218] sm:$0xff] }
  0x14   :  { %149 = vperm.xlu0 %1345, %v145_v29   ;;  %v92_v38 = vld [vmem:[%s1976_s1 + $0x258] sm:$0xff]  ;;  %v1285_v41 = vcombine.high %v83_v35, %v91_v36  ;;  %v1284_v47 = vcombine.low %v83_v35, %v91_v36  ;;  %v69_v29 = vld [vmem:[%s1976_s1 + $0x1a0] sm:$0xff] }
  0x15   :  { %v1287_v42 = vcombine.high %v84_v37, %v92_v38  ;;  %v1286_v48 = vcombine.low %v84_v37, %v92_v38  ;;  %v85_v37 = vld [vmem:[%s1976_s1 + $0x220] sm:$0xff] }
  0x16   :  { %812 = vmatpush1.bf16.msra.mxu0 %v1280_v43  ;;  %855 = vmatpush1.bf16.msra.mxu1 %v1282_v44  ;;  %v99_v43 = vld [vmem:[%s1976_s1 + $0x290] sm:$0xff]  ;;  %v93_v38 = vld [vmem:[%s1976_s1 + $0x260] sm:$0xff] }
  0x17   :  { %813 = vmatprep.subr.bf16.mxu0 %v1297_v45  ;;  %856 = vmatprep.subr.bf16.mxu1 %v1299_v46  ;;  %v107_v44 = vld [vmem:[%s1976_s1 + $0x2d0] sm:$0xff]  ;;  %v100_v45 = vld [vmem:[%s1976_s1 + $0x298] sm:$0xff] }
  0x18   :  { %154 = vperm.xlu0 %1345, %v146_v33   ;;  %v108_v46 = vld [vmem:[%s1976_s1 + $0x2d8] sm:$0xff]  ;;  %v1301_v49 = vcombine.high %v99_v43, %v107_v44  ;;  %v1300_v55 = vcombine.low %v99_v43, %v107_v44  ;;  %v1289_v43 = vcombine.high %v85_v37, %v93_v38 }
  0x19   :  { %v1303_v50 = vcombine.high %v100_v45, %v108_v46  ;;  %v1302_v56 = vcombine.low %v100_v45, %v108_v46  ;;  %v101_v45 = vld [vmem:[%s1976_s1 + $0x2a0] sm:$0xff] }
  0x1a   :  { %814 = vmatpush1.bf16.msra.mxu0 %v1296_v51  ;;  %857 = vmatpush1.bf16.msra.mxu1 %v1298_v52  ;;  %v115_v51 = vld [vmem:[%s1976_s1 + $0x310] sm:$0xff]  ;;  %v109_v46 = vld [vmem:[%s1976_s1 + $0x2e0] sm:$0xff] }
  0x1b   :  { %815 = vmatprep.subr.bf16.mxu0 %v1313_v53  ;;  %858 = vmatprep.subr.bf16.mxu1 %v1315_v54  ;;  %v123_v52 = vld [vmem:[%s1976_s1 + $0x350] sm:$0xff]  ;;  %v116_v53 = vld [vmem:[%s1976_s1 + $0x318] sm:$0xff] }
  0x1c   :  { %v124_v54 = vld [vmem:[%s1976_s1 + $0x358] sm:$0xff]  ;;  %v1317_v57 = vcombine.high %v115_v51, %v123_v52  ;;  %v1316_v63 = vcombine.low %v115_v51, %v123_v52  ;;  %v1305_v51 = vcombine.high %v101_v45, %v109_v46 }
  0x1d   :  { %v1319_v58 = vcombine.high %v116_v53, %v124_v54  ;;  %v1318_v0 = vcombine.low %v116_v53, %v124_v54  ;;  %v117_v53 = vld [vmem:[%s1976_s1 + $0x320] sm:$0xff] }
  0x1e   :  { %816 = vmatpush1.bf16.msra.mxu0 %v1312_v59  ;;  %859 = vmatpush1.bf16.msra.mxu1 %v1314_v60  ;;  %v131_v59 = vld [vmem:[%s1976_s1 + $0x390] sm:$0xff]  ;;  %v125_v54 = vld [vmem:[%s1976_s1 + $0x360] sm:$0xff] }
  0x1f   :  { %817 = vmatprep.subr.bf16.mxu0 %v1329_v61  ;;  %860 = vmatprep.subr.bf16.mxu1 %v1331_v62  ;;  %v139_v60 = vld [vmem:[%s1976_s1 + $0x3d0] sm:$0xff]  ;;  %v132_v61 = vld [vmem:[%s1976_s1 + $0x398] sm:$0xff] }
  0x20   :  { %v140_v62 = vld [vmem:[%s1976_s1 + $0x3d8] sm:$0xff]  ;;  %v1333_v1 = vcombine.high %v131_v59, %v139_v60  ;;  %v1332_v8 = vcombine.low %v131_v59, %v139_v60  ;;  %v1321_v59 = vcombine.high %v117_v53, %v125_v54 }
  0x21   :  { %v1335_v2 = vcombine.high %v132_v61, %v140_v62  ;;  %v1334_v9 = vcombine.low %v132_v61, %v140_v62  ;;  %v133_v61 = vld [vmem:[%s1976_s1 + $0x3a0] sm:$0xff] }
  0x22   :  { %818 = vmatpush1.bf16.msra.mxu0 %v1328_v4  ;;  %861 = vmatpush1.bf16.msra.mxu1 %v1330_v5  ;;  %v21_v4 = vld [vmem:[%s1976_s1 + $0x20] sm:$0xff] }
  0x23   :  { %889 = vmatprep.subr.bf16.mxu0 %v1221_v6  ;;  %932 = vmatprep.subr.bf16.mxu1 %v1223_v7  ;;  %v29_v5 = vld [vmem:[%s1976_s1 + $0x60] sm:$0xff]  ;;  %v22_v6 = vld [vmem:[%s1976_s1 + $0x28] sm:$0xff] }
  0x24   :  { %v30_v7 = vld [vmem:[%s1976_s1 + $0x68] sm:$0xff]  ;;  %v1225_v11 = vcombine.high %v21_v4, %v29_v5  ;;  %v1224_v17 = vcombine.low %v21_v4, %v29_v5  ;;  %v141_v62 = vld [vmem:[%s1976_s1 + $0x3e0] sm:$0xff] }
  0x25   :  { %836 = vmatmul.mubr.bf16.vlgmr.msra.gmra.mrb[0].mxu0 %v1552_v10  ;;  %879 = vmatmul.mubr.bf16.vlgmr.msra.gmra.mrb[0].mxu1 %v1552_v10  ;;  %v1227_v12 = vcombine.high %v22_v6, %v30_v7  ;;  %v1226_v18 = vcombine.low %v22_v6, %v30_v7  ;;  %v1337_v4 = vcombine.high %v133_v61, %v141_v62  ;;  %v23_v6 = vld [vmem:[%s1976_s1 + $0x30] sm:$0xff] }
  0x26   :  { %890 = vmatpush1.bf16.msra.mxu0 %v1220_v13  ;;  %933 = vmatpush1.bf16.msra.mxu1 %v1222_v14  ;;  %v37_v13 = vld [vmem:[%s1976_s1 + $0xa0] sm:$0xff]  ;;  %v31_v7 = vld [vmem:[%s1976_s1 + $0x70] sm:$0xff] }
  0x27   :  { %891 = vmatprep.subr.bf16.mxu0 %v1237_v15  ;;  %934 = vmatprep.subr.bf16.mxu1 %v1239_v16  ;;  %v45_v14 = vld [vmem:[%s1976_s1 + $0xe0] sm:$0xff]  ;;  %v38_v15 = vld [vmem:[%s1976_s1 + $0xa8] sm:$0xff] }
  0x28   :  { %921 = vmatprep.mubr.bf16.mxu0 %v1411_v3  ;;  %964 = vmatprep.mubr.bf16.mxu1 %v1411_v3  ;;  %v46_v16 = vld [vmem:[%s1976_s1 + $0xe8] sm:$0xff]  ;;  %v1241_v19 = vcombine.high %v37_v13, %v45_v14  ;;  %v1240_v25 = vcombine.low %v37_v13, %v45_v14  ;;  %v1229_v13 = vcombine.high %v23_v6, %v31_v7 }
  0x29   :  { %v1243_v20 = vcombine.high %v38_v15, %v46_v16  ;;  %v1242_v26 = vcombine.low %v38_v15, %v46_v16  ;;  %v39_v15 = vld [vmem:[%s1976_s1 + $0xb0] sm:$0xff] }
  0x2a   :  { %892 = vmatpush1.bf16.msra.mxu0 %v1236_v21  ;;  %935 = vmatpush1.bf16.msra.mxu1 %v1238_v22  ;;  %v53_v21 = vld [vmem:[%s1976_s1 + $0x120] sm:$0xff]  ;;  %v47_v16 = vld [vmem:[%s1976_s1 + $0xf0] sm:$0xff] }
  0x2b   :  { %893 = vmatprep.subr.bf16.mxu0 %v1253_v23  ;;  %936 = vmatprep.subr.bf16.mxu1 %v1255_v24  ;;  %v61_v22 = vld [vmem:[%s1976_s1 + $0x160] sm:$0xff]  ;;  %v54_v23 = vld [vmem:[%s1976_s1 + $0x128] sm:$0xff] }
  0x2c   :  { %v62_v24 = vld [vmem:[%s1976_s1 + $0x168] sm:$0xff]  ;;  %v1257_v27 = vcombine.high %v53_v21, %v61_v22  ;;  %v1256_v33 = vcombine.low %v53_v21, %v61_v22  ;;  %v1245_v21 = vcombine.high %v39_v15, %v47_v16 }
  0x2d   :  { %v1259_v28 = vcombine.high %v54_v23, %v62_v24 }
  0x2e   :  { %894 = vmatpush1.bf16.msra.mxu0 %v1252_v30  ;;  %937 = vmatpush1.bf16.msra.mxu1 %v1254_v31  ;;  %v77_v30 = vld [vmem:[%s1976_s1 + $0x1e0] sm:$0xff]  ;;  %v70_v31 = vld [vmem:[%s1976_s1 + $0x1a8] sm:$0xff] }
  0x2f   :  { %895 = vmatprep.subr.bf16.mxu0 %v1269_v32  ;;  %938 = vmatprep.subr.bf16.mxu1 %v1271_v34  ;;  %v78_v32 = vld [vmem:[%s1976_s1 + $0x1e8] sm:$0xff]  ;;  %v1258_v34 = vcombine.low %v54_v23, %v62_v24  ;;  %v1273_v35 = vcombine.high %v69_v29, %v77_v30  ;;  %v55_v23 = vld [vmem:[%s1976_s1 + $0x130] sm:$0xff] }
  0x30   :  { %v1275_v36 = vcombine.high %v70_v31, %v78_v32  ;;  %v63_v24 = vld [vmem:[%s1976_s1 + $0x170] sm:$0xff] }
  0x32   :  { %896 = vmatpush1.bf16.msra.mxu0 %v1268_v39  ;;  %939 = vmatpush1.bf16.msra.mxu1 %v1270_v40  ;;  %v86_v39 = vld [vmem:[%s1976_s1 + $0x228] sm:$0xff] }
  0x33   :  { %897 = vmatprep.subr.bf16.mxu0 %v1285_v41  ;;  %940 = vmatprep.subr.bf16.mxu1 %v1287_v42  ;;  %v94_v40 = vld [vmem:[%s1976_s1 + $0x268] sm:$0xff]  ;;  %v1272_v41 = vcombine.low %v69_v29, %v77_v30  ;;  %v1274_v42 = vcombine.low %v70_v31, %v78_v32  ;;  %v1261_v29 = vcombine.high %v55_v23, %v63_v24  ;;  %v71_v31 = vld [vmem:[%s1976_s1 + $0x1b0] sm:$0xff] }
  0x34   :  { %v1291_v44 = vcombine.high %v86_v39, %v94_v40  ;;  %v79_v32 = vld [vmem:[%s1976_s1 + $0x1f0] sm:$0xff] }
  0x36   :  { %898 = vmatpush1.bf16.msra.mxu0 %v1284_v47  ;;  %941 = vmatpush1.bf16.msra.mxu1 %v1286_v48  ;;  %v102_v47 = vld [vmem:[%s1976_s1 + $0x2a8] sm:$0xff] }
  0x37   :  { %899 = vmatprep.subr.bf16.mxu0 %v1301_v49  ;;  %942 = vmatprep.subr.bf16.mxu1 %v1303_v50  ;;  %v110_v48 = vld [vmem:[%s1976_s1 + $0x2e8] sm:$0xff]  ;;  %v1288_v49 = vcombine.low %v85_v37, %v93_v38  ;;  %v1290_v50 = vcombine.low %v86_v39, %v94_v40  ;;  %v1277_v37 = vcombine.high %v71_v31, %v79_v32  ;;  %v87_v39 = vld [vmem:[%s1976_s1 + $0x230] sm:$0xff] }
  0x38   :  { %v1307_v52 = vcombine.high %v102_v47, %v110_v48  ;;  %v95_v40 = vld [vmem:[%s1976_s1 + $0x270] sm:$0xff] }
  0x3a   :  { %900 = vmatpush1.bf16.msra.mxu0 %v1300_v55  ;;  %943 = vmatpush1.bf16.msra.mxu1 %v1302_v56  ;;  %v118_v55 = vld [vmem:[%s1976_s1 + $0x328] sm:$0xff] }
  0x3b   :  { %901 = vmatprep.subr.bf16.mxu0 %v1317_v57  ;;  %944 = vmatprep.subr.bf16.mxu1 %v1319_v58  ;;  %v126_v56 = vld [vmem:[%s1976_s1 + $0x368] sm:$0xff]  ;;  %v1304_v57 = vcombine.low %v101_v45, %v109_v46  ;;  %v1306_v58 = vcombine.low %v102_v47, %v110_v48  ;;  %v103_v46 = vld [vmem:[%s1976_s1 + $0x2b0] sm:$0xff]  ;;  %v104_v48 = vld [vmem:[%s1976_s1 + $0x2b8] sm:$0xff] }
  0x3c   :  { %v1323_v60 = vcombine.high %v118_v55, %v126_v56  ;;  %v111_v47 = vld [vmem:[%s1976_s1 + $0x2f0] sm:$0xff] }
  0x3e   :  { %902 = vmatpush1.bf16.msra.mxu0 %v1316_v63  ;;  %945 = vmatpush1.bf16.msra.mxu1 %v1318_v0  ;;  %v134_v63 = vld [vmem:[%s1976_s1 + $0x3a8] sm:$0xff] }
  0x3f   :  { %903 = vmatprep.subr.bf16.mxu0 %v1333_v1  ;;  %946 = vmatprep.subr.bf16.mxu1 %v1335_v2  ;;  %v142_v0 = vld [vmem:[%s1976_s1 + $0x3e8] sm:$0xff]  ;;  %v1320_v1 = vcombine.low %v117_v53, %v125_v54  ;;  %v1322_v2 = vcombine.low %v118_v55, %v126_v56  ;;  %v119_v54 = vld [vmem:[%s1976_s1 + $0x330] sm:$0xff]  ;;  %v120_v56 = vld [vmem:[%s1976_s1 + $0x338] sm:$0xff] }
  0x40   :  { %v1339_v5 = vcombine.high %v134_v63, %v142_v0  ;;  %v127_v55 = vld [vmem:[%s1976_s1 + $0x370] sm:$0xff] }
  0x42   :  { %904 = vmatpush1.bf16.msra.mxu0 %v1332_v8  ;;  %947 = vmatpush1.bf16.msra.mxu1 %v1334_v9  ;;  %v24_v8 = vld [vmem:[%s1976_s1 + $0x38] sm:$0xff] }
  0x43   :  { %975 = vmatprep.subr.bf16.mxu0 %v1225_v11  ;;  %1018 = vmatprep.subr.bf16.mxu1 %v1227_v12  ;;  %v32_v9 = vld [vmem:[%s1976_s1 + $0x78] sm:$0xff]  ;;  %v1336_v11 = vcombine.low %v133_v61, %v141_v62  ;;  %v1338_v12 = vcombine.low %v134_v63, %v142_v0  ;;  %v135_v62 = vld [vmem:[%s1976_s1 + $0x3b0] sm:$0xff] }
  0x44   :  { %v1231_v14 = vcombine.high %v24_v8, %v32_v9  ;;  %v143_v63 = vld [vmem:[%s1976_s1 + $0x3f0] sm:$0xff]  ;;  %v136_v0 = vld [vmem:[%s1976_s1 + $0x3b8] sm:$0xff] }
  0x45   :  { %922 = vmatmul.mubr.bf16.vlgmr.msra.gmra.mrb[4].mxu0 %v1552_v10  ;;  %965 = vmatmul.mubr.bf16.vlgmr.msra.gmra.mrb[4].mxu1 %v1552_v10 }
  0x46   :  { %976 = vmatpush1.bf16.msra.mxu0 %v1224_v17  ;;  %1019 = vmatpush1.bf16.msra.mxu1 %v1226_v18  ;;  %v40_v17 = vld [vmem:[%s1976_s1 + $0xb8] sm:$0xff] }
  0x47   :  { %977 = vmatprep.subr.bf16.mxu0 %v1241_v19  ;;  %1020 = vmatprep.subr.bf16.mxu1 %v1243_v20  ;;  %v48_v18 = vld [vmem:[%s1976_s1 + $0xf8] sm:$0xff]  ;;  %v1228_v19 = vcombine.low %v23_v6, %v31_v7  ;;  %v1230_v20 = vcombine.low %v24_v8, %v32_v9  ;;  %v1340_v7 = vcombine.low %v135_v62, %v143_v63 }
  0x48   :  { %1007 = vmatprep.mubr.bf16.mxu0 %v1411_v3  ;;  %1050 = vmatprep.mubr.bf16.mxu1 %v1411_v3  ;;  %v1247_v22 = vcombine.high %v40_v17, %v48_v18 }
  0x4a   :  { %978 = vmatpush1.bf16.msra.mxu0 %v1240_v25  ;;  %1021 = vmatpush1.bf16.msra.mxu1 %v1242_v26  ;;  %v56_v25 = vld [vmem:[%s1976_s1 + $0x138] sm:$0xff] }
  0x4b   :  { %979 = vmatprep.subr.bf16.mxu0 %v1257_v27  ;;  %1022 = vmatprep.subr.bf16.mxu1 %v1259_v28  ;;  %v64_v26 = vld [vmem:[%s1976_s1 + $0x178] sm:$0xff]  ;;  %v1244_v27 = vcombine.low %v39_v15, %v47_v16  ;;  %v1246_v28 = vcombine.low %v40_v17, %v48_v18 }
  0x4c   :  { %v1263_v30 = vcombine.high %v56_v25, %v64_v26 }
  0x4e   :  { %980 = vmatpush1.bf16.msra.mxu0 %v1256_v33  ;;  %1023 = vmatpush1.bf16.msra.mxu1 %v1258_v34  ;;  %v72_v33 = vld [vmem:[%s1976_s1 + $0x1b8] sm:$0xff] }
  0x4f   :  { %981 = vmatprep.subr.bf16.mxu0 %v1273_v35  ;;  %1024 = vmatprep.subr.bf16.mxu1 %v1275_v36  ;;  %v80_v34 = vld [vmem:[%s1976_s1 + $0x1f8] sm:$0xff]  ;;  %v1260_v35 = vcombine.low %v55_v23, %v63_v24  ;;  %v1262_v36 = vcombine.low %v56_v25, %v64_v26 }
  0x50   :  { %v1279_v38 = vcombine.high %v72_v33, %v80_v34 }
  0x52   :  { %982 = vmatpush1.bf16.msra.mxu0 %v1272_v41  ;;  %1025 = vmatpush1.bf16.msra.mxu1 %v1274_v42  ;;  %v96_v41 = vld [vmem:[%s1976_s1 + $0x278] sm:$0xff]  ;;  %v1276_v42 = vcombine.low %v71_v31, %v79_v32 }
  0x53   :  { %983 = vmatprep.subr.bf16.mxu0 %v1289_v43  ;;  %1026 = vmatprep.subr.bf16.mxu1 %v1291_v44  ;;  %v1278_v43 = vcombine.low %v72_v33, %v80_v34  ;;  %v1293_v44 = vcombine.high %v87_v39, %v95_v40 }
  0x56   :  { %984 = vmatpush1.bf16.msra.mxu0 %v1288_v49  ;;  %1027 = vmatpush1.bf16.msra.mxu1 %v1290_v50  ;;  %v112_v49 = vld [vmem:[%s1976_s1 + $0x2f8] sm:$0xff]  ;;  %v1292_v50 = vcombine.low %v87_v39, %v95_v40 }
  0x57   :  { %985 = vmatprep.subr.bf16.mxu0 %v1305_v51  ;;  %1028 = vmatprep.subr.bf16.mxu1 %v1307_v52  ;;  %v1309_v52 = vcombine.high %v103_v46, %v111_v47  ;;  %v1311_v53 = vcombine.high %v104_v48, %v112_v49 }
  0x5a   :  { %986 = vmatpush1.bf16.msra.mxu0 %v1304_v57  ;;  %1029 = vmatpush1.bf16.msra.mxu1 %v1306_v58  ;;  %v128_v57 = vld [vmem:[%s1976_s1 + $0x378] sm:$0xff]  ;;  %v1308_v58 = vcombine.low %v103_v46, %v111_v47 }
  0x5b   :  { %987 = vmatprep.subr.bf16.mxu0 %v1321_v59  ;;  %1030 = vmatprep.subr.bf16.mxu1 %v1323_v60  ;;  %v1310_v59 = vcombine.low %v104_v48, %v112_v49  ;;  %v1325_v60 = vcombine.high %v119_v54, %v127_v55  ;;  %v1327_v61 = vcombine.high %v120_v56, %v128_v57 }
  0x5e   :  { %988 = vmatpush1.bf16.msra.mxu0 %v1320_v1  ;;  %1031 = vmatpush1.bf16.msra.mxu1 %v1322_v2  ;;  %v144_v1 = vld [vmem:[%s1976_s1 + $0x3f8] sm:$0xff]  ;;  %v1324_v2 = vcombine.low %v119_v54, %v127_v55 }
  0x5f   :  { %989 = vmatprep.subr.bf16.mxu0 %v1337_v4  ;;  %1032 = vmatprep.subr.bf16.mxu1 %v1339_v5  ;;  %v1326_v4 = vcombine.low %v120_v56, %v128_v57  ;;  %v1341_v5 = vcombine.high %v135_v62, %v143_v63  ;;  %v1343_v6 = vcombine.high %v136_v0, %v144_v1 }
  0x60   :  { %v1342_v8 = vcombine.low %v136_v0, %v144_v1 }
  0x62   :  { %990 = vmatpush1.bf16.msra.mxu0 %v1336_v11  ;;  %1033 = vmatpush1.bf16.msra.mxu1 %v1338_v12 }
  0x63   :  { %1061 = vmatprep.subr.bf16.mxu0 %v1229_v13  ;;  %1104 = vmatprep.subr.bf16.mxu1 %v1231_v14 }
  0x65   :  { %1008 = vmatmul.mubr.bf16.vlgmr.msra.gmra.mrb[8].mxu0 %v1552_v10  ;;  %1051 = vmatmul.mubr.bf16.vlgmr.msra.gmra.mrb[8].mxu1 %v1552_v10 }
  0x66   :  { %1062 = vmatpush1.bf16.msra.mxu0 %v1228_v19  ;;  %1105 = vmatpush1.bf16.msra.mxu1 %v1230_v20 }
  0x67   :  { %1063 = vmatprep.subr.bf16.mxu0 %v1245_v21  ;;  %1106 = vmatprep.subr.bf16.mxu1 %v1247_v22 }
  0x68   :  { %1093 = vmatprep.mubr.bf16.mxu0 %v1411_v3  ;;  %1136 = vmatprep.mubr.bf16.mxu1 %v1411_v3  ;;  %v88_v3 = vld [vmem:[%s1976_s1 + $0x238] sm:$0xff] }
  0x69   :  { %v1295_v45 = vcombine.high %v88_v3, %v96_v41  ;;  %v1294_v51 = vcombine.low %v88_v3, %v96_v41 }
  0x6a   :  { %1064 = vmatpush1.bf16.msra.mxu0 %v1244_v27  ;;  %1107 = vmatpush1.bf16.msra.mxu1 %v1246_v28 }
  0x6b   :  { %1065 = vmatprep.subr.bf16.mxu0 %v1261_v29  ;;  %1108 = vmatprep.subr.bf16.mxu1 %v1263_v30 }
  0x6e   :  { %1066 = vmatpush1.bf16.msra.mxu0 %v1260_v35  ;;  %1109 = vmatpush1.bf16.msra.mxu1 %v1262_v36 }
  0x6f   :  { %1067 = vmatprep.subr.bf16.mxu0 %v1277_v37  ;;  %1110 = vmatprep.subr.bf16.mxu1 %v1279_v38 }
  0x72   :  { %1068 = vmatpush1.bf16.msra.mxu0 %v1276_v42  ;;  %1111 = vmatpush1.bf16.msra.mxu1 %v1278_v43 }
  0x73   :  { %1069 = vmatprep.subr.bf16.mxu0 %v1293_v44  ;;  %1112 = vmatprep.subr.bf16.mxu1 %v1295_v45 }
  0x76   :  { %1070 = vmatpush1.bf16.msra.mxu0 %v1292_v50  ;;  %1113 = vmatpush1.bf16.msra.mxu1 %v1294_v51 }
  0x77   :  { %1071 = vmatprep.subr.bf16.mxu0 %v1309_v52  ;;  %1114 = vmatprep.subr.bf16.mxu1 %v1311_v53 }
  0x7a   :  { %1072 = vmatpush1.bf16.msra.mxu0 %v1308_v58  ;;  %1115 = vmatpush1.bf16.msra.mxu1 %v1310_v59 }
  0x7b   :  { %1073 = vmatprep.subr.bf16.mxu0 %v1325_v60  ;;  %1116 = vmatprep.subr.bf16.mxu1 %v1327_v61 }
  0x7e   :  { %1074 = vmatpush1.bf16.msra.mxu0 %v1324_v2  ;;  %1117 = vmatpush1.bf16.msra.mxu1 %v1326_v4 }
  0x7f   :  { %1075 = vmatprep.subr.bf16.mxu0 %v1341_v5  ;;  %1118 = vmatprep.subr.bf16.mxu1 %v1343_v6 }
  0x82   :  { %1076 = vmatpush1.bf16.msra.mxu0 %v1340_v7  ;;  %1119 = vmatpush1.bf16.msra.mxu1 %v1342_v8 }
  0x85   :  { %1094 = vmatmul.mubr.bf16.vlgmr.msra.gmra.mrb[12].mxu0 %v1552_v10  ;;  %1137 = vmatmul.mubr.bf16.vlgmr.msra.gmra.mrb[12].mxu1 %v1552_v10 }
  0x93   :  { %v1844_v9 = vpop.permute.xlu0 %149 }
  0x97   :  { %v1846_v12 = vpop.permute.xlu0 %154 }
  0xf8   :  { %v837_v11 = vpop.f32.mrb[0].mxu0  ;;  %v880_v14 = vpop.f32.mrb[0].mxu1 }
  0xf9   :  { %v838_v13 = vadd.f32 %v837_v11, %v1844_v9  ;;  %v839_v15 = vpop.f32.mrb[1].mxu0  ;;  %v881_v16 = vadd.f32 %v880_v14, %v1844_v9  ;;  %v882_v18 = vpop.f32.mrb[1].mxu1 }
  0xfa   :  { %v840_v17 = vadd.f32 %v839_v15, %v1844_v9  ;;  %v841_v19 = vpop.f32.mrb[2].mxu0  ;;  %v883_v20 = vadd.f32 %v882_v18, %v1844_v9  ;;  %v884_v21 = vpop.f32.mrb[2].mxu1 }
  0xfb   :  { %1347 = vtanh.f32 %v838_v13  ;;  %v842_v10 = vadd.f32 %v841_v19, %v1846_v12  ;;  %v843_v22 = vpop.f32.mrb[3].mxu0  ;;  %v885_v23 = vadd.f32 %v884_v21, %v1846_v12  ;;  %v886_v24 = vpop.f32.mrb[3].mxu1 }
  0xfc   :  { %1349 = vtanh.f32 %v881_v16  ;;  %v844_v25 = vadd.f32 %v843_v22, %v1846_v12  ;;  %v887_v26 = vadd.f32 %v886_v24, %v1846_v12 }
  0xfd   :  { %1351 = vtanh.f32 %v840_v17 }
  0xfe   :  { %1353 = vtanh.f32 %v883_v20 }
  0xff   :  { %1355 = vtanh.f32 %v842_v10 }
 0x100   :  { %1357 = vtanh.f32 %v885_v23 }
 0x101   :  { %1359 = vtanh.f32 %v844_v25 }
 0x102   :  { %1361 = vtanh.f32 %v887_v26 }
 0x105   :  { %v1348_v27 = vpop.eup %1347 }
 0x106   :  { %v1350_v28 = vpop.eup %1349  ;;  %1179 = vst [vmem:[%s1979_s3] sm:$0xff] %v1348_v27 }
 0x107   :  { %v1352_v29 = vpop.eup %1351  ;;  %1181 = vst [vmem:[%s1979_s3 + $0x10] sm:$0xff] %v1350_v28 }
 0x108   :  { %v1354_v30 = vpop.eup %1353  ;;  %1180 = vst [vmem:[%s1979_s3 + $0x8] sm:$0xff] %v1352_v29 }
 0x109   :  { %v1356_v31 = vpop.eup %1355  ;;  %1182 = vst [vmem:[%s1979_s3 + $0x18] sm:$0xff] %v1354_v30 }
 0x10a   :  { %v1358_v32 = vpop.eup %1357  ;;  %1195 = vst [vmem:[%s1979_s3 + $0x80] sm:$0xff] %v1356_v31 }
 0x10b   :  { %v1360_v33 = vpop.eup %1359  ;;  %1197 = vst [vmem:[%s1979_s3 + $0x90] sm:$0xff] %v1358_v32 }
 0x10c   :  { %v1362_v34 = vpop.eup %1361  ;;  %1196 = vst [vmem:[%s1979_s3 + $0x88] sm:$0xff] %v1360_v33 }
 0x10d   :  { %1198 = vst [vmem:[%s1979_s3 + $0x98] sm:$0xff] %v1362_v34 }
 0x118   :  { %v923_v35 = vpop.f32.mrb[4].mxu0  ;;  %v966_v37 = vpop.f32.mrb[4].mxu1 }
 0x119   :  { %v924_v36 = vadd.f32 %v923_v35, %v1844_v9  ;;  %v925_v38 = vpop.f32.mrb[5].mxu0  ;;  %v967_v39 = vadd.f32 %v966_v37, %v1844_v9  ;;  %v968_v3 = vpop.f32.mrb[5].mxu1 }
 0x11a   :  { %v926_v40 = vadd.f32 %v925_v38, %v1844_v9  ;;  %v927_v41 = vpop.f32.mrb[6].mxu0  ;;  %v969_v42 = vadd.f32 %v968_v3, %v1844_v9  ;;  %v970_v44 = vpop.f32.mrb[6].mxu1 }
 0x11b   :  { %1363 = vtanh.f32 %v924_v36  ;;  %v928_v43 = vadd.f32 %v927_v41, %v1846_v12  ;;  %v929_v45 = vpop.f32.mrb[7].mxu0  ;;  %v971_v46 = vadd.f32 %v970_v44, %v1846_v12  ;;  %v972_v47 = vpop.f32.mrb[7].mxu1 }
 0x11c   :  { %1365 = vtanh.f32 %v967_v39  ;;  %v930_v48 = vadd.f32 %v929_v45, %v1846_v12  ;;  %v973_v49 = vadd.f32 %v972_v47, %v1846_v12 }
 0x11d   :  { %1367 = vtanh.f32 %v926_v40 }
 0x11e   :  { %1369 = vtanh.f32 %v969_v42 }
 0x11f   :  { %1371 = vtanh.f32 %v928_v43 }
 0x120   :  { %1373 = vtanh.f32 %v971_v46 }
 0x121   :  { %1375 = vtanh.f32 %v930_v48 }
 0x122   :  { %1377 = vtanh.f32 %v973_v49 }
 0x125   :  { %v1364_v50 = vpop.eup %1363 }
 0x126   :  { %v1366_v51 = vpop.eup %1365  ;;  %1183 = vst [vmem:[%s1979_s3 + $0x20] sm:$0xff] %v1364_v50 }
 0x127   :  { %v1368_v52 = vpop.eup %1367  ;;  %1185 = vst [vmem:[%s1979_s3 + $0x30] sm:$0xff] %v1366_v51 }
 0x128   :  { %v1370_v53 = vpop.eup %1369  ;;  %1184 = vst [vmem:[%s1979_s3 + $0x28] sm:$0xff] %v1368_v52 }
 0x129   :  { %v1372_v54 = vpop.eup %1371  ;;  %1186 = vst [vmem:[%s1979_s3 + $0x38] sm:$0xff] %v1370_v53 }
 0x12a   :  { %v1374_v55 = vpop.eup %1373  ;;  %1199 = vst [vmem:[%s1979_s3 + $0xa0] sm:$0xff] %v1372_v54 }
 0x12b   :  { %v1376_v56 = vpop.eup %1375  ;;  %1201 = vst [vmem:[%s1979_s3 + $0xb0] sm:$0xff] %v1374_v55 }
 0x12c   :  { %v1378_v57 = vpop.eup %1377  ;;  %1200 = vst [vmem:[%s1979_s3 + $0xa8] sm:$0xff] %v1376_v56 }
 0x12d   :  { %1202 = vst [vmem:[%s1979_s3 + $0xb8] sm:$0xff] %v1378_v57 }
 0x138   :  { %v1009_v58 = vpop.f32.mrb[8].mxu0  ;;  %v1052_v60 = vpop.f32.mrb[8].mxu1 }
 0x139   :  { %v1010_v59 = vadd.f32 %v1009_v58, %v1844_v9  ;;  %v1011_v61 = vpop.f32.mrb[9].mxu0  ;;  %v1053_v62 = vadd.f32 %v1052_v60, %v1844_v9  ;;  %v1054_v0 = vpop.f32.mrb[9].mxu1 }
 0x13a   :  { %v1012_v63 = vadd.f32 %v1011_v61, %v1844_v9  ;;  %v1013_v1 = vpop.f32.mrb[10].mxu0  ;;  %v1055_v2 = vadd.f32 %v1054_v0, %v1844_v9  ;;  %v1056_v5 = vpop.f32.mrb[10].mxu1 }
 0x13b   :  { %1379 = vtanh.f32 %v1010_v59  ;;  %v1014_v4 = vadd.f32 %v1013_v1, %v1846_v12  ;;  %v1015_v6 = vpop.f32.mrb[11].mxu0  ;;  %v1057_v7 = vadd.f32 %v1056_v5, %v1846_v12  ;;  %v1058_v8 = vpop.f32.mrb[11].mxu1 }
 0x13c   :  { %1381 = vtanh.f32 %v1053_v62  ;;  %v1016_v11 = vadd.f32 %v1015_v6, %v1846_v12  ;;  %v1059_v13 = vadd.f32 %v1058_v8, %v1846_v12 }
 0x13d   :  { %1383 = vtanh.f32 %v1012_v63 }
 0x13e   :  { %1385 = vtanh.f32 %v1055_v2 }
 0x13f   :  { %1387 = vtanh.f32 %v1014_v4 }
 0x140   :  { %1389 = vtanh.f32 %v1057_v7 }
 0x141   :  { %1391 = vtanh.f32 %v1016_v11 }
 0x142   :  { %1393 = vtanh.f32 %v1059_v13 }
 0x145   :  { %v1380_v14 = vpop.eup %1379 }
 0x146   :  { %v1382_v15 = vpop.eup %1381  ;;  %1187 = vst [vmem:[%s1979_s3 + $0x40] sm:$0xff] %v1380_v14 }
 0x147   :  { %v1384_v16 = vpop.eup %1383  ;;  %1189 = vst [vmem:[%s1979_s3 + $0x50] sm:$0xff] %v1382_v15 }
 0x148   :  { %v1386_v17 = vpop.eup %1385  ;;  %1188 = vst [vmem:[%s1979_s3 + $0x48] sm:$0xff] %v1384_v16 }
 0x149   :  { %v1388_v18 = vpop.eup %1387  ;;  %1190 = vst [vmem:[%s1979_s3 + $0x58] sm:$0xff] %v1386_v17 }
 0x14a   :  { %v1390_v19 = vpop.eup %1389  ;;  %1203 = vst [vmem:[%s1979_s3 + $0xc0] sm:$0xff] %v1388_v18 }
 0x14b   :  { %v1392_v20 = vpop.eup %1391  ;;  %1205 = vst [vmem:[%s1979_s3 + $0xd0] sm:$0xff] %v1390_v19 }
 0x14c   :  { %v1394_v10 = vpop.eup %1393  ;;  %1204 = vst [vmem:[%s1979_s3 + $0xc8] sm:$0xff] %v1392_v20 }
 0x14d   :  { %1206 = vst [vmem:[%s1979_s3 + $0xd8] sm:$0xff] %v1394_v10 }
 0x158   :  { %v1095_v21 = vpop.f32.mrb[12].mxu0  ;;  %v1138_v23 = vpop.f32.mrb[12].mxu1 }
 0x159   :  { %v1096_v22 = vadd.f32 %v1095_v21, %v1844_v9  ;;  %v1097_v24 = vpop.f32.mrb[13].mxu0  ;;  %v1139_v25 = vadd.f32 %v1138_v23, %v1844_v9  ;;  %v1140_v27 = vpop.f32.mrb[13].mxu1 }
 0x15a   :  { %v1098_v26 = vadd.f32 %v1097_v24, %v1844_v9  ;;  %v1099_v28 = vpop.f32.mrb[14].mxu0  ;;  %v1141_v29 = vadd.f32 %v1140_v27, %v1844_v9  ;;  %v1142_v31 = vpop.f32.mrb[14].mxu1 }
 0x15b   :  { %1395 = vtanh.f32 %v1096_v22  ;;  %v1100_v30 = vadd.f32 %v1099_v28, %v1846_v12  ;;  %v1101_v32 = vpop.f32.mrb[15].mxu0  ;;  %v1143_v33 = vadd.f32 %v1142_v31, %v1846_v12  ;;  %v1144_v34 = vpop.f32.mrb[15].mxu1 }
 0x15c   :  { %1397 = vtanh.f32 %v1139_v25  ;;  %v1102_v35 = vadd.f32 %v1101_v32, %v1846_v12  ;;  %v1145_v36 = vadd.f32 %v1144_v34, %v1846_v12 }
 0x15d   :  { %1399 = vtanh.f32 %v1098_v26 }
 0x15e   :  { %1401 = vtanh.f32 %v1141_v29 }
 0x15f   :  { %1403 = vtanh.f32 %v1100_v30 }
 0x160   :  { %1405 = vtanh.f32 %v1143_v33 }
 0x161   :  { %1407 = vtanh.f32 %v1102_v35 }
 0x162   :  { %1409 = vtanh.f32 %v1145_v36 }
 0x165   :  { %v1396_v37 = vpop.eup %1395 }
 0x166   :  { %v1398_v9 = vpop.eup %1397  ;;  %1191 = vst [vmem:[%s1979_s3 + $0x60] sm:$0xff] %v1396_v37 }
 0x167   :  { %v1400_v38 = vpop.eup %1399  ;;  %1193 = vst [vmem:[%s1979_s3 + $0x70] sm:$0xff] %v1398_v9 }
 0x168   :  { %v1402_v39 = vpop.eup %1401  ;;  %1192 = vst [vmem:[%s1979_s3 + $0x68] sm:$0xff] %v1400_v38 }
 0x169   :  { %v1404_v12 = vpop.eup %1403  ;;  %1194 = vst [vmem:[%s1979_s3 + $0x78] sm:$0xff] %v1402_v39 }
 0x16a   :  { %v1406_v40 = vpop.eup %1405  ;;  %1207 = vst [vmem:[%s1979_s3 + $0xe0] sm:$0xff] %v1404_v12 }
 0x16b   :  { %v1408_v3 = vpop.eup %1407  ;;  %1209 = vst [vmem:[%s1979_s3 + $0xf0] sm:$0xff] %v1406_v40 }
 0x16c   :  { %v1410_v41 = vpop.eup %1409  ;;  %1208 = vst [vmem:[%s1979_s3 + $0xe8] sm:$0xff] %v1408_v3 }
 0x16d   :  { %1210 = vst [vmem:[%s1979_s3 + $0xf8] sm:$0xff] %v1410_v41 }

</bundles_post_ra>
